<compile_context>
chip_gen: v7x
topology: tpu7x:2x2x1
jax: 0.10.0
libtpu: 0.0.40
codegen_flags: <defaults>
</compile_context>

<pallas_src>
import math
from functools import partial

import jax
import jax.numpy as jnp
from jax.experimental import pallas as pl
from jax.experimental.pallas import tpu as pltpu

LN_EPS = 1e-5
NEG_INF = -1e9   # TODO(synk): masks use -1e9 instead of -inf for softmax robustness.


# ------------------------- in-kernel building blocks -------------------------

def _mm(x, w, b=None):
    """bf16 MXU matmul with f32 accumulation; optional fused bias add."""
    y = jnp.dot(x.astype(jnp.bfloat16), w.astype(jnp.bfloat16),
                preferred_element_type=jnp.float32)
    if b is not None:
        y = y + b
    return y


def _layernorm(x, g, b):
    mean = jnp.mean(x, axis=-1, keepdims=True)
    var = jnp.mean(jnp.square(x - mean), axis=-1, keepdims=True)
    return (x - mean) * jax.lax.rsqrt(var + LN_EPS) * g + b


def _softmax_rows(s):
    m = jnp.max(s, axis=-1, keepdims=True)
    p = jnp.exp(s - m)
    denom = jnp.sum(p, axis=-1, keepdims=True)
    return p * pl.reciprocal(denom, approx=True)


def _sdpa_into_scratch(q, k, v, scr, *, nhead, B, Tq, Tk, kp_bias=None, causal=False):
    """Per-batch, per-head scaled dot-product attention.

    q: (B*Tq, D), k/v: (B*Tk, D) f32.  Writes the (B*Tq, D) result into the VMEM
    scratch ref `scr` via static row/lane slices (no concatenate).  K is transposed
    once per batch, not once per head.
    """
    D = q.shape[-1]
    dh = D // nhead
    scale = 1.0 / math.sqrt(dh)

    causal_bias = None
    if causal:
        row = jax.lax.broadcasted_iota(jnp.int32, (Tq, Tk), 0)
        col = jax.lax.broadcasted_iota(jnp.int32, (Tq, Tk), 1)
        causal_bias = jnp.where(col > row, NEG_INF, 0.0)

    for b in range(B):                     # B is small & static -> unrolled
        qs = slice(b * Tq, (b + 1) * Tq)
        ks = slice(b * Tk, (b + 1) * Tk)
        q_b = q[qs].astype(jnp.bfloat16)                     # (Tq, D)
        kT_b = k[ks].T.astype(jnp.bfloat16)                  # (D, Tk) one transpose
        v_b = v[ks].astype(jnp.bfloat16)                     # (Tk, D)

        bias = causal_bias
        if kp_bias is not None:
            kb = kp_bias[b:b + 1, :]                         # (1, Tk) key-padding bias
            bias = kb if bias is None else bias + kb

        for h in range(nhead):             # static unroll; writes go to lane slices
            hs = slice(h * dh, (h + 1) * dh)
            s = jnp.dot(q_b[:, hs], kT_b[hs, :],
                        preferred_element_type=jnp.float32) * scale
            if bias is not None:
                s = s + bias
            p = _softmax_rows(s)
            pv = jnp.dot(p.astype(jnp.bfloat16), v_b[:, hs],
                         preferred_element_type=jnp.float32)   # (Tq, dh)
            scr[qs, hs] = pv


# ------------------------------- Pallas kernels ------------------------------

def _src_embed_kernel(x_ref, w_ref, b_ref, pe_ref, o_ref, *, B, Ts):
    # custom_src_module Linear(input_size -> d_model) + positional encoding, fused.
    y = _mm(x_ref[...], w_ref[...], b_ref[...])              # (B*Ts, D) f32
    pe = pe_ref[...]                                         # (Ts, D)
    for b in range(B):
        rs = slice(b * Ts, (b + 1) * Ts)
        o_ref[rs, :] = (y[rs, :] + pe).astype(o_ref.dtype)


def _encoder_stack_kernel(x_ref, wat_ref, wf1_ref, wf2_ref, vec_ref, fln_ref,
                          o_ref, x_scr, attn_scr,
                          *, nhead, B, T, D, dff, apply_final_ln):
    """One grid step == one post-norm encoder layer; activation stays in x_scr."""
    l = pl.program_id(0)

    @pl.when(l == 0)
    def _():
        x_scr[...] = x_ref[...].astype(jnp.float32)

    x = x_scr[...]                                           # (B*T, D) f32
    w_attn = wat_ref[0]                                      # (D, 4D) = [in_proj | out_proj]
    w_f1 = wf1_ref[0]                                        # (D, dff)
    w_f2 = wf2_ref[0]                                        # (dff, D)
    v = vec_ref[0]                                           # (8, vw) packed vectors

    in_b = v[0:1, :3 * D]
    out_b = v[1:2, :D]
    fb1 = v[2:3, :dff]
    fb2 = v[3:4, :D]
    g1, b1 = v[4:5, :D], v[5:6, :D]
    g2, b2 = v[6:7, :D], v[7:8, :D]

    # --- self-attention (no src mask: wav_len is None) ---
    qkv = _mm(x, w_attn[:, :3 * D], in_b)                    # fused QKV on whole slab
    q, k, vv = qkv[:, :D], qkv[:, D:2 * D], qkv[:, 2 * D:]
    _sdpa_into_scratch(q, k, vv, attn_scr, nhead=nhead, B=B, Tq=T, Tk=T)
    attn = _mm(attn_scr[...], w_attn[:, 3 * D:], out_b)
    x = _layernorm(x + attn, g1, b1)

    # --- FFN (ReLU) ---
    h = jnp.maximum(_mm(x, w_f1, fb1), 0.0)
    h = _mm(h, w_f2, fb2)
    x = _layernorm(x + h, g2, b2)
    x_scr[...] = x

    @pl.when(l == pl.num_programs(0) - 1)
    def _():
        out = x_scr[...]
        if apply_final_ln:                                   # fused final LayerNorm
            out = _layernorm(out, fln_ref[0:1, :], fln_ref[1:2, :])
        o_ref[...] = out.astype(o_ref.dtype)


def _decoder_stack_kernel(t_ref, m_ref, kp_ref, wsa_ref, wca_ref, wf1_ref,
                          wf2_ref, vec_ref, fln_ref, o_ref, y_scr, attn_scr,
                          *, nhead, B, Tt, Ts, D, dff, apply_final_ln):
    """One grid step == one post-norm decoder layer; activation stays in y_scr."""
    l = pl.program_id(0)

    @pl.when(l == 0)
    def _():
        y_scr[...] = t_ref[...].astype(jnp.float32)

    y = y_scr[...]                                           # (B*Tt, D) f32
    mem = m_ref[...]                                         # (B*Ts, D) bf16
    kp = kp_ref[...]                                         # (B, Tt) additive bias

    w_sa = wsa_ref[0]
    w_ca = wca_ref[0]
    w_f1 = wf1_ref[0]
    w_f2 = wf2_ref[0]
    v = vec_ref[0]                                           # (12, vw)

    sa_in_b, sa_out_b = v[0:1, :3 * D], v[1:2, :D]
    ca_in_b, ca_out_b = v[2:3, :3 * D], v[3:4, :D]
    fb1, fb2 = v[4:5, :dff], v[5:6, :D]
    g1, b1 = v[6:7, :D], v[7:8, :D]
    g2, b2 = v[8:9, :D], v[9:10, :D]
    g3, b3 = v[10:11, :D], v[11:12, :D]

    # --- masked self-attention (causal + tgt key-padding, built in-register) ---
    qkv = _mm(y, w_sa[:, :3 * D], sa_in_b)
    q, k, vv = qkv[:, :D], qkv[:, D:2 * D], qkv[:, 2 * D:]
    _sdpa_into_scratch(q, k, vv, attn_scr, nhead=nhead, B=B, Tq=Tt, Tk=Tt,
                       kp_bias=kp, causal=True)
    sa = _mm(attn_scr[...], w_sa[:, 3 * D:], sa_out_b)
    y = _layernorm(y + sa, g1, b1)

    # --- cross-attention over encoder memory (no memory mask: wav_len is None) ---
    q = _mm(y, w_ca[:, :D], ca_in_b[:, :D])
    kv = _mm(mem, w_ca[:, D:3 * D], ca_in_b[:, D:])
    k, vv = kv[:, :D], kv[:, D:]
    _sdpa_into_scratch(q, k, vv, attn_scr, nhead=nhead, B=B, Tq=Tt, Tk=Ts)
    ca = _mm(attn_scr[...], w_ca[:, 3 * D:], ca_out_b)
    y = _layernorm(y + ca, g2, b2)

    # --- FFN (ReLU) ---
    h = jnp.maximum(_mm(y, w_f1, fb1), 0.0)
    h = _mm(h, w_f2, fb2)
    y = _layernorm(y + h, g3, b3)
    y_scr[...] = y

    @pl.when(l == pl.num_programs(0) - 1)
    def _():
        out = y_scr[...]
        if apply_final_ln:                                   # fused final LayerNorm
            out = _layernorm(out, fln_ref[0:1, :], fln_ref[1:2, :])
        o_ref[...] = out.astype(o_ref.dtype)


# ------------------------------- call wrappers -------------------------------

_COMPILER_PARAMS = pltpu.CompilerParams(
    dimension_semantics=("arbitrary",),          # layer axis is a serial dependency
    vmem_limit_bytes=32 * 1024 * 1024)           # explicit budget (safe on v5e/v6e/v7x)


def _pack_rows(rows, width):
    """Pack small 1-row params into one (n_rows, width) f32 array (sliced in-kernel)."""
    out = []
    for r in rows:
        r = jnp.asarray(r, jnp.float32).reshape(1, -1)
        if r.shape[1] < width:
            r = jnp.pad(r, ((0, 0), (0, width - r.shape[1])))
        out.append(r)
    return jnp.concatenate(out, axis=0)


def src_embed(src_flat, w, b, pe, *, B, Ts):
    BT, _ = src_flat.shape
    D = w.shape[1]
    return pl.pallas_call(
        partial(_src_embed_kernel, B=B, Ts=Ts),
        out_shape=jax.ShapeDtypeStruct((BT, D), jnp.bfloat16),
    )(src_flat, w, b, pe)


def encoder_stack(x, layers, nhead, fin_g, fin_b, *, B, T, apply_final_ln, out_dtype):
    BT, D = x.shape
    L = len(layers)
    dff = layers[0]['ffn_w1'].shape[1]
    vw = max(3 * D, dff)
    dh = D // nhead

    w_attn = jnp.stack([jnp.concatenate([lp['in_w'], lp['out_w']], axis=1)
                        for lp in layers])                      # (L, D, 4D) bf16
    w_f1 = jnp.stack([lp['ffn_w1'] for lp in layers])           # (L, D, dff)
    w_f2 = jnp.stack([lp['ffn_w2'] for lp in layers])           # (L, dff, D)
    vecs = jnp.stack([_pack_rows([lp['in_b'], lp['out_b'], lp['ffn_b1'], lp['ffn_b2'],
                                  lp['norm1_g'], lp['norm1_b'],
                                  lp['norm2_g'], lp['norm2_b']], vw)
                      for lp in layers])                        # (L, 8, vw) f32
    fin = jnp.concatenate([fin_g, fin_b], axis=0)               # (2, D) f32

    flops = L * (2 * BT * D * 3 * D + 2 * BT * D * D
                 + 4 * B * nhead * T * T * dh + 4 * BT * D * dff)
    trans = L * B * nhead * T * T
    bytes_acc = (BT * D * 2 + w_attn.size * 2 + w_f1.size * 2 + w_f2.size * 2
                 + vecs.size * 4 + fin.size * 4 + BT * D * jnp.dtype(out_dtype).itemsize)

    kernel = partial(_encoder_stack_kernel, nhead=nhead, B=B, T=T, D=D,
                     dff=dff, apply_final_ln=apply_final_ln)
    return pl.pallas_call(
        kernel,
        out_shape=jax.ShapeDtypeStruct((BT, D), out_dtype),
        grid=(L,),
        in_specs=[
            pl.BlockSpec((BT, D), lambda l: (0, 0)),             # resident activation in
            pl.BlockSpec((1, D, 4 * D), lambda l: (l, 0, 0)),    # per-layer attn weights
            pl.BlockSpec((1, D, dff), lambda l: (l, 0, 0)),
            pl.BlockSpec((1, dff, D), lambda l: (l, 0, 0)),
            pl.BlockSpec((1, 8, vw), lambda l: (l, 0, 0)),       # packed small params
            pl.BlockSpec((2, D), lambda l: (0, 0)),              # fused final LN params
        ],
        out_specs=pl.BlockSpec((BT, D), lambda l: (0, 0)),
        scratch_shapes=[pltpu.VMEM((BT, D), jnp.float32),        # f32 activation carry
                        pltpu.VMEM((BT, D), jnp.float32)],       # per-head attn output
        compiler_params=_COMPILER_PARAMS,
        cost_estimate=pl.CostEstimate(flops=int(flops), transcendentals=int(trans),
                                      bytes_accessed=int(bytes_acc)),
    )(x, w_attn, w_f1, w_f2, vecs, fin)


def decoder_stack(tgt, mem, kp_bias, layers, nhead, fin_g, fin_b,
                  *, B, Tt, Ts, apply_final_ln, out_dtype):
    BTt, D = tgt.shape
    L = len(layers)
    dff = layers[0]['ffn_w1'].shape[1]
    vw = max(3 * D, dff)
    dh = D // nhead

    w_sa = jnp.stack([jnp.concatenate([lp['sa_in_w'], lp['sa_out_w']], axis=1)
                      for lp in layers])                        # (L, D, 4D)
    w_ca = jnp.stack([jnp.concatenate([lp['ca_in_w'], lp['ca_out_w']], axis=1)
                      for lp in layers])                        # (L, D, 4D)
    w_f1 = jnp.stack([lp['ffn_w1'] for lp in layers])
    w_f2 = jnp.stack([lp['ffn_w2'] for lp in layers])
    vecs = jnp.stack([_pack_rows([lp['sa_in_b'], lp['sa_out_b'],
                                  lp['ca_in_b'], lp['ca_out_b'],
                                  lp['ffn_b1'], lp['ffn_b2'],
                                  lp['norm1_g'], lp['norm1_b'],
                                  lp['norm2_g'], lp['norm2_b'],
                                  lp['norm3_g'], lp['norm3_b']], vw)
                      for lp in layers])                        # (L, 12, vw)
    fin = jnp.concatenate([fin_g, fin_b], axis=0)               # (2, D)

    BTs = mem.shape[0]
    flops = L * (2 * BTt * D * 3 * D + 2 * BTt * D * D            # self-attn proj
                 + 4 * B * nhead * Tt * Tt * dh                   # self-attn sdpa
                 + 2 * BTt * D * D + 2 * BTs * D * 2 * D + 2 * BTt * D * D  # cross proj
                 + 4 * B * nhead * Tt * Ts * dh                   # cross sdpa
                 + 4 * BTt * D * dff)                             # ffn
    trans = L * B * nhead * (Tt * Tt + Tt * Ts)
    bytes_acc = (BTt * D * 2 + BTs * D * 2 + kp_bias.size * 4
                 + w_sa.size * 2 + w_ca.size * 2 + w_f1.size * 2 + w_f2.size * 2
                 + vecs.size * 4 + fin.size * 4
                 + BTt * D * jnp.dtype(out_dtype).itemsize)

    kernel = partial(_decoder_stack_kernel, nhead=nhead, B=B, Tt=Tt, Ts=Ts, D=D,
                     dff=dff, apply_final_ln=apply_final_ln)
    return pl.pallas_call(
        kernel,
        out_shape=jax.ShapeDtypeStruct((BTt, D), out_dtype),
        grid=(L,),
        in_specs=[
            pl.BlockSpec((BTt, D), lambda l: (0, 0)),            # resident tgt activation
            pl.BlockSpec((BTs, D), lambda l: (0, 0)),            # encoder memory (bf16)
            pl.BlockSpec((B, Tt), lambda l: (0, 0)),             # key-padding bias
            pl.BlockSpec((1, D, 4 * D), lambda l: (l, 0, 0)),
            pl.BlockSpec((1, D, 4 * D), lambda l: (l, 0, 0)),
            pl.BlockSpec((1, D, dff), lambda l: (l, 0, 0)),
            pl.BlockSpec((1, dff, D), lambda l: (l, 0, 0)),
            pl.BlockSpec((1, 12, vw), lambda l: (l, 0, 0)),
            pl.BlockSpec((2, D), lambda l: (0, 0)),
        ],
        out_specs=pl.BlockSpec((BTt, D), lambda l: (0, 0)),
        scratch_shapes=[pltpu.VMEM((BTt, D), jnp.float32),
                        pltpu.VMEM((BTt, D), jnp.float32)],
        compiler_params=_COMPILER_PARAMS,
        cost_estimate=pl.CostEstimate(flops=int(flops), transcendentals=int(trans),
                                      bytes_accessed=int(bytes_acc)),
    )(tgt, mem, kp_bias, w_sa, w_ca, w_f1, w_f2, vecs, fin)


# --------------------------------- forward -----------------------------------

def positional_encoding(max_len, d_model):
    pos = jnp.arange(max_len, dtype=jnp.float32)[:, None]
    denom = jnp.exp(jnp.arange(0, d_model, 2, dtype=jnp.float32)
                    * (-math.log(10000.0) / d_model))
    pe = jnp.zeros((max_len, d_model), jnp.float32)
    pe = pe.at[:, 0::2].set(jnp.sin(pos * denom))
    pe = pe.at[:, 1::2].set(jnp.cos(pos * denom))
    return pe


def transformer_asr_forward(params, src, tgt, cfg):
    D = cfg['d_model']

    # ---- encode() ----
    if src.ndim == 4:                       # (B, T, ch1, ch2) -> (B, T, ch1*ch2)
        B, T, c1, c2 = src.shape
        src = src.reshape(B, T, c1 * c2)
    B, Ts, F = src.shape

    x = src_embed(src.reshape(B * Ts, F), params['src_w'], params['src_b'],
                  params['pos_enc'][:Ts], B=B, Ts=Ts)          # (B*Ts, D) bf16

    # Group consecutive encoder layers with identical (nhead, dff) into one fused call.
    enc_layers = params['enc_layers']
    n_enc = len(enc_layers)
    sig = [(cfg['encoder_heads'][i], enc_layers[i]['ffn_w1'].shape[1])
           for i in range(n_enc)]
    groups, start = [], 0
    for i in range(1, n_enc + 1):
        if i == n_enc or sig[i] != sig[start]:
            groups.append((start, i))
            start = i
    for gi, (s, e) in enumerate(groups):
        last = gi == len(groups) - 1
        x = encoder_stack(x, enc_layers[s:e], cfg['encoder_heads'][s],
                          params['enc_norm_g'], params['enc_norm_b'],
                          B=B, T=Ts, apply_final_ln=last,
                          out_dtype=jnp.float32 if last else jnp.bfloat16)
    enc_flat = x                                               # (B*Ts, D) f32
    encoder_out = enc_flat.reshape(B, Ts, D)

    # ---- decode path ----
    Tt = tgt.shape[1]
    # NormalizedEmbedding: emb(tgt) * sqrt(d_model) + positional encoding.
    # TODO(synk): token gather left to XLA (jnp.take); a Pallas gather kernel is not
    # worthwhile at this vocab/sequence size.
    y = jnp.take(params['emb_table'], tgt, axis=0).astype(jnp.float32)
    y = y * math.sqrt(D) + params['pos_enc'][:Tt][None, :, :]
    y_flat = y.reshape(B * Tt, D).astype(jnp.bfloat16)

    # get_key_padding_mask as a tiny additive bias (consumed in-kernel per batch).
    kp_bias = jnp.where(tgt == cfg['pad_idx'], NEG_INF, 0.0).astype(jnp.float32)

    dec_flat = decoder_stack(y_flat, enc_flat.astype(jnp.bfloat16), kp_bias,
                             params['dec_layers'], cfg['nhead'],
                             params['dec_norm_g'], params['dec_norm_b'],
                             B=B, Tt=Tt, Ts=Ts, apply_final_ln=True,
                             out_dtype=jnp.float32)
    decoder_out = dec_flat.reshape(B, Tt, D)
    return encoder_out, decoder_out


# ------------------------------ parameter init --------------------------------

def init_params(key, cfg, input_size):
    D = cfg['d_model']
    keys = iter(jax.random.split(key, 256))

    def xavier(shape):
        fan_in, fan_out = shape
        std = math.sqrt(2.0 / (fan_in + fan_out))
        # matmul weights stored in bf16 (MXU operand dtype); accumulation stays f32.
        return (std * jax.random.normal(next(keys), shape, jnp.float32)
                ).astype(jnp.bfloat16)

    def zeros(shape):
        return jnp.zeros(shape, jnp.float32)

    def ones(shape):
        return jnp.ones(shape, jnp.float32)

    # NOTE: in_proj convention is x @ W with W:(D,3D); transpose when loading real
    # PyTorch checkpoints (in_proj_weight:(3D,D)).
    def attn(prefix):
        return {prefix + 'in_w': xavier((D, 3 * D)),
                prefix + 'in_b': zeros((1, 3 * D)),
                prefix + 'out_w': xavier((D, D)),
                prefix + 'out_b': zeros((1, D))}

    params = dict(
        src_w=xavier((input_size, D)), src_b=zeros((1, D)),
        emb_table=xavier((cfg['tgt_vocab'], D)),
        pos_enc=positional_encoding(cfg['max_length'], D),
        enc_norm_g=ones((1, D)), enc_norm_b=zeros((1, D)),
        dec_norm_g=ones((1, D)), dec_norm_b=zeros((1, D)),
    )

    enc_layers = []
    for i in range(cfg['num_encoder_layers']):
        dff = D * cfg['mlp_ratio'][i]
        lp = attn('')
        lp.update(dict(
            ffn_w1=xavier((D, dff)), ffn_b1=zeros((1, dff)),
            ffn_w2=xavier((dff, D)), ffn_b2=zeros((1, D)),
            norm1_g=ones((1, D)), norm1_b=zeros((1, D)),
            norm2_g=ones((1, D)), norm2_b=zeros((1, D)),
        ))
        enc_layers.append(lp)
    params['enc_layers'] = enc_layers

    dec_layers = []
    for _ in range(cfg['num_decoder_layers']):
        dff = cfg['d_ffn']
        lp = {}
        lp.update(attn('sa_'))
        lp.update(attn('ca_'))
        lp.update(dict(
            ffn_w1=xavier((D, dff)), ffn_b1=zeros((1, dff)),
            ffn_w2=xavier((dff, D)), ffn_b2=zeros((1, D)),
            norm1_g=ones((1, D)), norm1_b=zeros((1, D)),
            norm2_g=ones((1, D)), norm2_b=zeros((1, D)),
            norm3_g=ones((1, D)), norm3_b=zeros((1, D)),
        ))
        dec_layers.append(lp)
    params['dec_layers'] = dec_layers
    return params


# ----------------------------------- main -------------------------------------

if __name__ == "__main__":
    # Lane-dense demo config: d_model and d_ffn are multiples of 128 (the real
    # supernet dims 512 / 2048 already satisfy this).
    cfg = dict(tgt_vocab=16, d_model=128, encoder_heads=[4, 4], nhead=4,
               num_encoder_layers=2, num_decoder_layers=2,
               mlp_ratio=[2, 2], d_ffn=256, pad_idx=0, max_length=64)
    input_size = 4 * 5

    key = jax.random.PRNGKey(0)
    k_src, k_tgt, k_par = jax.random.split(key, 3)
    # src arrives 4D (B, T_src, ch1, ch2) and is flattened inside the forward.
    src = jax.random.normal(k_src, (2, 8, 4, 5), dtype=jnp.float32)
    tgt = jax.random.randint(k_tgt, (2, 6), 1, cfg['tgt_vocab'])  # tokens, pad_idx=0

    params = init_params(k_par, cfg, input_size)

    fwd = jax.jit(lambda p, s, t: transformer_asr_forward(p, s, t, cfg))
    enc_out, dec_out = fwd(params, src, tgt)
    jax.block_until_ready((enc_out, dec_out))

    assert enc_out.shape == (2, 8, cfg['d_model'])
    assert dec_out.shape == (2, 6, cfg['d_model'])
    print("KERNEL_OK")
</pallas_src>

<mosaic_0001>
module attributes {stable_mosaic.version = 11 : i64} {
  func.func @_src_embed_kernel(%arg0: memref<16x20xf32, #tpu.memory_space<vmem>>, %arg1: memref<20x128xbf16, #tpu.memory_space<vmem>>, %arg2: memref<1x128xf32, #tpu.memory_space<vmem>>, %arg3: memref<8x128xf32, #tpu.memory_space<vmem>>, %arg4: memref<16x128xbf16, #tpu.memory_space<vmem>>) attributes {dimension_semantics = [], scalar_prefetch = 0 : i64, scratch_operands = 0 : i64, tpu.core_type = #tpu.core_type<tc>} {
    %c0 = arith.constant 0 : index
    %c0_0 = arith.constant 0 : index
    %0 = vector.load %arg0[%c0, %c0_0] : memref<16x20xf32, #tpu.memory_space<vmem>>, vector<16x20xf32>
    %c0_1 = arith.constant 0 : index
    %c0_2 = arith.constant 0 : index
    %1 = vector.load %arg1[%c0_1, %c0_2] : memref<20x128xbf16, #tpu.memory_space<vmem>>, vector<20x128xbf16>
    %c0_3 = arith.constant 0 : index
    %c0_4 = arith.constant 0 : index
    %2 = vector.load %arg2[%c0_3, %c0_4] : memref<1x128xf32, #tpu.memory_space<vmem>>, vector<1x128xf32>
    %3 = arith.truncf %0 : vector<16x20xf32> to vector<16x20xbf16>
    %cst = arith.constant dense<0.000000e+00> : vector<16x128xf32>
    %4 = tpu.matmul %3, %1, %cst {dimension_numbers = #tpu.dot_dimension_numbers<[1], [0], [0], [1], [0, 0, 1, 1], [], []>} : vector<16x20xbf16>, vector<20x128xbf16>, vector<16x128xf32> -> vector<16x128xf32>
    %5 = vector.broadcast %2 : vector<1x128xf32> to vector<16x128xf32>
    %6 = arith.addf %4, %5 : vector<16x128xf32>
    %c0_5 = arith.constant 0 : index
    %c0_6 = arith.constant 0 : index
    %7 = vector.load %arg3[%c0_5, %c0_6] : memref<8x128xf32, #tpu.memory_space<vmem>>, vector<8x128xf32>
    %8 = vector.extract_strided_slice %6 {offsets = [0, 0], sizes = [8, 128], strides = [1, 1]} : vector<16x128xf32> to vector<8x128xf32>
    %9 = arith.addf %8, %7 : vector<8x128xf32>
    %10 = arith.truncf %9 : vector<8x128xf32> to vector<8x128xbf16>
    %c0_7 = arith.constant 0 : index
    %c0_8 = arith.constant 0 : index
    %11 = vector.load %arg4[%c0_7, %c0_8] : memref<16x128xbf16, #tpu.memory_space<vmem>>, vector<8x128xbf16>
    tpu.vector_store %arg4[%c0_7, %c0_8], %10 {strides = array<i32>} : memref<16x128xbf16, #tpu.memory_space<vmem>>, vector<8x128xbf16>,
    %12 = vector.extract_strided_slice %6 {offsets = [8, 0], sizes = [8, 128], strides = [1, 1]} : vector<16x128xf32> to vector<8x128xf32>
    %13 = arith.addf %12, %7 : vector<8x128xf32>
    %14 = arith.truncf %13 : vector<8x128xf32> to vector<8x128xbf16>
    %c8 = arith.constant 8 : index
    %c0_9 = arith.constant 0 : index
    %15 = vector.load %arg4[%c8, %c0_9] : memref<16x128xbf16, #tpu.memory_space<vmem>>, vector<8x128xbf16>
    tpu.vector_store %arg4[%c8, %c0_9], %14 {strides = array<i32>} : memref<16x128xbf16, #tpu.memory_space<vmem>>, vector<8x128xbf16>,
    return
  }
}

module attributes {stable_mosaic.version = 11 : i64} {
  func.func @_encoder_stack_kernel(%arg0: i32, %arg1: memref<16x128xbf16, #tpu.memory_space<vmem>>, %arg2: memref<1x128x512xbf16, #tpu.memory_space<vmem>>, %arg3: memref<1x128x256xbf16, #tpu.memory_space<vmem>>, %arg4: memref<1x256x128xbf16, #tpu.memory_space<vmem>>, %arg5: memref<1x8x384xf32, #tpu.memory_space<vmem>>, %arg6: memref<2x128xf32, #tpu.memory_space<vmem>>, %arg7: memref<16x128xf32, #tpu.memory_space<vmem>>, %arg8: memref<16x128xf32, #tpu.memory_space<vmem>>, %arg9: memref<16x128xf32, #tpu.memory_space<vmem>>) attributes {dimension_semantics = [#tpu.dimension_semantics<arbitrary>], iteration_bounds = array<i64: 2>, scalar_prefetch = 0 : i64, scratch_operands = 2 : i64, tpu.core_type = #tpu.core_type<tc>, window_params = [{pipeline_mode = #tpu.pipeline_mode<synchronous>, transform_indices = @transform_0, window_bounds = array<i64: 16, 128>}, {transform_indices = @transform_1, window_bounds = array<i64: 1, 128, 512>}, {transform_indices = @transform_2, window_bounds = array<i64: 1, 128, 256>}, {transform_indices = @transform_3, window_bounds = array<i64: 1, 256, 128>}, {transform_indices = @transform_4, window_bounds = array<i64: 1, 8, 384>}, {pipeline_mode = #tpu.pipeline_mode<synchronous>, transform_indices = @transform_5, window_bounds = array<i64: 2, 128>}, {pipeline_mode = #tpu.pipeline_mode<synchronous>, transform_indices = @transform_6, window_bounds = array<i64: 16, 128>}]} {
    %c0_i32 = arith.constant 0 : i32
    %0 = arith.cmpi eq, %arg0, %c0_i32 : i32
    %1 = arith.extui %0 : i1 to i32
    %c0_i32_0 = arith.constant 0 : i32
    %2 = arith.cmpi ne, %1, %c0_i32_0 : i32
    scf.if %2 {
      %c0_85 = arith.constant 0 : index
      %c0_86 = arith.constant 0 : index
      %260 = vector.load %arg1[%c0_85, %c0_86] : memref<16x128xbf16, #tpu.memory_space<vmem>>, vector<16x128xbf16>
      %261 = arith.extf %260 : vector<16x128xbf16> to vector<16x128xf32>
      %c0_87 = arith.constant 0 : index
      %c0_88 = arith.constant 0 : index
      %262 = vector.load %arg8[%c0_87, %c0_88] : memref<16x128xf32, #tpu.memory_space<vmem>>, vector<16x128xf32>
      tpu.vector_store %arg8[%c0_87, %c0_88], %261 {strides = array<i32>} : memref<16x128xf32, #tpu.memory_space<vmem>>, vector<16x128xf32>,
    } else {
    }
    %c0 = arith.constant 0 : index
    %c0_1 = arith.constant 0 : index
    %3 = vector.load %arg8[%c0, %c0_1] : memref<16x128xf32, #tpu.memory_space<vmem>>, vector<16x128xf32>
    %c0_2 = arith.constant 0 : index
    %c0_3 = arith.constant 0 : index
    %c0_4 = arith.constant 0 : index
    %4 = vector.load %arg2[%c0_2, %c0_3, %c0_4] : memref<1x128x512xbf16, #tpu.memory_space<vmem>>, vector<1x128x512xbf16>
    %5 = vector.shape_cast %4 : vector<1x128x512xbf16> to vector<128x512xbf16>
    %c0_5 = arith.constant 0 : index
    %c0_6 = arith.constant 0 : index
    %c0_7 = arith.constant 0 : index
    %6 = vector.load %arg3[%c0_5, %c0_6, %c0_7] : memref<1x128x256xbf16, #tpu.memory_space<vmem>>, vector<1x128x256xbf16>
    %7 = vector.shape_cast %6 : vector<1x128x256xbf16> to vector<128x256xbf16>
    %c0_8 = arith.constant 0 : index
    %c0_9 = arith.constant 0 : index
    %c0_10 = arith.constant 0 : index
    %8 = vector.load %arg4[%c0_8, %c0_9, %c0_10] : memref<1x256x128xbf16, #tpu.memory_space<vmem>>, vector<1x256x128xbf16>
    %9 = vector.shape_cast %8 : vector<1x256x128xbf16> to vector<256x128xbf16>
    %c0_11 = arith.constant 0 : index
    %c0_12 = arith.constant 0 : index
    %c0_13 = arith.constant 0 : index
    %10 = vector.load %arg5[%c0_11, %c0_12, %c0_13] : memref<1x8x384xf32, #tpu.memory_space<vmem>>, vector<1x8x384xf32>
    %11 = vector.shape_cast %10 : vector<1x8x384xf32> to vector<8x384xf32>
    %12 = vector.extract_strided_slice %11 {offsets = [0, 0], sizes = [1, 384], strides = [1, 1]} : vector<8x384xf32> to vector<1x384xf32>
    %13 = vector.extract_strided_slice %11 {offsets = [1, 0], sizes = [1, 128], strides = [1, 1]} : vector<8x384xf32> to vector<1x128xf32>
    %14 = vector.extract_strided_slice %11 {offsets = [2, 0], sizes = [1, 256], strides = [1, 1]} : vector<8x384xf32> to vector<1x256xf32>
    %15 = vector.extract_strided_slice %11 {offsets = [3, 0], sizes = [1, 128], strides = [1, 1]} : vector<8x384xf32> to vector<1x128xf32>
    %16 = vector.extract_strided_slice %11 {offsets = [4, 0], sizes = [1, 128], strides = [1, 1]} : vector<8x384xf32> to vector<1x128xf32>
    %17 = vector.extract_strided_slice %11 {offsets = [5, 0], sizes = [1, 128], strides = [1, 1]} : vector<8x384xf32> to vector<1x128xf32>
    %18 = vector.extract_strided_slice %11 {offsets = [6, 0], sizes = [1, 128], strides = [1, 1]} : vector<8x384xf32> to vector<1x128xf32>
    %19 = vector.extract_strided_slice %11 {offsets = [7, 0], sizes = [1, 128], strides = [1, 1]} : vector<8x384xf32> to vector<1x128xf32>
    %20 = vector.extract_strided_slice %5 {offsets = [0, 0], sizes = [128, 384], strides = [1, 1]} : vector<128x512xbf16> to vector<128x384xbf16>
    %21 = arith.truncf %3 : vector<16x128xf32> to vector<16x128xbf16>
    %cst = arith.constant dense<0.000000e+00> : vector<16x384xf32>
    %22 = tpu.matmul %21, %20, %cst {dimension_numbers = #tpu.dot_dimension_numbers<[1], [0], [0], [1], [0, 0, 1, 1], [], []>} : vector<16x128xbf16>, vector<128x384xbf16>, vector<16x384xf32> -> vector<16x384xf32>
    %23 = vector.broadcast %12 : vector<1x384xf32> to vector<16x384xf32>
    %24 = arith.addf %22, %23 : vector<16x384xf32>
    %25 = vector.extract_strided_slice %24 {offsets = [0, 0], sizes = [16, 128], strides = [1, 1]} : vector<16x384xf32> to vector<16x128xf32>
    %26 = vector.extract_strided_slice %24 {offsets = [0, 128], sizes = [16, 128], strides = [1, 1]} : vector<16x384xf32> to vector<16x128xf32>
    %27 = vector.extract_strided_slice %24 {offsets = [0, 256], sizes = [16, 128], strides = [1, 1]} : vector<16x384xf32> to vector<16x128xf32>
    %28 = vector.extract_strided_slice %25 {offsets = [0, 0], sizes = [8, 128], strides = [1, 1]} : vector<16x128xf32> to vector<8x128xf32>
    %29 = arith.truncf %28 : vector<8x128xf32> to vector<8x128xbf16>
    %30 = vector.extract_strided_slice %26 {offsets = [0, 0], sizes = [8, 128], strides = [1, 1]} : vector<16x128xf32> to vector<8x128xf32>
    %31 = tpu.transpose %30, [1, 0] : vector<8x128xf32> -> vector<128x8xf32>
    %32 = arith.truncf %31 : vector<128x8xf32> to vector<128x8xbf16>
    %33 = vector.extract_strided_slice %27 {offsets = [0, 0], sizes = [8, 128], strides = [1, 1]} : vector<16x128xf32> to vector<8x128xf32>
    %34 = arith.truncf %33 : vector<8x128xf32> to vector<8x128xbf16>
    %35 = vector.extract_strided_slice %29 {offsets = [0, 0], sizes = [8, 32], strides = [1, 1]} : vector<8x128xbf16> to vector<8x32xbf16>
    %36 = vector.extract_strided_slice %32 {offsets = [0, 0], sizes = [32, 8], strides = [1, 1]} : vector<128x8xbf16> to vector<32x8xbf16>
    %cst_14 = arith.constant dense<0.000000e+00> : vector<8x8xf32>
    %37 = tpu.matmul %35, %36, %cst_14 {dimension_numbers = #tpu.dot_dimension_numbers<[1], [0], [0], [1], [0, 0, 1, 1], [], []>} : vector<8x32xbf16>, vector<32x8xbf16>, vector<8x8xf32> -> vector<8x8xf32>
    %cst_15 = arith.constant 0.176776692 : f32
    %38 = vector.broadcast %cst_15 : f32 to vector<8x8xf32>
    %39 = arith.mulf %37, %38 : vector<8x8xf32>
    %cst_16 = arith.constant dense<0xFF800000> : vector<8xf32>
    %40 = vector.multi_reduction <maximumf>, %39, %cst_16 [1] : vector<8x8xf32> to vector<8xf32>
    %41 = vector.shape_cast %40 : vector<8xf32> to vector<8x1xf32>
    %42 = vector.broadcast %41 : vector<8x1xf32> to vector<8x8xf32>
    %43 = arith.subf %39, %42 : vector<8x8xf32>
    %44 = math.exp %43 : vector<8x8xf32>
    %cst_17 = arith.constant dense<0.000000e+00> : vector<8xf32>
    %45 = vector.multi_reduction <add>, %44, %cst_17 [1] : vector<8x8xf32> to vector<8xf32>
    %46 = vector.shape_cast %45 : vector<8xf32> to vector<8x1xf32>
    %47 = tpu.reciprocal %46 {approx = true} : vector<8x1xf32> -> vector<8x1xf32>
    %48 = vector.broadcast %47 : vector<8x1xf32> to vector<8x8xf32>
    %49 = arith.mulf %44, %48 : vector<8x8xf32>
    %50 = arith.truncf %49 : vector<8x8xf32> to vector<8x8xbf16>
    %51 = vector.extract_strided_slice %34 {offsets = [0, 0], sizes = [8, 32], strides = [1, 1]} : vector<8x128xbf16> to vector<8x32xbf16>
    %cst_18 = arith.constant dense<0.000000e+00> : vector<8x32xf32>
    %52 = tpu.matmul %50, %51, %cst_18 {dimension_numbers = #tpu.dot_dimension_numbers<[1], [0], [0], [1], [0, 0, 1, 1], [], []>} : vector<8x8xbf16>, vector<8x32xbf16>, vector<8x32xf32> -> vector<8x32xf32>
    %c0_19 = arith.constant 0 : index
    %c0_20 = arith.constant 0 : index
    %53 = vector.load %arg9[%c0_19, %c0_20] : memref<16x128xf32, #tpu.memory_space<vmem>>, vector<8x32xf32>
    tpu.vector_store %arg9[%c0_19, %c0_20], %52 {strides = array<i32>} : memref<16x128xf32, #tpu.memory_space<vmem>>, vector<8x32xf32>,
    %54 = vector.extract_strided_slice %29 {offsets = [0, 32], sizes = [8, 32], strides = [1, 1]} : vector<8x128xbf16> to vector<8x32xbf16>
    %55 = vector.extract_strided_slice %32 {offsets = [32, 0], sizes = [32, 8], strides = [1, 1]} : vector<128x8xbf16> to vector<32x8xbf16>
    %cst_21 = arith.constant dense<0.000000e+00> : vector<8x8xf32>
    %56 = tpu.matmul %54, %55, %cst_21 {dimension_numbers = #tpu.dot_dimension_numbers<[1], [0], [0], [1], [0, 0, 1, 1], [], []>} : vector<8x32xbf16>, vector<32x8xbf16>, vector<8x8xf32> -> vector<8x8xf32>
    %cst_22 = arith.constant 0.176776692 : f32
    %57 = vector.broadcast %cst_22 : f32 to vector<8x8xf32>
    %58 = arith.mulf %56, %57 : vector<8x8xf32>
    %cst_23 = arith.constant dense<0xFF800000> : vector<8xf32>
    %59 = vector.multi_reduction <maximumf>, %58, %cst_23 [1] : vector<8x8xf32> to vector<8xf32>
    %60 = vector.shape_cast %59 : vector<8xf32> to vector<8x1xf32>
    %61 = vector.broadcast %60 : vector<8x1xf32> to vector<8x8xf32>
    %62 = arith.subf %58, %61 : vector<8x8xf32>
    %63 = math.exp %62 : vector<8x8xf32>
    %cst_24 = arith.constant dense<0.000000e+00> : vector<8xf32>
    %64 = vector.multi_reduction <add>, %63, %cst_24 [1] : vector<8x8xf32> to vector<8xf32>
    %65 = vector.shape_cast %64 : vector<8xf32> to vector<8x1xf32>
    %66 = tpu.reciprocal %65 {approx = true} : vector<8x1xf32> -> vector<8x1xf32>
    %67 = vector.broadcast %66 : vector<8x1xf32> to vector<8x8xf32>
    %68 = arith.mulf %63, %67 : vector<8x8xf32>
    %69 = arith.truncf %68 : vector<8x8xf32> to vector<8x8xbf16>
    %70 = vector.extract_strided_slice %34 {offsets = [0, 32], sizes = [8, 32], strides = [1, 1]} : vector<8x128xbf16> to vector<8x32xbf16>
    %cst_25 = arith.constant dense<0.000000e+00> : vector<8x32xf32>
    %71 = tpu.matmul %69, %70, %cst_25 {dimension_numbers = #tpu.dot_dimension_numbers<[1], [0], [0], [1], [0, 0, 1, 1], [], []>} : vector<8x8xbf16>, vector<8x32xbf16>, vector<8x32xf32> -> vector<8x32xf32>
    %c0_26 = arith.constant 0 : index
    %c32 = arith.constant 32 : index
    %72 = vector.load %arg9[%c0_26, %c32] : memref<16x128xf32, #tpu.memory_space<vmem>>, vector<8x32xf32>
    tpu.vector_store %arg9[%c0_26, %c32], %71 {strides = array<i32>} : memref<16x128xf32, #tpu.memory_space<vmem>>, vector<8x32xf32>,
    %73 = vector.extract_strided_slice %29 {offsets = [0, 64], sizes = [8, 32], strides = [1, 1]} : vector<8x128xbf16> to vector<8x32xbf16>
    %74 = vector.extract_strided_slice %32 {offsets = [64, 0], sizes = [32, 8], strides = [1, 1]} : vector<128x8xbf16> to vector<32x8xbf16>
    %cst_27 = arith.constant dense<0.000000e+00> : vector<8x8xf32>
    %75 = tpu.matmul %73, %74, %cst_27 {dimension_numbers = #tpu.dot_dimension_numbers<[1], [0], [0], [1], [0, 0, 1, 1], [], []>} : vector<8x32xbf16>, vector<32x8xbf16>, vector<8x8xf32> -> vector<8x8xf32>
    %cst_28 = arith.constant 0.176776692 : f32
    %76 = vector.broadcast %cst_28 : f32 to vector<8x8xf32>
    %77 = arith.mulf %75, %76 : vector<8x8xf32>
    %cst_29 = arith.constant dense<0xFF800000> : vector<8xf32>
    %78 = vector.multi_reduction <maximumf>, %77, %cst_29 [1] : vector<8x8xf32> to vector<8xf32>
    %79 = vector.shape_cast %78 : vector<8xf32> to vector<8x1xf32>
    %80 = vector.broadcast %79 : vector<8x1xf32> to vector<8x8xf32>
    %81 = arith.subf %77, %80 : vector<8x8xf32>
    %82 = math.exp %81 : vector<8x8xf32>
    %cst_30 = arith.constant dense<0.000000e+00> : vector<8xf32>
    %83 = vector.multi_reduction <add>, %82, %cst_30 [1] : vector<8x8xf32> to vector<8xf32>
    %84 = vector.shape_cast %83 : vector<8xf32> to vector<8x1xf32>
    %85 = tpu.reciprocal %84 {approx = true} : vector<8x1xf32> -> vector<8x1xf32>
    %86 = vector.broadcast %85 : vector<8x1xf32> to vector<8x8xf32>
    %87 = arith.mulf %82, %86 : vector<8x8xf32>
    %88 = arith.truncf %87 : vector<8x8xf32> to vector<8x8xbf16>
    %89 = vector.extract_strided_slice %34 {offsets = [0, 64], sizes = [8, 32], strides = [1, 1]} : vector<8x128xbf16> to vector<8x32xbf16>
    %cst_31 = arith.constant dense<0.000000e+00> : vector<8x32xf32>
    %90 = tpu.matmul %88, %89, %cst_31 {dimension_numbers = #tpu.dot_dimension_numbers<[1], [0], [0], [1], [0, 0, 1, 1], [], []>} : vector<8x8xbf16>, vector<8x32xbf16>, vector<8x32xf32> -> vector<8x32xf32>
    %c0_32 = arith.constant 0 : index
    %c64 = arith.constant 64 : index
    %91 = vector.load %arg9[%c0_32, %c64] : memref<16x128xf32, #tpu.memory_space<vmem>>, vector<8x32xf32>
    tpu.vector_store %arg9[%c0_32, %c64], %90 {strides = array<i32>} : memref<16x128xf32, #tpu.memory_space<vmem>>, vector<8x32xf32>,
    %92 = vector.extract_strided_slice %29 {offsets = [0, 96], sizes = [8, 32], strides = [1, 1]} : vector<8x128xbf16> to vector<8x32xbf16>
    %93 = vector.extract_strided_slice %32 {offsets = [96, 0], sizes = [32, 8], strides = [1, 1]} : vector<128x8xbf16> to vector<32x8xbf16>
    %cst_33 = arith.constant dense<0.000000e+00> : vector<8x8xf32>
    %94 = tpu.matmul %92, %93, %cst_33 {dimension_numbers = #tpu.dot_dimension_numbers<[1], [0], [0], [1], [0, 0, 1, 1], [], []>} : vector<8x32xbf16>, vector<32x8xbf16>, vector<8x8xf32> -> vector<8x8xf32>
    %cst_34 = arith.constant 0.176776692 : f32
    %95 = vector.broadcast %cst_34 : f32 to vector<8x8xf32>
    %96 = arith.mulf %94, %95 : vector<8x8xf32>
    %cst_35 = arith.constant dense<0xFF800000> : vector<8xf32>
    %97 = vector.multi_reduction <maximumf>, %96, %cst_35 [1] : vector<8x8xf32> to vector<8xf32>
    %98 = vector.shape_cast %97 : vector<8xf32> to vector<8x1xf32>
    %99 = vector.broadcast %98 : vector<8x1xf32> to vector<8x8xf32>
    %100 = arith.subf %96, %99 : vector<8x8xf32>
    %101 = math.exp %100 : vector<8x8xf32>
    %cst_36 = arith.constant dense<0.000000e+00> : vector<8xf32>
    %102 = vector.multi_reduction <add>, %101, %cst_36 [1] : vector<8x8xf32> to vector<8xf32>
    %103 = vector.shape_cast %102 : vector<8xf32> to vector<8x1xf32>
    %104 = tpu.reciprocal %103 {approx = true} : vector<8x1xf32> -> vector<8x1xf32>
    %105 = vector.broadcast %104 : vector<8x1xf32> to vector<8x8xf32>
    %106 = arith.mulf %101, %105 : vector<8x8xf32>
    %107 = arith.truncf %106 : vector<8x8xf32> to vector<8x8xbf16>
    %108 = vector.extract_strided_slice %34 {offsets = [0, 96], sizes = [8, 32], strides = [1, 1]} : vector<8x128xbf16> to vector<8x32xbf16>
    %cst_37 = arith.constant dense<0.000000e+00> : vector<8x32xf32>
    %109 = tpu.matmul %107, %108, %cst_37 {dimension_numbers = #tpu.dot_dimension_numbers<[1], [0], [0], [1], [0, 0, 1, 1], [], []>} : vector<8x8xbf16>, vector<8x32xbf16>, vector<8x32xf32> -> vector<8x32xf32>
    %c0_38 = arith.constant 0 : index
    %c96 = arith.constant 96 : index
    %110 = vector.load %arg9[%c0_38, %c96] : memref<16x128xf32, #tpu.memory_space<vmem>>, vector<8x32xf32>
    tpu.vector_store %arg9[%c0_38, %c96], %109 {strides = array<i32>} : memref<16x128xf32, #tpu.memory_space<vmem>>, vector<8x32xf32>,
    %111 = vector.extract_strided_slice %25 {offsets = [8, 0], sizes = [8, 128], strides = [1, 1]} : vector<16x128xf32> to vector<8x128xf32>
    %112 = arith.truncf %111 : vector<8x128xf32> to vector<8x128xbf16>
    %113 = vector.extract_strided_slice %26 {offsets = [8, 0], sizes = [8, 128], strides = [1, 1]} : vector<16x128xf32> to vector<8x128xf32>
    %114 = tpu.transpose %113, [1, 0] : vector<8x128xf32> -> vector<128x8xf32>
    %115 = arith.truncf %114 : vector<128x8xf32> to vector<128x8xbf16>
    %116 = vector.extract_strided_slice %27 {offsets = [8, 0], sizes = [8, 128], strides = [1, 1]} : vector<16x128xf32> to vector<8x128xf32>
    %117 = arith.truncf %116 : vector<8x128xf32> to vector<8x128xbf16>
    %118 = vector.extract_strided_slice %112 {offsets = [0, 0], sizes = [8, 32], strides = [1, 1]} : vector<8x128xbf16> to vector<8x32xbf16>
    %119 = vector.extract_strided_slice %115 {offsets = [0, 0], sizes = [32, 8], strides = [1, 1]} : vector<128x8xbf16> to vector<32x8xbf16>
    %cst_39 = arith.constant dense<0.000000e+00> : vector<8x8xf32>
    %120 = tpu.matmul %118, %119, %cst_39 {dimension_numbers = #tpu.dot_dimension_numbers<[1], [0], [0], [1], [0, 0, 1, 1], [], []>} : vector<8x32xbf16>, vector<32x8xbf16>, vector<8x8xf32> -> vector<8x8xf32>
    %cst_40 = arith.constant 0.176776692 : f32
    %121 = vector.broadcast %cst_40 : f32 to vector<8x8xf32>
    %122 = arith.mulf %120, %121 : vector<8x8xf32>
    %cst_41 = arith.constant dense<0xFF800000> : vector<8xf32>
    %123 = vector.multi_reduction <maximumf>, %122, %cst_41 [1] : vector<8x8xf32> to vector<8xf32>
    %124 = vector.shape_cast %123 : vector<8xf32> to vector<8x1xf32>
    %125 = vector.broadcast %124 : vector<8x1xf32> to vector<8x8xf32>
    %126 = arith.subf %122, %125 : vector<8x8xf32>
    %127 = math.exp %126 : vector<8x8xf32>
    %cst_42 = arith.constant dense<0.000000e+00> : vector<8xf32>
    %128 = vector.multi_reduction <add>, %127, %cst_42 [1] : vector<8x8xf32> to vector<8xf32>
    %129 = vector.shape_cast %128 : vector<8xf32> to vector<8x1xf32>
    %130 = tpu.reciprocal %129 {approx = true} : vector<8x1xf32> -> vector<8x1xf32>
    %131 = vector.broadcast %130 : vector<8x1xf32> to vector<8x8xf32>
    %132 = arith.mulf %127, %131 : vector<8x8xf32>
    %133 = arith.truncf %132 : vector<8x8xf32> to vector<8x8xbf16>
    %134 = vector.extract_strided_slice %117 {offsets = [0, 0], sizes = [8, 32], strides = [1, 1]} : vector<8x128xbf16> to vector<8x32xbf16>
    %cst_43 = arith.constant dense<0.000000e+00> : vector<8x32xf32>
    %135 = tpu.matmul %133, %134, %cst_43 {dimension_numbers = #tpu.dot_dimension_numbers<[1], [0], [0], [1], [0, 0, 1, 1], [], []>} : vector<8x8xbf16>, vector<8x32xbf16>, vector<8x32xf32> -> vector<8x32xf32>
    %c8 = arith.constant 8 : index
    %c0_44 = arith.constant 0 : index
    %136 = vector.load %arg9[%c8, %c0_44] : memref<16x128xf32, #tpu.memory_space<vmem>>, vector<8x32xf32>
    tpu.vector_store %arg9[%c8, %c0_44], %135 {strides = array<i32>} : memref<16x128xf32, #tpu.memory_space<vmem>>, vector<8x32xf32>,
    %137 = vector.extract_strided_slice %112 {offsets = [0, 32], sizes = [8, 32], strides = [1, 1]} : vector<8x128xbf16> to vector<8x32xbf16>
    %138 = vector.extract_strided_slice %115 {offsets = [32, 0], sizes = [32, 8], strides = [1, 1]} : vector<128x8xbf16> to vector<32x8xbf16>
    %cst_45 = arith.constant dense<0.000000e+00> : vector<8x8xf32>
    %139 = tpu.matmul %137, %138, %cst_45 {dimension_numbers = #tpu.dot_dimension_numbers<[1], [0], [0], [1], [0, 0, 1, 1], [], []>} : vector<8x32xbf16>, vector<32x8xbf16>, vector<8x8xf32> -> vector<8x8xf32>
    %cst_46 = arith.constant 0.176776692 : f32
    %140 = vector.broadcast %cst_46 : f32 to vector<8x8xf32>
    %141 = arith.mulf %139, %140 : vector<8x8xf32>
    %cst_47 = arith.constant dense<0xFF800000> : vector<8xf32>
    %142 = vector.multi_reduction <maximumf>, %141, %cst_47 [1] : vector<8x8xf32> to vector<8xf32>
    %143 = vector.shape_cast %142 : vector<8xf32> to vector<8x1xf32>
    %144 = vector.broadcast %143 : vector<8x1xf32> to vector<8x8xf32>
    %145 = arith.subf %141, %144 : vector<8x8xf32>
    %146 = math.exp %145 : vector<8x8xf32>
    %cst_48 = arith.constant dense<0.000000e+00> : vector<8xf32>
    %147 = vector.multi_reduction <add>, %146, %cst_48 [1] : vector<8x8xf32> to vector<8xf32>
    %148 = vector.shape_cast %147 : vector<8xf32> to vector<8x1xf32>
    %149 = tpu.reciprocal %148 {approx = true} : vector<8x1xf32> -> vector<8x1xf32>
    %150 = vector.broadcast %149 : vector<8x1xf32> to vector<8x8xf32>
    %151 = arith.mulf %146, %150 : vector<8x8xf32>
    %152 = arith.truncf %151 : vector<8x8xf32> to vector<8x8xbf16>
    %153 = vector.extract_strided_slice %117 {offsets = [0, 32], sizes = [8, 32], strides = [1, 1]} : vector<8x128xbf16> to vector<8x32xbf16>
    %cst_49 = arith.constant dense<0.000000e+00> : vector<8x32xf32>
    %154 = tpu.matmul %152, %153, %cst_49 {dimension_numbers = #tpu.dot_dimension_numbers<[1], [0], [0], [1], [0, 0, 1, 1], [], []>} : vector<8x8xbf16>, vector<8x32xbf16>, vector<8x32xf32> -> vector<8x32xf32>
    %c8_50 = arith.constant 8 : index
    %c32_51 = arith.constant 32 : index
    %155 = vector.load %arg9[%c8_50, %c32_51] : memref<16x128xf32, #tpu.memory_space<vmem>>, vector<8x32xf32>
    tpu.vector_store %arg9[%c8_50, %c32_51], %154 {strides = array<i32>} : memref<16x128xf32, #tpu.memory_space<vmem>>, vector<8x32xf32>,
    %156 = vector.extract_strided_slice %112 {offsets = [0, 64], sizes = [8, 32], strides = [1, 1]} : vector<8x128xbf16> to vector<8x32xbf16>
    %157 = vector.extract_strided_slice %115 {offsets = [64, 0], sizes = [32, 8], strides = [1, 1]} : vector<128x8xbf16> to vector<32x8xbf16>
    %cst_52 = arith.constant dense<0.000000e+00> : vector<8x8xf32>
    %158 = tpu.matmul %156, %157, %cst_52 {dimension_numbers = #tpu.dot_dimension_numbers<[1], [0], [0], [1], [0, 0, 1, 1], [], []>} : vector<8x32xbf16>, vector<32x8xbf16>, vector<8x8xf32> -> vector<8x8xf32>
    %cst_53 = arith.constant 0.176776692 : f32
    %159 = vector.broadcast %cst_53 : f32 to vector<8x8xf32>
    %160 = arith.mulf %158, %159 : vector<8x8xf32>
    %cst_54 = arith.constant dense<0xFF800000> : vector<8xf32>
    %161 = vector.multi_reduction <maximumf>, %160, %cst_54 [1] : vector<8x8xf32> to vector<8xf32>
    %162 = vector.shape_cast %161 : vector<8xf32> to vector<8x1xf32>
    %163 = vector.broadcast %162 : vector<8x1xf32> to vector<8x8xf32>
    %164 = arith.subf %160, %163 : vector<8x8xf32>
    %165 = math.exp %164 : vector<8x8xf32>
    %cst_55 = arith.constant dense<0.000000e+00> : vector<8xf32>
    %166 = vector.multi_reduction <add>, %165, %cst_55 [1] : vector<8x8xf32> to vector<8xf32>
    %167 = vector.shape_cast %166 : vector<8xf32> to vector<8x1xf32>
    %168 = tpu.reciprocal %167 {approx = true} : vector<8x1xf32> -> vector<8x1xf32>
    %169 = vector.broadcast %168 : vector<8x1xf32> to vector<8x8xf32>
    %170 = arith.mulf %165, %169 : vector<8x8xf32>
    %171 = arith.truncf %170 : vector<8x8xf32> to vector<8x8xbf16>
    %172 = vector.extract_strided_slice %117 {offsets = [0, 64], sizes = [8, 32], strides = [1, 1]} : vector<8x128xbf16> to vector<8x32xbf16>
    %cst_56 = arith.constant dense<0.000000e+00> : vector<8x32xf32>
    %173 = tpu.matmul %171, %172, %cst_56 {dimension_numbers = #tpu.dot_dimension_numbers<[1], [0], [0], [1], [0, 0, 1, 1], [], []>} : vector<8x8xbf16>, vector<8x32xbf16>, vector<8x32xf32> -> vector<8x32xf32>
    %c8_57 = arith.constant 8 : index
    %c64_58 = arith.constant 64 : index
    %174 = vector.load %arg9[%c8_57, %c64_58] : memref<16x128xf32, #tpu.memory_space<vmem>>, vector<8x32xf32>
    tpu.vector_store %arg9[%c8_57, %c64_58], %173 {strides = array<i32>} : memref<16x128xf32, #tpu.memory_space<vmem>>, vector<8x32xf32>,
    %175 = vector.extract_strided_slice %112 {offsets = [0, 96], sizes = [8, 32], strides = [1, 1]} : vector<8x128xbf16> to vector<8x32xbf16>
    %176 = vector.extract_strided_slice %115 {offsets = [96, 0], sizes = [32, 8], strides = [1, 1]} : vector<128x8xbf16> to vector<32x8xbf16>
    %cst_59 = arith.constant dense<0.000000e+00> : vector<8x8xf32>
    %177 = tpu.matmul %175, %176, %cst_59 {dimension_numbers = #tpu.dot_dimension_numbers<[1], [0], [0], [1], [0, 0, 1, 1], [], []>} : vector<8x32xbf16>, vector<32x8xbf16>, vector<8x8xf32> -> vector<8x8xf32>
    %cst_60 = arith.constant 0.176776692 : f32
    %178 = vector.broadcast %cst_60 : f32 to vector<8x8xf32>
    %179 = arith.mulf %177, %178 : vector<8x8xf32>
    %cst_61 = arith.constant dense<0xFF800000> : vector<8xf32>
    %180 = vector.multi_reduction <maximumf>, %179, %cst_61 [1] : vector<8x8xf32> to vector<8xf32>
    %181 = vector.shape_cast %180 : vector<8xf32> to vector<8x1xf32>
    %182 = vector.broadcast %181 : vector<8x1xf32> to vector<8x8xf32>
    %183 = arith.subf %179, %182 : vector<8x8xf32>
    %184 = math.exp %183 : vector<8x8xf32>
    %cst_62 = arith.constant dense<0.000000e+00> : vector<8xf32>
    %185 = vector.multi_reduction <add>, %184, %cst_62 [1] : vector<8x8xf32> to vector<8xf32>
    %186 = vector.shape_cast %185 : vector<8xf32> to vector<8x1xf32>
    %187 = tpu.reciprocal %186 {approx = true} : vector<8x1xf32> -> vector<8x1xf32>
    %188 = vector.broadcast %187 : vector<8x1xf32> to vector<8x8xf32>
    %189 = arith.mulf %184, %188 : vector<8x8xf32>
    %190 = arith.truncf %189 : vector<8x8xf32> to vector<8x8xbf16>
    %191 = vector.extract_strided_slice %117 {offsets = [0, 96], sizes = [8, 32], strides = [1, 1]} : vector<8x128xbf16> to vector<8x32xbf16>
    %cst_63 = arith.constant dense<0.000000e+00> : vector<8x32xf32>
    %192 = tpu.matmul %190, %191, %cst_63 {dimension_numbers = #tpu.dot_dimension_numbers<[1], [0], [0], [1], [0, 0, 1, 1], [], []>} : vector<8x8xbf16>, vector<8x32xbf16>, vector<8x32xf32> -> vector<8x32xf32>
    %c8_64 = arith.constant 8 : index
    %c96_65 = arith.constant 96 : index
    %193 = vector.load %arg9[%c8_64, %c96_65] : memref<16x128xf32, #tpu.memory_space<vmem>>, vector<8x32xf32>
    tpu.vector_store %arg9[%c8_64, %c96_65], %192 {strides = array<i32>} : memref<16x128xf32, #tpu.memory_space<vmem>>, vector<8x32xf32>,
    %c0_66 = arith.constant 0 : index
    %c0_67 = arith.constant 0 : index
    %194 = vector.load %arg9[%c0_66, %c0_67] : memref<16x128xf32, #tpu.memory_space<vmem>>, vector<16x128xf32>
    %195 = vector.extract_strided_slice %5 {offsets = [0, 384], sizes = [128, 128], strides = [1, 1]} : vector<128x512xbf16> to vector<128x128xbf16>
    %196 = arith.truncf %194 : vector<16x128xf32> to vector<16x128xbf16>
    %cst_68 = arith.constant dense<0.000000e+00> : vector<16x128xf32>
    %197 = tpu.matmul %196, %195, %cst_68 {dimension_numbers = #tpu.dot_dimension_numbers<[1], [0], [0], [1], [0, 0, 1, 1], [], []>} : vector<16x128xbf16>, vector<128x128xbf16>, vector<16x128xf32> -> vector<16x128xf32>
    %198 = vector.broadcast %13 : vector<1x128xf32> to vector<16x128xf32>
    %199 = arith.addf %197, %198 : vector<16x128xf32>
    %200 = arith.addf %3, %199 : vector<16x128xf32>
    %cst_69 = arith.constant dense<0.000000e+00> : vector<16xf32>
    %201 = vector.multi_reduction <add>, %200, %cst_69 [1] : vector<16x128xf32> to vector<16xf32>
    %202 = vector.shape_cast %201 : vector<16xf32> to vector<16x1xf32>
    %cst_70 = arith.constant 1.280000e+02 : f32
    %203 = vector.broadcast %cst_70 : f32 to vector<16x1xf32>
    %204 = arith.divf %202, %203 : vector<16x1xf32>
    %205 = vector.broadcast %204 : vector<16x1xf32> to vector<16x128xf32>
    %206 = arith.subf %200, %205 : vector<16x128xf32>
    %207 = arith.mulf %206, %206 : vector<16x128xf32>
    %cst_71 = arith.constant dense<0.000000e+00> : vector<16xf32>
    %208 = vector.multi_reduction <add>, %207, %cst_71 [1] : vector<16x128xf32> to vector<16xf32>
    %209 = vector.shape_cast %208 : vector<16xf32> to vector<16x1xf32>
    %cst_72 = arith.constant 1.280000e+02 : f32
    %210 = vector.broadcast %cst_72 : f32 to vector<16x1xf32>
    %211 = arith.divf %209, %210 : vector<16x1xf32>
    %212 = vector.broadcast %204 : vector<16x1xf32> to vector<16x128xf32>
    %213 = arith.subf %200, %212 : vector<16x128xf32>
    %cst_73 = arith.constant 9.99999974E-6 : f32
    %214 = vector.broadcast %cst_73 : f32 to vector<16x1xf32>
    %215 = arith.addf %211, %214 : vector<16x1xf32>
    %216 = math.rsqrt %215 : vector<16x1xf32>
    %217 = vector.broadcast %216 : vector<16x1xf32> to vector<16x128xf32>
    %218 = arith.mulf %213, %217 : vector<16x128xf32>
    %219 = vector.broadcast %16 : vector<1x128xf32> to vector<16x128xf32>
    %220 = arith.mulf %218, %219 : vector<16x128xf32>
    %221 = vector.broadcast %17 : vector<1x128xf32> to vector<16x128xf32>
    %222 = arith.addf %220, %221 : vector<16x128xf32>
    %223 = arith.truncf %222 : vector<16x128xf32> to vector<16x128xbf16>
    %cst_74 = arith.constant dense<0.000000e+00> : vector<16x256xf32>
    %224 = tpu.matmul %223, %7, %cst_74 {dimension_numbers = #tpu.dot_dimension_numbers<[1], [0], [0], [1], [0, 0, 1, 1], [], []>} : vector<16x128xbf16>, vector<128x256xbf16>, vector<16x256xf32> -> vector<16x256xf32>
    %225 = vector.broadcast %14 : vector<1x256xf32> to vector<16x256xf32>
    %226 = arith.addf %224, %225 : vector<16x256xf32>
    %cst_75 = arith.constant 0.000000e+00 : f32
    %227 = vector.broadcast %cst_75 : f32 to vector<16x256xf32>
    %228 = arith.maximumf %226, %227 : vector<16x256xf32>
    %229 = arith.truncf %228 : vector<16x256xf32> to vector<16x256xbf16>
    %cst_76 = arith.constant dense<0.000000e+00> : vector<16x128xf32>
    %230 = tpu.matmul %229, %9, %cst_76 {dimension_numbers = #tpu.dot_dimension_numbers<[1], [0], [0], [1], [0, 0, 1, 1], [], []>} : vector<16x256xbf16>, vector<256x128xbf16>, vector<16x128xf32> -> vector<16x128xf32>
    %231 = vector.broadcast %15 : vector<1x128xf32> to vector<16x128xf32>
    %232 = arith.addf %230, %231 : vector<16x128xf32>
    %233 = arith.addf %222, %232 : vector<16x128xf32>
    %cst_77 = arith.constant dense<0.000000e+00> : vector<16xf32>
    %234 = vector.multi_reduction <add>, %233, %cst_77 [1] : vector<16x128xf32> to vector<16xf32>
    %235 = vector.shape_cast %234 : vector<16xf32> to vector<16x1xf32>
    %cst_78 = arith.constant 1.280000e+02 : f32
    %236 = vector.broadcast %cst_78 : f32 to vector<16x1xf32>
    %237 = arith.divf %235, %236 : vector<16x1xf32>
    %238 = vector.broadcast %237 : vector<16x1xf32> to vector<16x128xf32>
    %239 = arith.subf %233, %238 : vector<16x128xf32>
    %240 = arith.mulf %239, %239 : vector<16x128xf32>
    %cst_79 = arith.constant dense<0.000000e+00> : vector<16xf32>
    %241 = vector.multi_reduction <add>, %240, %cst_79 [1] : vector<16x128xf32> to vector<16xf32>
    %242 = vector.shape_cast %241 : vector<16xf32> to vector<16x1xf32>
    %cst_80 = arith.constant 1.280000e+02 : f32
    %243 = vector.broadcast %cst_80 : f32 to vector<16x1xf32>
    %244 = arith.divf %242, %243 : vector<16x1xf32>
    %245 = vector.broadcast %237 : vector<16x1xf32> to vector<16x128xf32>
    %246 = arith.subf %233, %245 : vector<16x128xf32>
    %cst_81 = arith.constant 9.99999974E-6 : f32
    %247 = vector.broadcast %cst_81 : f32 to vector<16x1xf32>
    %248 = arith.addf %244, %247 : vector<16x1xf32>
    %249 = math.rsqrt %248 : vector<16x1xf32>
    %250 = vector.broadcast %249 : vector<16x1xf32> to vector<16x128xf32>
    %251 = arith.mulf %246, %250 : vector<16x128xf32>
    %252 = vector.broadcast %18 : vector<1x128xf32> to vector<16x128xf32>
    %253 = arith.mulf %251, %252 : vector<16x128xf32>
    %254 = vector.broadcast %19 : vector<1x128xf32> to vector<16x128xf32>
    %255 = arith.addf %253, %254 : vector<16x128xf32>
    %c0_82 = arith.constant 0 : index
    %c0_83 = arith.constant 0 : index
    %256 = vector.load %arg8[%c0_82, %c0_83] : memref<16x128xf32, #tpu.memory_space<vmem>>, vector<16x128xf32>
    tpu.vector_store %arg8[%c0_82, %c0_83], %255 {strides = array<i32>} : memref<16x128xf32, #tpu.memory_space<vmem>>, vector<16x128xf32>,
    %c1_i32 = arith.constant 1 : i32
    %257 = arith.cmpi eq, %arg0, %c1_i32 : i32
    %258 = arith.extui %257 : i1 to i32
    %c0_i32_84 = arith.constant 0 : i32
    %259 = arith.cmpi ne, %258, %c0_i32_84 : i32
    scf.if %259 {
      %c0_85 = arith.constant 0 : index
      %c0_86 = arith.constant 0 : index
      %260 = vector.load %arg8[%c0_85, %c0_86] : memref<16x128xf32, #tpu.memory_space<vmem>>, vector<16x128xf32>
      %c0_87 = arith.constant 0 : index
      %c0_88 = arith.constant 0 : index
      %261 = vector.load %arg6[%c0_87, %c0_88] : memref<2x128xf32, #tpu.memory_space<vmem>>, vector<1x128xf32>
      %c1 = arith.constant 1 : index
      %c0_89 = arith.constant 0 : index
      %262 = vector.load %arg6[%c1, %c0_89] : memref<2x128xf32, #tpu.memory_space<vmem>>, vector<1x128xf32>
      %cst_90 = arith.constant dense<0.000000e+00> : vector<16xf32>
      %263 = vector.multi_reduction <add>, %260, %cst_90 [1] : vector<16x128xf32> to vector<16xf32>
      %264 = vector.shape_cast %263 : vector<16xf32> to vector<16x1xf32>
      %cst_91 = arith.constant 1.280000e+02 : f32
      %265 = vector.broadcast %cst_91 : f32 to vector<16x1xf32>
      %266 = arith.divf %264, %265 : vector<16x1xf32>
      %267 = vector.broadcast %266 : vector<16x1xf32> to vector<16x128xf32>
      %268 = arith.subf %260, %267 : vector<16x128xf32>
      %269 = arith.mulf %268, %268 : vector<16x128xf32>
      %cst_92 = arith.constant dense<0.000000e+00> : vector<16xf32>
      %270 = vector.multi_reduction <add>, %269, %cst_92 [1] : vector<16x128xf32> to vector<16xf32>
      %271 = vector.shape_cast %270 : vector<16xf32> to vector<16x1xf32>
      %cst_93 = arith.constant 1.280000e+02 : f32
      %272 = vector.broadcast %cst_93 : f32 to vector<16x1xf32>
      %273 = arith.divf %271, %272 : vector<16x1xf32>
      %274 = vector.broadcast %266 : vector<16x1xf32> to vector<16x128xf32>
      %275 = arith.subf %260, %274 : vector<16x128xf32>
      %cst_94 = arith.constant 9.99999974E-6 : f32
      %276 = vector.broadcast %cst_94 : f32 to vector<16x1xf32>
      %277 = arith.addf %273, %276 : vector<16x1xf32>
      %278 = math.rsqrt %277 : vector<16x1xf32>
      %279 = vector.broadcast %278 : vector<16x1xf32> to vector<16x128xf32>
      %280 = arith.mulf %275, %279 : vector<16x128xf32>
      %281 = vector.broadcast %261 : vector<1x128xf32> to vector<16x128xf32>
      %282 = arith.mulf %280, %281 : vector<16x128xf32>
      %283 = vector.broadcast %262 : vector<1x128xf32> to vector<16x128xf32>
      %284 = arith.addf %282, %283 : vector<16x128xf32>
      %c0_95 = arith.constant 0 : index
      %c0_96 = arith.constant 0 : index
      %285 = vector.load %arg7[%c0_95, %c0_96] : memref<16x128xf32, #tpu.memory_space<vmem>>, vector<16x128xf32>
      tpu.vector_store %arg7[%c0_95, %c0_96], %284 {strides = array<i32>} : memref<16x128xf32, #tpu.memory_space<vmem>>, vector<16x128xf32>,
    } else {
    }
    return
  }
  func.func @transform_0(%arg0: i32) -> (i32, i32) {
    %c0_i32 = arith.constant 0 : i32
    %c0_i32_0 = arith.constant 0 : i32
    %c0_i32_1 = arith.constant 0 : i32
    return %c0_i32, %c0_i32_0 : i32, i32
  }
  func.func @transform_1(%arg0: i32) -> (i32, i32, i32) {
    %c0_i32 = arith.constant 0 : i32
    %c0_i32_0 = arith.constant 0 : i32
    %c0_i32_1 = arith.constant 0 : i32
    return %arg0, %c0_i32, %c0_i32_0 : i32, i32, i32
  }
  func.func @transform_2(%arg0: i32) -> (i32, i32, i32) {
    %c0_i32 = arith.constant 0 : i32
    %c0_i32_0 = arith.constant 0 : i32
    %c0_i32_1 = arith.constant 0 : i32
    return %arg0, %c0_i32, %c0_i32_0 : i32, i32, i32
  }
  func.func @transform_3(%arg0: i32) -> (i32, i32, i32) {
    %c0_i32 = arith.constant 0 : i32
    %c0_i32_0 = arith.constant 0 : i32
    %c0_i32_1 = arith.constant 0 : i32
    return %arg0, %c0_i32, %c0_i32_0 : i32, i32, i32
  }
  func.func @transform_4(%arg0: i32) -> (i32, i32, i32) {
    %c0_i32 = arith.constant 0 : i32
    %c0_i32_0 = arith.constant 0 : i32
    %c0_i32_1 = arith.constant 0 : i32
    return %arg0, %c0_i32, %c0_i32_0 : i32, i32, i32
  }
  func.func @transform_5(%arg0: i32) -> (i32, i32) {
    %c0_i32 = arith.constant 0 : i32
    %c0_i32_0 = arith.constant 0 : i32
    %c0_i32_1 = arith.constant 0 : i32
    return %c0_i32, %c0_i32_0 : i32, i32
  }
  func.func @transform_6(%arg0: i32) -> (i32, i32) {
    %c0_i32 = arith.constant 0 : i32
    %c0_i32_0 = arith.constant 0 : i32
    %c0_i32_1 = arith.constant 0 : i32
    return %c0_i32, %c0_i32_0 : i32, i32
  }
}

module attributes {stable_mosaic.version = 11 : i64} {
  func.func @_decoder_stack_kernel(%arg0: i32, %arg1: memref<12x128xbf16, #tpu.memory_space<vmem>>, %arg2: memref<16x128xbf16, #tpu.memory_space<vmem>>, %arg3: memref<2x6xf32, #tpu.memory_space<vmem>>, %arg4: memref<1x128x512xbf16, #tpu.memory_space<vmem>>, %arg5: memref<1x128x512xbf16, #tpu.memory_space<vmem>>, %arg6: memref<1x128x256xbf16, #tpu.memory_space<vmem>>, %arg7: memref<1x256x128xbf16, #tpu.memory_space<vmem>>, %arg8: memref<1x12x384xf32, #tpu.memory_space<vmem>>, %arg9: memref<2x128xf32, #tpu.memory_space<vmem>>, %arg10: memref<12x128xf32, #tpu.memory_space<vmem>>, %arg11: memref<12x128xf32, #tpu.memory_space<vmem>>, %arg12: memref<12x128xf32, #tpu.memory_space<vmem>>) attributes {dimension_semantics = [#tpu.dimension_semantics<arbitrary>], iteration_bounds = array<i64: 2>, scalar_prefetch = 0 : i64, scratch_operands = 2 : i64, tpu.core_type = #tpu.core_type<tc>, window_params = [{pipeline_mode = #tpu.pipeline_mode<synchronous>, transform_indices = @transform_0, window_bounds = array<i64: 12, 128>}, {pipeline_mode = #tpu.pipeline_mode<synchronous>, transform_indices = @transform_1, window_bounds = array<i64: 16, 128>}, {pipeline_mode = #tpu.pipeline_mode<synchronous>, transform_indices = @transform_2, window_bounds = array<i64: 2, 6>}, {transform_indices = @transform_3, window_bounds = array<i64: 1, 128, 512>}, {transform_indices = @transform_4, window_bounds = array<i64: 1, 128, 512>}, {transform_indices = @transform_5, window_bounds = array<i64: 1, 128, 256>}, {transform_indices = @transform_6, window_bounds = array<i64: 1, 256, 128>}, {transform_indices = @transform_7, window_bounds = array<i64: 1, 12, 384>}, {pipeline_mode = #tpu.pipeline_mode<synchronous>, transform_indices = @transform_8, window_bounds = array<i64: 2, 128>}, {pipeline_mode = #tpu.pipeline_mode<synchronous>, transform_indices = @transform_9, window_bounds = array<i64: 12, 128>}]} {
    %c0_i32 = arith.constant 0 : i32
    %0 = arith.cmpi eq, %arg0, %c0_i32 : i32
    %1 = arith.extui %0 : i1 to i32
    %c0_i32_0 = arith.constant 0 : i32
    %2 = arith.cmpi ne, %1, %c0_i32_0 : i32
    scf.if %2 {
      %c0_160 = arith.constant 0 : index
      %c0_161 = arith.constant 0 : index
      %496 = vector.load %arg1[%c0_160, %c0_161] : memref<12x128xbf16, #tpu.memory_space<vmem>>, vector<12x128xbf16>
      %497 = arith.extf %496 : vector<12x128xbf16> to vector<12x128xf32>
      %c0_162 = arith.constant 0 : index
      %c0_163 = arith.constant 0 : index
      %498 = vector.load %arg11[%c0_162, %c0_163] : memref<12x128xf32, #tpu.memory_space<vmem>>, vector<12x128xf32>
      tpu.vector_store %arg11[%c0_162, %c0_163], %497 {strides = array<i32>} : memref<12x128xf32, #tpu.memory_space<vmem>>, vector<12x128xf32>,
    } else {
    }
    %c0 = arith.constant 0 : index
    %c0_1 = arith.constant 0 : index
    %3 = vector.load %arg11[%c0, %c0_1] : memref<12x128xf32, #tpu.memory_space<vmem>>, vector<12x128xf32>
    %c0_2 = arith.constant 0 : index
    %c0_3 = arith.constant 0 : index
    %4 = vector.load %arg2[%c0_2, %c0_3] : memref<16x128xbf16, #tpu.memory_space<vmem>>, vector<16x128xbf16>
    %c0_4 = arith.constant 0 : index
    %c0_5 = arith.constant 0 : index
    %5 = vector.load %arg3[%c0_4, %c0_5] : memref<2x6xf32, #tpu.memory_space<vmem>>, vector<2x6xf32>
    %c0_6 = arith.constant 0 : index
    %c0_7 = arith.constant 0 : index
    %c0_8 = arith.constant 0 : index
    %6 = vector.load %arg4[%c0_6, %c0_7, %c0_8] : memref<1x128x512xbf16, #tpu.memory_space<vmem>>, vector<1x128x512xbf16>
    %7 = vector.shape_cast %6 : vector<1x128x512xbf16> to vector<128x512xbf16>
    %c0_9 = arith.constant 0 : index
    %c0_10 = arith.constant 0 : index
    %c0_11 = arith.constant 0 : index
    %8 = vector.load %arg5[%c0_9, %c0_10, %c0_11] : memref<1x128x512xbf16, #tpu.memory_space<vmem>>, vector<1x128x512xbf16>
    %9 = vector.shape_cast %8 : vector<1x128x512xbf16> to vector<128x512xbf16>
    %c0_12 = arith.constant 0 : index
    %c0_13 = arith.constant 0 : index
    %c0_14 = arith.constant 0 : index
    %10 = vector.load %arg6[%c0_12, %c0_13, %c0_14] : memref<1x128x256xbf16, #tpu.memory_space<vmem>>, vector<1x128x256xbf16>
    %11 = vector.shape_cast %10 : vector<1x128x256xbf16> to vector<128x256xbf16>
    %c0_15 = arith.constant 0 : index
    %c0_16 = arith.constant 0 : index
    %c0_17 = arith.constant 0 : index
    %12 = vector.load %arg7[%c0_15, %c0_16, %c0_17] : memref<1x256x128xbf16, #tpu.memory_space<vmem>>, vector<1x256x128xbf16>
    %13 = vector.shape_cast %12 : vector<1x256x128xbf16> to vector<256x128xbf16>
    %c0_18 = arith.constant 0 : index
    %c0_19 = arith.constant 0 : index
    %c0_20 = arith.constant 0 : index
    %14 = vector.load %arg8[%c0_18, %c0_19, %c0_20] : memref<1x12x384xf32, #tpu.memory_space<vmem>>, vector<1x12x384xf32>
    %15 = vector.shape_cast %14 : vector<1x12x384xf32> to vector<12x384xf32>
    %16 = vector.extract_strided_slice %15 {offsets = [0, 0], sizes = [1, 384], strides = [1, 1]} : vector<12x384xf32> to vector<1x384xf32>
    %17 = vector.extract_strided_slice %15 {offsets = [1, 0], sizes = [1, 128], strides = [1, 1]} : vector<12x384xf32> to vector<1x128xf32>
    %18 = vector.extract_strided_slice %15 {offsets = [2, 0], sizes = [1, 384], strides = [1, 1]} : vector<12x384xf32> to vector<1x384xf32>
    %19 = vector.extract_strided_slice %15 {offsets = [3, 0], sizes = [1, 128], strides = [1, 1]} : vector<12x384xf32> to vector<1x128xf32>
    %20 = vector.extract_strided_slice %15 {offsets = [4, 0], sizes = [1, 256], strides = [1, 1]} : vector<12x384xf32> to vector<1x256xf32>
    %21 = vector.extract_strided_slice %15 {offsets = [5, 0], sizes = [1, 128], strides = [1, 1]} : vector<12x384xf32> to vector<1x128xf32>
    %22 = vector.extract_strided_slice %15 {offsets = [6, 0], sizes = [1, 128], strides = [1, 1]} : vector<12x384xf32> to vector<1x128xf32>
    %23 = vector.extract_strided_slice %15 {offsets = [7, 0], sizes = [1, 128], strides = [1, 1]} : vector<12x384xf32> to vector<1x128xf32>
    %24 = vector.extract_strided_slice %15 {offsets = [8, 0], sizes = [1, 128], strides = [1, 1]} : vector<12x384xf32> to vector<1x128xf32>
    %25 = vector.extract_strided_slice %15 {offsets = [9, 0], sizes = [1, 128], strides = [1, 1]} : vector<12x384xf32> to vector<1x128xf32>
    %26 = vector.extract_strided_slice %15 {offsets = [10, 0], sizes = [1, 128], strides = [1, 1]} : vector<12x384xf32> to vector<1x128xf32>
    %27 = vector.extract_strided_slice %15 {offsets = [11, 0], sizes = [1, 128], strides = [1, 1]} : vector<12x384xf32> to vector<1x128xf32>
    %28 = vector.extract_strided_slice %7 {offsets = [0, 0], sizes = [128, 384], strides = [1, 1]} : vector<128x512xbf16> to vector<128x384xbf16>
    %29 = arith.truncf %3 : vector<12x128xf32> to vector<12x128xbf16>
    %cst = arith.constant dense<0.000000e+00> : vector<12x384xf32>
    %30 = tpu.matmul %29, %28, %cst {dimension_numbers = #tpu.dot_dimension_numbers<[1], [0], [0], [1], [0, 0, 1, 1], [], []>} : vector<12x128xbf16>, vector<128x384xbf16>, vector<12x384xf32> -> vector<12x384xf32>
    %31 = vector.broadcast %16 : vector<1x384xf32> to vector<12x384xf32>
    %32 = arith.addf %30, %31 : vector<12x384xf32>
    %33 = vector.extract_strided_slice %32 {offsets = [0, 0], sizes = [12, 128], strides = [1, 1]} : vector<12x384xf32> to vector<12x128xf32>
    %34 = vector.extract_strided_slice %32 {offsets = [0, 128], sizes = [12, 128], strides = [1, 1]} : vector<12x384xf32> to vector<12x128xf32>
    %35 = vector.extract_strided_slice %32 {offsets = [0, 256], sizes = [12, 128], strides = [1, 1]} : vector<12x384xf32> to vector<12x128xf32>
    %36 = tpu.iota {dimensions = array<i32: 0>} : vector<6x6xi32>
    %37 = tpu.iota {dimensions = array<i32: 1>} : vector<6x6xi32>
    %38 = arith.cmpi sgt, %37, %36 : vector<6x6xi32>
    %cst_21 = arith.constant -1.000000e+09 : f32
    %cst_22 = arith.constant 0.000000e+00 : f32
    %39 = vector.broadcast %cst_21 : f32 to vector<6x6xf32>
    %40 = vector.broadcast %cst_22 : f32 to vector<6x6xf32>
    %41 = arith.select %38, %39, %40 : vector<6x6xi1>, vector<6x6xf32>
    %42 = vector.extract_strided_slice %33 {offsets = [0, 0], sizes = [6, 128], strides = [1, 1]} : vector<12x128xf32> to vector<6x128xf32>
    %43 = arith.truncf %42 : vector<6x128xf32> to vector<6x128xbf16>
    %44 = vector.extract_strided_slice %34 {offsets = [0, 0], sizes = [6, 128], strides = [1, 1]} : vector<12x128xf32> to vector<6x128xf32>
    %45 = tpu.transpose %44, [1, 0] : vector<6x128xf32> -> vector<128x6xf32>
    %46 = arith.truncf %45 : vector<128x6xf32> to vector<128x6xbf16>
    %47 = vector.extract_strided_slice %35 {offsets = [0, 0], sizes = [6, 128], strides = [1, 1]} : vector<12x128xf32> to vector<6x128xf32>
    %48 = arith.truncf %47 : vector<6x128xf32> to vector<6x128xbf16>
    %49 = vector.extract_strided_slice %5 {offsets = [0, 0], sizes = [1, 6], strides = [1, 1]} : vector<2x6xf32> to vector<1x6xf32>
    %50 = vector.broadcast %49 : vector<1x6xf32> to vector<6x6xf32>
    %51 = arith.addf %41, %50 : vector<6x6xf32>
    %52 = vector.extract_strided_slice %43 {offsets = [0, 0], sizes = [6, 32], strides = [1, 1]} : vector<6x128xbf16> to vector<6x32xbf16>
    %53 = vector.extract_strided_slice %46 {offsets = [0, 0], sizes = [32, 6], strides = [1, 1]} : vector<128x6xbf16> to vector<32x6xbf16>
    %cst_23 = arith.constant dense<0.000000e+00> : vector<6x6xf32>
    %54 = tpu.matmul %52, %53, %cst_23 {dimension_numbers = #tpu.dot_dimension_numbers<[1], [0], [0], [1], [0, 0, 1, 1], [], []>} : vector<6x32xbf16>, vector<32x6xbf16>, vector<6x6xf32> -> vector<6x6xf32>
    %cst_24 = arith.constant 0.176776692 : f32
    %55 = vector.broadcast %cst_24 : f32 to vector<6x6xf32>
    %56 = arith.mulf %54, %55 : vector<6x6xf32>
    %57 = arith.addf %56, %51 : vector<6x6xf32>
    %cst_25 = arith.constant dense<0xFF800000> : vector<6xf32>
    %58 = vector.multi_reduction <maximumf>, %57, %cst_25 [1] : vector<6x6xf32> to vector<6xf32>
    %59 = vector.shape_cast %58 : vector<6xf32> to vector<6x1xf32>
    %60 = vector.broadcast %59 : vector<6x1xf32> to vector<6x6xf32>
    %61 = arith.subf %57, %60 : vector<6x6xf32>
    %62 = math.exp %61 : vector<6x6xf32>
    %cst_26 = arith.constant dense<0.000000e+00> : vector<6xf32>
    %63 = vector.multi_reduction <add>, %62, %cst_26 [1] : vector<6x6xf32> to vector<6xf32>
    %64 = vector.shape_cast %63 : vector<6xf32> to vector<6x1xf32>
    %65 = tpu.reciprocal %64 {approx = true} : vector<6x1xf32> -> vector<6x1xf32>
    %66 = vector.broadcast %65 : vector<6x1xf32> to vector<6x6xf32>
    %67 = arith.mulf %62, %66 : vector<6x6xf32>
    %68 = arith.truncf %67 : vector<6x6xf32> to vector<6x6xbf16>
    %69 = vector.extract_strided_slice %48 {offsets = [0, 0], sizes = [6, 32], strides = [1, 1]} : vector<6x128xbf16> to vector<6x32xbf16>
    %cst_27 = arith.constant dense<0.000000e+00> : vector<6x32xf32>
    %70 = tpu.matmul %68, %69, %cst_27 {dimension_numbers = #tpu.dot_dimension_numbers<[1], [0], [0], [1], [0, 0, 1, 1], [], []>} : vector<6x6xbf16>, vector<6x32xbf16>, vector<6x32xf32> -> vector<6x32xf32>
    %c0_28 = arith.constant 0 : index
    %c0_29 = arith.constant 0 : index
    %71 = vector.load %arg12[%c0_28, %c0_29] : memref<12x128xf32, #tpu.memory_space<vmem>>, vector<6x32xf32>
    tpu.vector_store %arg12[%c0_28, %c0_29], %70 {strides = array<i32>} : memref<12x128xf32, #tpu.memory_space<vmem>>, vector<6x32xf32>,
    %72 = vector.extract_strided_slice %43 {offsets = [0, 32], sizes = [6, 32], strides = [1, 1]} : vector<6x128xbf16> to vector<6x32xbf16>
    %73 = vector.extract_strided_slice %46 {offsets = [32, 0], sizes = [32, 6], strides = [1, 1]} : vector<128x6xbf16> to vector<32x6xbf16>
    %cst_30 = arith.constant dense<0.000000e+00> : vector<6x6xf32>
    %74 = tpu.matmul %72, %73, %cst_30 {dimension_numbers = #tpu.dot_dimension_numbers<[1], [0], [0], [1], [0, 0, 1, 1], [], []>} : vector<6x32xbf16>, vector<32x6xbf16>, vector<6x6xf32> -> vector<6x6xf32>
    %cst_31 = arith.constant 0.176776692 : f32
    %75 = vector.broadcast %cst_31 : f32 to vector<6x6xf32>
    %76 = arith.mulf %74, %75 : vector<6x6xf32>
    %77 = arith.addf %76, %51 : vector<6x6xf32>
    %cst_32 = arith.constant dense<0xFF800000> : vector<6xf32>
    %78 = vector.multi_reduction <maximumf>, %77, %cst_32 [1] : vector<6x6xf32> to vector<6xf32>
    %79 = vector.shape_cast %78 : vector<6xf32> to vector<6x1xf32>
    %80 = vector.broadcast %79 : vector<6x1xf32> to vector<6x6xf32>
    %81 = arith.subf %77, %80 : vector<6x6xf32>
    %82 = math.exp %81 : vector<6x6xf32>
    %cst_33 = arith.constant dense<0.000000e+00> : vector<6xf32>
    %83 = vector.multi_reduction <add>, %82, %cst_33 [1] : vector<6x6xf32> to vector<6xf32>
    %84 = vector.shape_cast %83 : vector<6xf32> to vector<6x1xf32>
    %85 = tpu.reciprocal %84 {approx = true} : vector<6x1xf32> -> vector<6x1xf32>
    %86 = vector.broadcast %85 : vector<6x1xf32> to vector<6x6xf32>
    %87 = arith.mulf %82, %86 : vector<6x6xf32>
    %88 = arith.truncf %87 : vector<6x6xf32> to vector<6x6xbf16>
    %89 = vector.extract_strided_slice %48 {offsets = [0, 32], sizes = [6, 32], strides = [1, 1]} : vector<6x128xbf16> to vector<6x32xbf16>
    %cst_34 = arith.constant dense<0.000000e+00> : vector<6x32xf32>
    %90 = tpu.matmul %88, %89, %cst_34 {dimension_numbers = #tpu.dot_dimension_numbers<[1], [0], [0], [1], [0, 0, 1, 1], [], []>} : vector<6x6xbf16>, vector<6x32xbf16>, vector<6x32xf32> -> vector<6x32xf32>
    %c0_35 = arith.constant 0 : index
    %c32 = arith.constant 32 : index
    %91 = vector.load %arg12[%c0_35, %c32] : memref<12x128xf32, #tpu.memory_space<vmem>>, vector<6x32xf32>
    tpu.vector_store %arg12[%c0_35, %c32], %90 {strides = array<i32>} : memref<12x128xf32, #tpu.memory_space<vmem>>, vector<6x32xf32>,
    %92 = vector.extract_strided_slice %43 {offsets = [0, 64], sizes = [6, 32], strides = [1, 1]} : vector<6x128xbf16> to vector<6x32xbf16>
    %93 = vector.extract_strided_slice %46 {offsets = [64, 0], sizes = [32, 6], strides = [1, 1]} : vector<128x6xbf16> to vector<32x6xbf16>
    %cst_36 = arith.constant dense<0.000000e+00> : vector<6x6xf32>
    %94 = tpu.matmul %92, %93, %cst_36 {dimension_numbers = #tpu.dot_dimension_numbers<[1], [0], [0], [1], [0, 0, 1, 1], [], []>} : vector<6x32xbf16>, vector<32x6xbf16>, vector<6x6xf32> -> vector<6x6xf32>
    %cst_37 = arith.constant 0.176776692 : f32
    %95 = vector.broadcast %cst_37 : f32 to vector<6x6xf32>
    %96 = arith.mulf %94, %95 : vector<6x6xf32>
    %97 = arith.addf %96, %51 : vector<6x6xf32>
    %cst_38 = arith.constant dense<0xFF800000> : vector<6xf32>
    %98 = vector.multi_reduction <maximumf>, %97, %cst_38 [1] : vector<6x6xf32> to vector<6xf32>
    %99 = vector.shape_cast %98 : vector<6xf32> to vector<6x1xf32>
    %100 = vector.broadcast %99 : vector<6x1xf32> to vector<6x6xf32>
    %101 = arith.subf %97, %100 : vector<6x6xf32>
    %102 = math.exp %101 : vector<6x6xf32>
    %cst_39 = arith.constant dense<0.000000e+00> : vector<6xf32>
    %103 = vector.multi_reduction <add>, %102, %cst_39 [1] : vector<6x6xf32> to vector<6xf32>
    %104 = vector.shape_cast %103 : vector<6xf32> to vector<6x1xf32>
    %105 = tpu.reciprocal %104 {approx = true} : vector<6x1xf32> -> vector<6x1xf32>
    %106 = vector.broadcast %105 : vector<6x1xf32> to vector<6x6xf32>
    %107 = arith.mulf %102, %106 : vector<6x6xf32>
    %108 = arith.truncf %107 : vector<6x6xf32> to vector<6x6xbf16>
    %109 = vector.extract_strided_slice %48 {offsets = [0, 64], sizes = [6, 32], strides = [1, 1]} : vector<6x128xbf16> to vector<6x32xbf16>
    %cst_40 = arith.constant dense<0.000000e+00> : vector<6x32xf32>
    %110 = tpu.matmul %108, %109, %cst_40 {dimension_numbers = #tpu.dot_dimension_numbers<[1], [0], [0], [1], [0, 0, 1, 1], [], []>} : vector<6x6xbf16>, vector<6x32xbf16>, vector<6x32xf32> -> vector<6x32xf32>
    %c0_41 = arith.constant 0 : index
    %c64 = arith.constant 64 : index
    %111 = vector.load %arg12[%c0_41, %c64] : memref<12x128xf32, #tpu.memory_space<vmem>>, vector<6x32xf32>
    tpu.vector_store %arg12[%c0_41, %c64], %110 {strides = array<i32>} : memref<12x128xf32, #tpu.memory_space<vmem>>, vector<6x32xf32>,
    %112 = vector.extract_strided_slice %43 {offsets = [0, 96], sizes = [6, 32], strides = [1, 1]} : vector<6x128xbf16> to vector<6x32xbf16>
    %113 = vector.extract_strided_slice %46 {offsets = [96, 0], sizes = [32, 6], strides = [1, 1]} : vector<128x6xbf16> to vector<32x6xbf16>
    %cst_42 = arith.constant dense<0.000000e+00> : vector<6x6xf32>
    %114 = tpu.matmul %112, %113, %cst_42 {dimension_numbers = #tpu.dot_dimension_numbers<[1], [0], [0], [1], [0, 0, 1, 1], [], []>} : vector<6x32xbf16>, vector<32x6xbf16>, vector<6x6xf32> -> vector<6x6xf32>
    %cst_43 = arith.constant 0.176776692 : f32
    %115 = vector.broadcast %cst_43 : f32 to vector<6x6xf32>
    %116 = arith.mulf %114, %115 : vector<6x6xf32>
    %117 = arith.addf %116, %51 : vector<6x6xf32>
    %cst_44 = arith.constant dense<0xFF800000> : vector<6xf32>
    %118 = vector.multi_reduction <maximumf>, %117, %cst_44 [1] : vector<6x6xf32> to vector<6xf32>
    %119 = vector.shape_cast %118 : vector<6xf32> to vector<6x1xf32>
    %120 = vector.broadcast %119 : vector<6x1xf32> to vector<6x6xf32>
    %121 = arith.subf %117, %120 : vector<6x6xf32>
    %122 = math.exp %121 : vector<6x6xf32>
    %cst_45 = arith.constant dense<0.000000e+00> : vector<6xf32>
    %123 = vector.multi_reduction <add>, %122, %cst_45 [1] : vector<6x6xf32> to vector<6xf32>
    %124 = vector.shape_cast %123 : vector<6xf32> to vector<6x1xf32>
    %125 = tpu.reciprocal %124 {approx = true} : vector<6x1xf32> -> vector<6x1xf32>
    %126 = vector.broadcast %125 : vector<6x1xf32> to vector<6x6xf32>
    %127 = arith.mulf %122, %126 : vector<6x6xf32>
    %128 = arith.truncf %127 : vector<6x6xf32> to vector<6x6xbf16>
    %129 = vector.extract_strided_slice %48 {offsets = [0, 96], sizes = [6, 32], strides = [1, 1]} : vector<6x128xbf16> to vector<6x32xbf16>
    %cst_46 = arith.constant dense<0.000000e+00> : vector<6x32xf32>
    %130 = tpu.matmul %128, %129, %cst_46 {dimension_numbers = #tpu.dot_dimension_numbers<[1], [0], [0], [1], [0, 0, 1, 1], [], []>} : vector<6x6xbf16>, vector<6x32xbf16>, vector<6x32xf32> -> vector<6x32xf32>
    %c0_47 = arith.constant 0 : index
    %c96 = arith.constant 96 : index
    %131 = vector.load %arg12[%c0_47, %c96] : memref<12x128xf32, #tpu.memory_space<vmem>>, vector<6x32xf32>
    tpu.vector_store %arg12[%c0_47, %c96], %130 {strides = array<i32>} : memref<12x128xf32, #tpu.memory_space<vmem>>, vector<6x32xf32>,
    %132 = vector.extract_strided_slice %33 {offsets = [6, 0], sizes = [6, 128], strides = [1, 1]} : vector<12x128xf32> to vector<6x128xf32>
    %133 = arith.truncf %132 : vector<6x128xf32> to vector<6x128xbf16>
    %134 = vector.extract_strided_slice %34 {offsets = [6, 0], sizes = [6, 128], strides = [1, 1]} : vector<12x128xf32> to vector<6x128xf32>
    %135 = tpu.transpose %134, [1, 0] : vector<6x128xf32> -> vector<128x6xf32>
    %136 = arith.truncf %135 : vector<128x6xf32> to vector<128x6xbf16>
    %137 = vector.extract_strided_slice %35 {offsets = [6, 0], sizes = [6, 128], strides = [1, 1]} : vector<12x128xf32> to vector<6x128xf32>
    %138 = arith.truncf %137 : vector<6x128xf32> to vector<6x128xbf16>
    %139 = vector.extract_strided_slice %5 {offsets = [1, 0], sizes = [1, 6], strides = [1, 1]} : vector<2x6xf32> to vector<1x6xf32>
    %140 = vector.broadcast %139 : vector<1x6xf32> to vector<6x6xf32>
    %141 = arith.addf %41, %140 : vector<6x6xf32>
    %142 = vector.extract_strided_slice %133 {offsets = [0, 0], sizes = [6, 32], strides = [1, 1]} : vector<6x128xbf16> to vector<6x32xbf16>
    %143 = vector.extract_strided_slice %136 {offsets = [0, 0], sizes = [32, 6], strides = [1, 1]} : vector<128x6xbf16> to vector<32x6xbf16>
    %cst_48 = arith.constant dense<0.000000e+00> : vector<6x6xf32>
    %144 = tpu.matmul %142, %143, %cst_48 {dimension_numbers = #tpu.dot_dimension_numbers<[1], [0], [0], [1], [0, 0, 1, 1], [], []>} : vector<6x32xbf16>, vector<32x6xbf16>, vector<6x6xf32> -> vector<6x6xf32>
    %cst_49 = arith.constant 0.176776692 : f32
    %145 = vector.broadcast %cst_49 : f32 to vector<6x6xf32>
    %146 = arith.mulf %144, %145 : vector<6x6xf32>
    %147 = arith.addf %146, %141 : vector<6x6xf32>
    %cst_50 = arith.constant dense<0xFF800000> : vector<6xf32>
    %148 = vector.multi_reduction <maximumf>, %147, %cst_50 [1] : vector<6x6xf32> to vector<6xf32>
    %149 = vector.shape_cast %148 : vector<6xf32> to vector<6x1xf32>
    %150 = vector.broadcast %149 : vector<6x1xf32> to vector<6x6xf32>
    %151 = arith.subf %147, %150 : vector<6x6xf32>
    %152 = math.exp %151 : vector<6x6xf32>
    %cst_51 = arith.constant dense<0.000000e+00> : vector<6xf32>
    %153 = vector.multi_reduction <add>, %152, %cst_51 [1] : vector<6x6xf32> to vector<6xf32>
    %154 = vector.shape_cast %153 : vector<6xf32> to vector<6x1xf32>
    %155 = tpu.reciprocal %154 {approx = true} : vector<6x1xf32> -> vector<6x1xf32>
    %156 = vector.broadcast %155 : vector<6x1xf32> to vector<6x6xf32>
    %157 = arith.mulf %152, %156 : vector<6x6xf32>
    %158 = arith.truncf %157 : vector<6x6xf32> to vector<6x6xbf16>
    %159 = vector.extract_strided_slice %138 {offsets = [0, 0], sizes = [6, 32], strides = [1, 1]} : vector<6x128xbf16> to vector<6x32xbf16>
    %cst_52 = arith.constant dense<0.000000e+00> : vector<6x32xf32>
    %160 = tpu.matmul %158, %159, %cst_52 {dimension_numbers = #tpu.dot_dimension_numbers<[1], [0], [0], [1], [0, 0, 1, 1], [], []>} : vector<6x6xbf16>, vector<6x32xbf16>, vector<6x32xf32> -> vector<6x32xf32>
    %c6 = arith.constant 6 : index
    %c0_53 = arith.constant 0 : index
    %161 = vector.load %arg12[%c6, %c0_53] : memref<12x128xf32, #tpu.memory_space<vmem>>, vector<6x32xf32>
    tpu.vector_store %arg12[%c6, %c0_53], %160 {strides = array<i32>} : memref<12x128xf32, #tpu.memory_space<vmem>>, vector<6x32xf32>,
    %162 = vector.extract_strided_slice %133 {offsets = [0, 32], sizes = [6, 32], strides = [1, 1]} : vector<6x128xbf16> to vector<6x32xbf16>
    %163 = vector.extract_strided_slice %136 {offsets = [32, 0], sizes = [32, 6], strides = [1, 1]} : vector<128x6xbf16> to vector<32x6xbf16>
    %cst_54 = arith.constant dense<0.000000e+00> : vector<6x6xf32>
    %164 = tpu.matmul %162, %163, %cst_54 {dimension_numbers = #tpu.dot_dimension_numbers<[1], [0], [0], [1], [0, 0, 1, 1], [], []>} : vector<6x32xbf16>, vector<32x6xbf16>, vector<6x6xf32> -> vector<6x6xf32>
    %cst_55 = arith.constant 0.176776692 : f32
    %165 = vector.broadcast %cst_55 : f32 to vector<6x6xf32>
    %166 = arith.mulf %164, %165 : vector<6x6xf32>
    %167 = arith.addf %166, %141 : vector<6x6xf32>
    %cst_56 = arith.constant dense<0xFF800000> : vector<6xf32>
    %168 = vector.multi_reduction <maximumf>, %167, %cst_56 [1] : vector<6x6xf32> to vector<6xf32>
    %169 = vector.shape_cast %168 : vector<6xf32> to vector<6x1xf32>
    %170 = vector.broadcast %169 : vector<6x1xf32> to vector<6x6xf32>
    %171 = arith.subf %167, %170 : vector<6x6xf32>
    %172 = math.exp %171 : vector<6x6xf32>
    %cst_57 = arith.constant dense<0.000000e+00> : vector<6xf32>
    %173 = vector.multi_reduction <add>, %172, %cst_57 [1] : vector<6x6xf32> to vector<6xf32>
    %174 = vector.shape_cast %173 : vector<6xf32> to vector<6x1xf32>
    %175 = tpu.reciprocal %174 {approx = true} : vector<6x1xf32> -> vector<6x1xf32>
    %176 = vector.broadcast %175 : vector<6x1xf32> to vector<6x6xf32>
    %177 = arith.mulf %172, %176 : vector<6x6xf32>
    %178 = arith.truncf %177 : vector<6x6xf32> to vector<6x6xbf16>
    %179 = vector.extract_strided_slice %138 {offsets = [0, 32], sizes = [6, 32], strides = [1, 1]} : vector<6x128xbf16> to vector<6x32xbf16>
    %cst_58 = arith.constant dense<0.000000e+00> : vector<6x32xf32>
    %180 = tpu.matmul %178, %179, %cst_58 {dimension_numbers = #tpu.dot_dimension_numbers<[1], [0], [0], [1], [0, 0, 1, 1], [], []>} : vector<6x6xbf16>, vector<6x32xbf16>, vector<6x32xf32> -> vector<6x32xf32>
    %c6_59 = arith.constant 6 : index
    %c32_60 = arith.constant 32 : index
    %181 = vector.load %arg12[%c6_59, %c32_60] : memref<12x128xf32, #tpu.memory_space<vmem>>, vector<6x32xf32>
    tpu.vector_store %arg12[%c6_59, %c32_60], %180 {strides = array<i32>} : memref<12x128xf32, #tpu.memory_space<vmem>>, vector<6x32xf32>,
    %182 = vector.extract_strided_slice %133 {offsets = [0, 64], sizes = [6, 32], strides = [1, 1]} : vector<6x128xbf16> to vector<6x32xbf16>
    %183 = vector.extract_strided_slice %136 {offsets = [64, 0], sizes = [32, 6], strides = [1, 1]} : vector<128x6xbf16> to vector<32x6xbf16>
    %cst_61 = arith.constant dense<0.000000e+00> : vector<6x6xf32>
    %184 = tpu.matmul %182, %183, %cst_61 {dimension_numbers = #tpu.dot_dimension_numbers<[1], [0], [0], [1], [0, 0, 1, 1], [], []>} : vector<6x32xbf16>, vector<32x6xbf16>, vector<6x6xf32> -> vector<6x6xf32>
    %cst_62 = arith.constant 0.176776692 : f32
    %185 = vector.broadcast %cst_62 : f32 to vector<6x6xf32>
    %186 = arith.mulf %184, %185 : vector<6x6xf32>
    %187 = arith.addf %186, %141 : vector<6x6xf32>
    %cst_63 = arith.constant dense<0xFF800000> : vector<6xf32>
    %188 = vector.multi_reduction <maximumf>, %187, %cst_63 [1] : vector<6x6xf32> to vector<6xf32>
    %189 = vector.shape_cast %188 : vector<6xf32> to vector<6x1xf32>
    %190 = vector.broadcast %189 : vector<6x1xf32> to vector<6x6xf32>
    %191 = arith.subf %187, %190 : vector<6x6xf32>
    %192 = math.exp %191 : vector<6x6xf32>
    %cst_64 = arith.constant dense<0.000000e+00> : vector<6xf32>
    %193 = vector.multi_reduction <add>, %192, %cst_64 [1] : vector<6x6xf32> to vector<6xf32>
    %194 = vector.shape_cast %193 : vector<6xf32> to vector<6x1xf32>
    %195 = tpu.reciprocal %194 {approx = true} : vector<6x1xf32> -> vector<6x1xf32>
    %196 = vector.broadcast %195 : vector<6x1xf32> to vector<6x6xf32>
    %197 = arith.mulf %192, %196 : vector<6x6xf32>
    %198 = arith.truncf %197 : vector<6x6xf32> to vector<6x6xbf16>
    %199 = vector.extract_strided_slice %138 {offsets = [0, 64], sizes = [6, 32], strides = [1, 1]} : vector<6x128xbf16> to vector<6x32xbf16>
    %cst_65 = arith.constant dense<0.000000e+00> : vector<6x32xf32>
    %200 = tpu.matmul %198, %199, %cst_65 {dimension_numbers = #tpu.dot_dimension_numbers<[1], [0], [0], [1], [0, 0, 1, 1], [], []>} : vector<6x6xbf16>, vector<6x32xbf16>, vector<6x32xf32> -> vector<6x32xf32>
    %c6_66 = arith.constant 6 : index
    %c64_67 = arith.constant 64 : index
    %201 = vector.load %arg12[%c6_66, %c64_67] : memref<12x128xf32, #tpu.memory_space<vmem>>, vector<6x32xf32>
    tpu.vector_store %arg12[%c6_66, %c64_67], %200 {strides = array<i32>} : memref<12x128xf32, #tpu.memory_space<vmem>>, vector<6x32xf32>,
    %202 = vector.extract_strided_slice %133 {offsets = [0, 96], sizes = [6, 32], strides = [1, 1]} : vector<6x128xbf16> to vector<6x32xbf16>
    %203 = vector.extract_strided_slice %136 {offsets = [96, 0], sizes = [32, 6], strides = [1, 1]} : vector<128x6xbf16> to vector<32x6xbf16>
    %cst_68 = arith.constant dense<0.000000e+00> : vector<6x6xf32>
    %204 = tpu.matmul %202, %203, %cst_68 {dimension_numbers = #tpu.dot_dimension_numbers<[1], [0], [0], [1], [0, 0, 1, 1], [], []>} : vector<6x32xbf16>, vector<32x6xbf16>, vector<6x6xf32> -> vector<6x6xf32>
    %cst_69 = arith.constant 0.176776692 : f32
    %205 = vector.broadcast %cst_69 : f32 to vector<6x6xf32>
    %206 = arith.mulf %204, %205 : vector<6x6xf32>
    %207 = arith.addf %206, %141 : vector<6x6xf32>
    %cst_70 = arith.constant dense<0xFF800000> : vector<6xf32>
    %208 = vector.multi_reduction <maximumf>, %207, %cst_70 [1] : vector<6x6xf32> to vector<6xf32>
    %209 = vector.shape_cast %208 : vector<6xf32> to vector<6x1xf32>
    %210 = vector.broadcast %209 : vector<6x1xf32> to vector<6x6xf32>
    %211 = arith.subf %207, %210 : vector<6x6xf32>
    %212 = math.exp %211 : vector<6x6xf32>
    %cst_71 = arith.constant dense<0.000000e+00> : vector<6xf32>
    %213 = vector.multi_reduction <add>, %212, %cst_71 [1] : vector<6x6xf32> to vector<6xf32>
    %214 = vector.shape_cast %213 : vector<6xf32> to vector<6x1xf32>
    %215 = tpu.reciprocal %214 {approx = true} : vector<6x1xf32> -> vector<6x1xf32>
    %216 = vector.broadcast %215 : vector<6x1xf32> to vector<6x6xf32>
    %217 = arith.mulf %212, %216 : vector<6x6xf32>
    %218 = arith.truncf %217 : vector<6x6xf32> to vector<6x6xbf16>
    %219 = vector.extract_strided_slice %138 {offsets = [0, 96], sizes = [6, 32], strides = [1, 1]} : vector<6x128xbf16> to vector<6x32xbf16>
    %cst_72 = arith.constant dense<0.000000e+00> : vector<6x32xf32>
    %220 = tpu.matmul %218, %219, %cst_72 {dimension_numbers = #tpu.dot_dimension_numbers<[1], [0], [0], [1], [0, 0, 1, 1], [], []>} : vector<6x6xbf16>, vector<6x32xbf16>, vector<6x32xf32> -> vector<6x32xf32>
    %c6_73 = arith.constant 6 : index
    %c96_74 = arith.constant 96 : index
    %221 = vector.load %arg12[%c6_73, %c96_74] : memref<12x128xf32, #tpu.memory_space<vmem>>, vector<6x32xf32>
    tpu.vector_store %arg12[%c6_73, %c96_74], %220 {strides = array<i32>} : memref<12x128xf32, #tpu.memory_space<vmem>>, vector<6x32xf32>,
    %c0_75 = arith.constant 0 : index
    %c0_76 = arith.constant 0 : index
    %222 = vector.load %arg12[%c0_75, %c0_76] : memref<12x128xf32, #tpu.memory_space<vmem>>, vector<12x128xf32>
    %223 = vector.extract_strided_slice %7 {offsets = [0, 384], sizes = [128, 128], strides = [1, 1]} : vector<128x512xbf16> to vector<128x128xbf16>
    %224 = arith.truncf %222 : vector<12x128xf32> to vector<12x128xbf16>
    %cst_77 = arith.constant dense<0.000000e+00> : vector<12x128xf32>
    %225 = tpu.matmul %224, %223, %cst_77 {dimension_numbers = #tpu.dot_dimension_numbers<[1], [0], [0], [1], [0, 0, 1, 1], [], []>} : vector<12x128xbf16>, vector<128x128xbf16>, vector<12x128xf32> -> vector<12x128xf32>
    %226 = vector.broadcast %17 : vector<1x128xf32> to vector<12x128xf32>
    %227 = arith.addf %225, %226 : vector<12x128xf32>
    %228 = arith.addf %3, %227 : vector<12x128xf32>
    %cst_78 = arith.constant dense<0.000000e+00> : vector<12xf32>
    %229 = vector.multi_reduction <add>, %228, %cst_78 [1] : vector<12x128xf32> to vector<12xf32>
    %230 = vector.shape_cast %229 : vector<12xf32> to vector<12x1xf32>
    %cst_79 = arith.constant 1.280000e+02 : f32
    %231 = vector.broadcast %cst_79 : f32 to vector<12x1xf32>
    %232 = arith.divf %230, %231 : vector<12x1xf32>
    %233 = vector.broadcast %232 : vector<12x1xf32> to vector<12x128xf32>
    %234 = arith.subf %228, %233 : vector<12x128xf32>
    %235 = arith.mulf %234, %234 : vector<12x128xf32>
    %cst_80 = arith.constant dense<0.000000e+00> : vector<12xf32>
    %236 = vector.multi_reduction <add>, %235, %cst_80 [1] : vector<12x128xf32> to vector<12xf32>
    %237 = vector.shape_cast %236 : vector<12xf32> to vector<12x1xf32>
    %cst_81 = arith.constant 1.280000e+02 : f32
    %238 = vector.broadcast %cst_81 : f32 to vector<12x1xf32>
    %239 = arith.divf %237, %238 : vector<12x1xf32>
    %240 = vector.broadcast %232 : vector<12x1xf32> to vector<12x128xf32>
    %241 = arith.subf %228, %240 : vector<12x128xf32>
    %cst_82 = arith.constant 9.99999974E-6 : f32
    %242 = vector.broadcast %cst_82 : f32 to vector<12x1xf32>
    %243 = arith.addf %239, %242 : vector<12x1xf32>
    %244 = math.rsqrt %243 : vector<12x1xf32>
    %245 = vector.broadcast %244 : vector<12x1xf32> to vector<12x128xf32>
    %246 = arith.mulf %241, %245 : vector<12x128xf32>
    %247 = vector.broadcast %22 : vector<1x128xf32> to vector<12x128xf32>
    %248 = arith.mulf %246, %247 : vector<12x128xf32>
    %249 = vector.broadcast %23 : vector<1x128xf32> to vector<12x128xf32>
    %250 = arith.addf %248, %249 : vector<12x128xf32>
    %251 = vector.extract_strided_slice %9 {offsets = [0, 0], sizes = [128, 128], strides = [1, 1]} : vector<128x512xbf16> to vector<128x128xbf16>
    %252 = vector.extract_strided_slice %18 {offsets = [0, 0], sizes = [1, 128], strides = [1, 1]} : vector<1x384xf32> to vector<1x128xf32>
    %253 = arith.truncf %250 : vector<12x128xf32> to vector<12x128xbf16>
    %cst_83 = arith.constant dense<0.000000e+00> : vector<12x128xf32>
    %254 = tpu.matmul %253, %251, %cst_83 {dimension_numbers = #tpu.dot_dimension_numbers<[1], [0], [0], [1], [0, 0, 1, 1], [], []>} : vector<12x128xbf16>, vector<128x128xbf16>, vector<12x128xf32> -> vector<12x128xf32>
    %255 = vector.broadcast %252 : vector<1x128xf32> to vector<12x128xf32>
    %256 = arith.addf %254, %255 : vector<12x128xf32>
    %257 = vector.extract_strided_slice %9 {offsets = [0, 128], sizes = [128, 256], strides = [1, 1]} : vector<128x512xbf16> to vector<128x256xbf16>
    %258 = vector.extract_strided_slice %18 {offsets = [0, 128], sizes = [1, 256], strides = [1, 1]} : vector<1x384xf32> to vector<1x256xf32>
    %cst_84 = arith.constant dense<0.000000e+00> : vector<16x256xf32>
    %259 = tpu.matmul %4, %257, %cst_84 {dimension_numbers = #tpu.dot_dimension_numbers<[1], [0], [0], [1], [0, 0, 1, 1], [], []>} : vector<16x128xbf16>, vector<128x256xbf16>, vector<16x256xf32> -> vector<16x256xf32>
    %260 = vector.broadcast %258 : vector<1x256xf32> to vector<16x256xf32>
    %261 = arith.addf %259, %260 : vector<16x256xf32>
    %262 = vector.extract_strided_slice %261 {offsets = [0, 0], sizes = [16, 128], strides = [1, 1]} : vector<16x256xf32> to vector<16x128xf32>
    %263 = vector.extract_strided_slice %261 {offsets = [0, 128], sizes = [16, 128], strides = [1, 1]} : vector<16x256xf32> to vector<16x128xf32>
    %264 = vector.extract_strided_slice %256 {offsets = [0, 0], sizes = [6, 128], strides = [1, 1]} : vector<12x128xf32> to vector<6x128xf32>
    %265 = arith.truncf %264 : vector<6x128xf32> to vector<6x128xbf16>
    %266 = vector.extract_strided_slice %262 {offsets = [0, 0], sizes = [8, 128], strides = [1, 1]} : vector<16x128xf32> to vector<8x128xf32>
    %267 = tpu.transpose %266, [1, 0] : vector<8x128xf32> -> vector<128x8xf32>
    %268 = arith.truncf %267 : vector<128x8xf32> to vector<128x8xbf16>
    %269 = vector.extract_strided_slice %263 {offsets = [0, 0], sizes = [8, 128], strides = [1, 1]} : vector<16x128xf32> to vector<8x128xf32>
    %270 = arith.truncf %269 : vector<8x128xf32> to vector<8x128xbf16>
    %271 = vector.extract_strided_slice %265 {offsets = [0, 0], sizes = [6, 32], strides = [1, 1]} : vector<6x128xbf16> to vector<6x32xbf16>
    %272 = vector.extract_strided_slice %268 {offsets = [0, 0], sizes = [32, 8], strides = [1, 1]} : vector<128x8xbf16> to vector<32x8xbf16>
    %cst_85 = arith.constant dense<0.000000e+00> : vector<6x8xf32>
    %273 = tpu.matmul %271, %272, %cst_85 {dimension_numbers = #tpu.dot_dimension_numbers<[1], [0], [0], [1], [0, 0, 1, 1], [], []>} : vector<6x32xbf16>, vector<32x8xbf16>, vector<6x8xf32> -> vector<6x8xf32>
    %cst_86 = arith.constant 0.176776692 : f32
    %274 = vector.broadcast %cst_86 : f32 to vector<6x8xf32>
    %275 = arith.mulf %273, %274 : vector<6x8xf32>
    %cst_87 = arith.constant dense<0xFF800000> : vector<6xf32>
    %276 = vector.multi_reduction <maximumf>, %275, %cst_87 [1] : vector<6x8xf32> to vector<6xf32>
    %277 = vector.shape_cast %276 : vector<6xf32> to vector<6x1xf32>
    %278 = vector.broadcast %277 : vector<6x1xf32> to vector<6x8xf32>
    %279 = arith.subf %275, %278 : vector<6x8xf32>
    %280 = math.exp %279 : vector<6x8xf32>
    %cst_88 = arith.constant dense<0.000000e+00> : vector<6xf32>
    %281 = vector.multi_reduction <add>, %280, %cst_88 [1] : vector<6x8xf32> to vector<6xf32>
    %282 = vector.shape_cast %281 : vector<6xf32> to vector<6x1xf32>
    %283 = tpu.reciprocal %282 {approx = true} : vector<6x1xf32> -> vector<6x1xf32>
    %284 = vector.broadcast %283 : vector<6x1xf32> to vector<6x8xf32>
    %285 = arith.mulf %280, %284 : vector<6x8xf32>
    %286 = arith.truncf %285 : vector<6x8xf32> to vector<6x8xbf16>
    %287 = vector.extract_strided_slice %270 {offsets = [0, 0], sizes = [8, 32], strides = [1, 1]} : vector<8x128xbf16> to vector<8x32xbf16>
    %cst_89 = arith.constant dense<0.000000e+00> : vector<6x32xf32>
    %288 = tpu.matmul %286, %287, %cst_89 {dimension_numbers = #tpu.dot_dimension_numbers<[1], [0], [0], [1], [0, 0, 1, 1], [], []>} : vector<6x8xbf16>, vector<8x32xbf16>, vector<6x32xf32> -> vector<6x32xf32>
    %c0_90 = arith.constant 0 : index
    %c0_91 = arith.constant 0 : index
    %289 = vector.load %arg12[%c0_90, %c0_91] : memref<12x128xf32, #tpu.memory_space<vmem>>, vector<6x32xf32>
    tpu.vector_store %arg12[%c0_90, %c0_91], %288 {strides = array<i32>} : memref<12x128xf32, #tpu.memory_space<vmem>>, vector<6x32xf32>,
    %290 = vector.extract_strided_slice %265 {offsets = [0, 32], sizes = [6, 32], strides = [1, 1]} : vector<6x128xbf16> to vector<6x32xbf16>
    %291 = vector.extract_strided_slice %268 {offsets = [32, 0], sizes = [32, 8], strides = [1, 1]} : vector<128x8xbf16> to vector<32x8xbf16>
    %cst_92 = arith.constant dense<0.000000e+00> : vector<6x8xf32>
    %292 = tpu.matmul %290, %291, %cst_92 {dimension_numbers = #tpu.dot_dimension_numbers<[1], [0], [0], [1], [0, 0, 1, 1], [], []>} : vector<6x32xbf16>, vector<32x8xbf16>, vector<6x8xf32> -> vector<6x8xf32>
    %cst_93 = arith.constant 0.176776692 : f32
    %293 = vector.broadcast %cst_93 : f32 to vector<6x8xf32>
    %294 = arith.mulf %292, %293 : vector<6x8xf32>
    %cst_94 = arith.constant dense<0xFF800000> : vector<6xf32>
    %295 = vector.multi_reduction <maximumf>, %294, %cst_94 [1] : vector<6x8xf32> to vector<6xf32>
    %296 = vector.shape_cast %295 : vector<6xf32> to vector<6x1xf32>
    %297 = vector.broadcast %296 : vector<6x1xf32> to vector<6x8xf32>
    %298 = arith.subf %294, %297 : vector<6x8xf32>
    %299 = math.exp %298 : vector<6x8xf32>
    %cst_95 = arith.constant dense<0.000000e+00> : vector<6xf32>
    %300 = vector.multi_reduction <add>, %299, %cst_95 [1] : vector<6x8xf32> to vector<6xf32>
    %301 = vector.shape_cast %300 : vector<6xf32> to vector<6x1xf32>
    %302 = tpu.reciprocal %301 {approx = true} : vector<6x1xf32> -> vector<6x1xf32>
    %303 = vector.broadcast %302 : vector<6x1xf32> to vector<6x8xf32>
    %304 = arith.mulf %299, %303 : vector<6x8xf32>
    %305 = arith.truncf %304 : vector<6x8xf32> to vector<6x8xbf16>
    %306 = vector.extract_strided_slice %270 {offsets = [0, 32], sizes = [8, 32], strides = [1, 1]} : vector<8x128xbf16> to vector<8x32xbf16>
    %cst_96 = arith.constant dense<0.000000e+00> : vector<6x32xf32>
    %307 = tpu.matmul %305, %306, %cst_96 {dimension_numbers = #tpu.dot_dimension_numbers<[1], [0], [0], [1], [0, 0, 1, 1], [], []>} : vector<6x8xbf16>, vector<8x32xbf16>, vector<6x32xf32> -> vector<6x32xf32>
    %c0_97 = arith.constant 0 : index
    %c32_98 = arith.constant 32 : index
    %308 = vector.load %arg12[%c0_97, %c32_98] : memref<12x128xf32, #tpu.memory_space<vmem>>, vector<6x32xf32>
    tpu.vector_store %arg12[%c0_97, %c32_98], %307 {strides = array<i32>} : memref<12x128xf32, #tpu.memory_space<vmem>>, vector<6x32xf32>,
    %309 = vector.extract_strided_slice %265 {offsets = [0, 64], sizes = [6, 32], strides = [1, 1]} : vector<6x128xbf16> to vector<6x32xbf16>
    %310 = vector.extract_strided_slice %268 {offsets = [64, 0], sizes = [32, 8], strides = [1, 1]} : vector<128x8xbf16> to vector<32x8xbf16>
    %cst_99 = arith.constant dense<0.000000e+00> : vector<6x8xf32>
    %311 = tpu.matmul %309, %310, %cst_99 {dimension_numbers = #tpu.dot_dimension_numbers<[1], [0], [0], [1], [0, 0, 1, 1], [], []>} : vector<6x32xbf16>, vector<32x8xbf16>, vector<6x8xf32> -> vector<6x8xf32>
    %cst_100 = arith.constant 0.176776692 : f32
    %312 = vector.broadcast %cst_100 : f32 to vector<6x8xf32>
    %313 = arith.mulf %311, %312 : vector<6x8xf32>
    %cst_101 = arith.constant dense<0xFF800000> : vector<6xf32>
    %314 = vector.multi_reduction <maximumf>, %313, %cst_101 [1] : vector<6x8xf32> to vector<6xf32>
    %315 = vector.shape_cast %314 : vector<6xf32> to vector<6x1xf32>
    %316 = vector.broadcast %315 : vector<6x1xf32> to vector<6x8xf32>
    %317 = arith.subf %313, %316 : vector<6x8xf32>
    %318 = math.exp %317 : vector<6x8xf32>
    %cst_102 = arith.constant dense<0.000000e+00> : vector<6xf32>
    %319 = vector.multi_reduction <add>, %318, %cst_102 [1] : vector<6x8xf32> to vector<6xf32>
    %320 = vector.shape_cast %319 : vector<6xf32> to vector<6x1xf32>
    %321 = tpu.reciprocal %320 {approx = true} : vector<6x1xf32> -> vector<6x1xf32>
    %322 = vector.broadcast %321 : vector<6x1xf32> to vector<6x8xf32>
    %323 = arith.mulf %318, %322 : vector<6x8xf32>
    %324 = arith.truncf %323 : vector<6x8xf32> to vector<6x8xbf16>
    %325 = vector.extract_strided_slice %270 {offsets = [0, 64], sizes = [8, 32], strides = [1, 1]} : vector<8x128xbf16> to vector<8x32xbf16>
    %cst_103 = arith.constant dense<0.000000e+00> : vector<6x32xf32>
    %326 = tpu.matmul %324, %325, %cst_103 {dimension_numbers = #tpu.dot_dimension_numbers<[1], [0], [0], [1], [0, 0, 1, 1], [], []>} : vector<6x8xbf16>, vector<8x32xbf16>, vector<6x32xf32> -> vector<6x32xf32>
    %c0_104 = arith.constant 0 : index
    %c64_105 = arith.constant 64 : index
    %327 = vector.load %arg12[%c0_104, %c64_105] : memref<12x128xf32, #tpu.memory_space<vmem>>, vector<6x32xf32>
    tpu.vector_store %arg12[%c0_104, %c64_105], %326 {strides = array<i32>} : memref<12x128xf32, #tpu.memory_space<vmem>>, vector<6x32xf32>,
    %328 = vector.extract_strided_slice %265 {offsets = [0, 96], sizes = [6, 32], strides = [1, 1]} : vector<6x128xbf16> to vector<6x32xbf16>
    %329 = vector.extract_strided_slice %268 {offsets = [96, 0], sizes = [32, 8], strides = [1, 1]} : vector<128x8xbf16> to vector<32x8xbf16>
    %cst_106 = arith.constant dense<0.000000e+00> : vector<6x8xf32>
    %330 = tpu.matmul %328, %329, %cst_106 {dimension_numbers = #tpu.dot_dimension_numbers<[1], [0], [0], [1], [0, 0, 1, 1], [], []>} : vector<6x32xbf16>, vector<32x8xbf16>, vector<6x8xf32> -> vector<6x8xf32>
    %cst_107 = arith.constant 0.176776692 : f32
    %331 = vector.broadcast %cst_107 : f32 to vector<6x8xf32>
    %332 = arith.mulf %330, %331 : vector<6x8xf32>
    %cst_108 = arith.constant dense<0xFF800000> : vector<6xf32>
    %333 = vector.multi_reduction <maximumf>, %332, %cst_108 [1] : vector<6x8xf32> to vector<6xf32>
    %334 = vector.shape_cast %333 : vector<6xf32> to vector<6x1xf32>
    %335 = vector.broadcast %334 : vector<6x1xf32> to vector<6x8xf32>
    %336 = arith.subf %332, %335 : vector<6x8xf32>
    %337 = math.exp %336 : vector<6x8xf32>
    %cst_109 = arith.constant dense<0.000000e+00> : vector<6xf32>
    %338 = vector.multi_reduction <add>, %337, %cst_109 [1] : vector<6x8xf32> to vector<6xf32>
    %339 = vector.shape_cast %338 : vector<6xf32> to vector<6x1xf32>
    %340 = tpu.reciprocal %339 {approx = true} : vector<6x1xf32> -> vector<6x1xf32>
    %341 = vector.broadcast %340 : vector<6x1xf32> to vector<6x8xf32>
    %342 = arith.mulf %337, %341 : vector<6x8xf32>
    %343 = arith.truncf %342 : vector<6x8xf32> to vector<6x8xbf16>
    %344 = vector.extract_strided_slice %270 {offsets = [0, 96], sizes = [8, 32], strides = [1, 1]} : vector<8x128xbf16> to vector<8x32xbf16>
    %cst_110 = arith.constant dense<0.000000e+00> : vector<6x32xf32>
    %345 = tpu.matmul %343, %344, %cst_110 {dimension_numbers = #tpu.dot_dimension_numbers<[1], [0], [0], [1], [0, 0, 1, 1], [], []>} : vector<6x8xbf16>, vector<8x32xbf16>, vector<6x32xf32> -> vector<6x32xf32>
    %c0_111 = arith.constant 0 : index
    %c96_112 = arith.constant 96 : index
    %346 = vector.load %arg12[%c0_111, %c96_112] : memref<12x128xf32, #tpu.memory_space<vmem>>, vector<6x32xf32>
    tpu.vector_store %arg12[%c0_111, %c96_112], %345 {strides = array<i32>} : memref<12x128xf32, #tpu.memory_space<vmem>>, vector<6x32xf32>,
    %347 = vector.extract_strided_slice %256 {offsets = [6, 0], sizes = [6, 128], strides = [1, 1]} : vector<12x128xf32> to vector<6x128xf32>
    %348 = arith.truncf %347 : vector<6x128xf32> to vector<6x128xbf16>
    %349 = vector.extract_strided_slice %262 {offsets = [8, 0], sizes = [8, 128], strides = [1, 1]} : vector<16x128xf32> to vector<8x128xf32>
    %350 = tpu.transpose %349, [1, 0] : vector<8x128xf32> -> vector<128x8xf32>
    %351 = arith.truncf %350 : vector<128x8xf32> to vector<128x8xbf16>
    %352 = vector.extract_strided_slice %263 {offsets = [8, 0], sizes = [8, 128], strides = [1, 1]} : vector<16x128xf32> to vector<8x128xf32>
    %353 = arith.truncf %352 : vector<8x128xf32> to vector<8x128xbf16>
    %354 = vector.extract_strided_slice %348 {offsets = [0, 0], sizes = [6, 32], strides = [1, 1]} : vector<6x128xbf16> to vector<6x32xbf16>
    %355 = vector.extract_strided_slice %351 {offsets = [0, 0], sizes = [32, 8], strides = [1, 1]} : vector<128x8xbf16> to vector<32x8xbf16>
    %cst_113 = arith.constant dense<0.000000e+00> : vector<6x8xf32>
    %356 = tpu.matmul %354, %355, %cst_113 {dimension_numbers = #tpu.dot_dimension_numbers<[1], [0], [0], [1], [0, 0, 1, 1], [], []>} : vector<6x32xbf16>, vector<32x8xbf16>, vector<6x8xf32> -> vector<6x8xf32>
    %cst_114 = arith.constant 0.176776692 : f32
    %357 = vector.broadcast %cst_114 : f32 to vector<6x8xf32>
    %358 = arith.mulf %356, %357 : vector<6x8xf32>
    %cst_115 = arith.constant dense<0xFF800000> : vector<6xf32>
    %359 = vector.multi_reduction <maximumf>, %358, %cst_115 [1] : vector<6x8xf32> to vector<6xf32>
    %360 = vector.shape_cast %359 : vector<6xf32> to vector<6x1xf32>
    %361 = vector.broadcast %360 : vector<6x1xf32> to vector<6x8xf32>
    %362 = arith.subf %358, %361 : vector<6x8xf32>
    %363 = math.exp %362 : vector<6x8xf32>
    %cst_116 = arith.constant dense<0.000000e+00> : vector<6xf32>
    %364 = vector.multi_reduction <add>, %363, %cst_116 [1] : vector<6x8xf32> to vector<6xf32>
    %365 = vector.shape_cast %364 : vector<6xf32> to vector<6x1xf32>
    %366 = tpu.reciprocal %365 {approx = true} : vector<6x1xf32> -> vector<6x1xf32>
    %367 = vector.broadcast %366 : vector<6x1xf32> to vector<6x8xf32>
    %368 = arith.mulf %363, %367 : vector<6x8xf32>
    %369 = arith.truncf %368 : vector<6x8xf32> to vector<6x8xbf16>
    %370 = vector.extract_strided_slice %353 {offsets = [0, 0], sizes = [8, 32], strides = [1, 1]} : vector<8x128xbf16> to vector<8x32xbf16>
    %cst_117 = arith.constant dense<0.000000e+00> : vector<6x32xf32>
    %371 = tpu.matmul %369, %370, %cst_117 {dimension_numbers = #tpu.dot_dimension_numbers<[1], [0], [0], [1], [0, 0, 1, 1], [], []>} : vector<6x8xbf16>, vector<8x32xbf16>, vector<6x32xf32> -> vector<6x32xf32>
    %c6_118 = arith.constant 6 : index
    %c0_119 = arith.constant 0 : index
    %372 = vector.load %arg12[%c6_118, %c0_119] : memref<12x128xf32, #tpu.memory_space<vmem>>, vector<6x32xf32>
    tpu.vector_store %arg12[%c6_118, %c0_119], %371 {strides = array<i32>} : memref<12x128xf32, #tpu.memory_space<vmem>>, vector<6x32xf32>,
    %373 = vector.extract_strided_slice %348 {offsets = [0, 32], sizes = [6, 32], strides = [1, 1]} : vector<6x128xbf16> to vector<6x32xbf16>
    %374 = vector.extract_strided_slice %351 {offsets = [32, 0], sizes = [32, 8], strides = [1, 1]} : vector<128x8xbf16> to vector<32x8xbf16>
    %cst_120 = arith.constant dense<0.000000e+00> : vector<6x8xf32>
    %375 = tpu.matmul %373, %374, %cst_120 {dimension_numbers = #tpu.dot_dimension_numbers<[1], [0], [0], [1], [0, 0, 1, 1], [], []>} : vector<6x32xbf16>, vector<32x8xbf16>, vector<6x8xf32> -> vector<6x8xf32>
    %cst_121 = arith.constant 0.176776692 : f32
    %376 = vector.broadcast %cst_121 : f32 to vector<6x8xf32>
    %377 = arith.mulf %375, %376 : vector<6x8xf32>
    %cst_122 = arith.constant dense<0xFF800000> : vector<6xf32>
    %378 = vector.multi_reduction <maximumf>, %377, %cst_122 [1] : vector<6x8xf32> to vector<6xf32>
    %379 = vector.shape_cast %378 : vector<6xf32> to vector<6x1xf32>
    %380 = vector.broadcast %379 : vector<6x1xf32> to vector<6x8xf32>
    %381 = arith.subf %377, %380 : vector<6x8xf32>
    %382 = math.exp %381 : vector<6x8xf32>
    %cst_123 = arith.constant dense<0.000000e+00> : vector<6xf32>
    %383 = vector.multi_reduction <add>, %382, %cst_123 [1] : vector<6x8xf32> to vector<6xf32>
    %384 = vector.shape_cast %383 : vector<6xf32> to vector<6x1xf32>
    %385 = tpu.reciprocal %384 {approx = true} : vector<6x1xf32> -> vector<6x1xf32>
    %386 = vector.broadcast %385 : vector<6x1xf32> to vector<6x8xf32>
    %387 = arith.mulf %382, %386 : vector<6x8xf32>
    %388 = arith.truncf %387 : vector<6x8xf32> to vector<6x8xbf16>
    %389 = vector.extract_strided_slice %353 {offsets = [0, 32], sizes = [8, 32], strides = [1, 1]} : vector<8x128xbf16> to vector<8x32xbf16>
    %cst_124 = arith.constant dense<0.000000e+00> : vector<6x32xf32>
    %390 = tpu.matmul %388, %389, %cst_124 {dimension_numbers = #tpu.dot_dimension_numbers<[1], [0], [0], [1], [0, 0, 1, 1], [], []>} : vector<6x8xbf16>, vector<8x32xbf16>, vector<6x32xf32> -> vector<6x32xf32>
    %c6_125 = arith.constant 6 : index
    %c32_126 = arith.constant 32 : index
    %391 = vector.load %arg12[%c6_125, %c32_126] : memref<12x128xf32, #tpu.memory_space<vmem>>, vector<6x32xf32>
    tpu.vector_store %arg12[%c6_125, %c32_126], %390 {strides = array<i32>} : memref<12x128xf32, #tpu.memory_space<vmem>>, vector<6x32xf32>,
    %392 = vector.extract_strided_slice %348 {offsets = [0, 64], sizes = [6, 32], strides = [1, 1]} : vector<6x128xbf16> to vector<6x32xbf16>
    %393 = vector.extract_strided_slice %351 {offsets = [64, 0], sizes = [32, 8], strides = [1, 1]} : vector<128x8xbf16> to vector<32x8xbf16>
    %cst_127 = arith.constant dense<0.000000e+00> : vector<6x8xf32>
    %394 = tpu.matmul %392, %393, %cst_127 {dimension_numbers = #tpu.dot_dimension_numbers<[1], [0], [0], [1], [0, 0, 1, 1], [], []>} : vector<6x32xbf16>, vector<32x8xbf16>, vector<6x8xf32> -> vector<6x8xf32>
    %cst_128 = arith.constant 0.176776692 : f32
    %395 = vector.broadcast %cst_128 : f32 to vector<6x8xf32>
    %396 = arith.mulf %394, %395 : vector<6x8xf32>
    %cst_129 = arith.constant dense<0xFF800000> : vector<6xf32>
    %397 = vector.multi_reduction <maximumf>, %396, %cst_129 [1] : vector<6x8xf32> to vector<6xf32>
    %398 = vector.shape_cast %397 : vector<6xf32> to vector<6x1xf32>
    %399 = vector.broadcast %398 : vector<6x1xf32> to vector<6x8xf32>
    %400 = arith.subf %396, %399 : vector<6x8xf32>
    %401 = math.exp %400 : vector<6x8xf32>
    %cst_130 = arith.constant dense<0.000000e+00> : vector<6xf32>
    %402 = vector.multi_reduction <add>, %401, %cst_130 [1] : vector<6x8xf32> to vector<6xf32>
    %403 = vector.shape_cast %402 : vector<6xf32> to vector<6x1xf32>
    %404 = tpu.reciprocal %403 {approx = true} : vector<6x1xf32> -> vector<6x1xf32>
    %405 = vector.broadcast %404 : vector<6x1xf32> to vector<6x8xf32>
    %406 = arith.mulf %401, %405 : vector<6x8xf32>
    %407 = arith.truncf %406 : vector<6x8xf32> to vector<6x8xbf16>
    %408 = vector.extract_strided_slice %353 {offsets = [0, 64], sizes = [8, 32], strides = [1, 1]} : vector<8x128xbf16> to vector<8x32xbf16>
    %cst_131 = arith.constant dense<0.000000e+00> : vector<6x32xf32>
    %409 = tpu.matmul %407, %408, %cst_131 {dimension_numbers = #tpu.dot_dimension_numbers<[1], [0], [0], [1], [0, 0, 1, 1], [], []>} : vector<6x8xbf16>, vector<8x32xbf16>, vector<6x32xf32> -> vector<6x32xf32>
    %c6_132 = arith.constant 6 : index
    %c64_133 = arith.constant 64 : index
    %410 = vector.load %arg12[%c6_132, %c64_133] : memref<12x128xf32, #tpu.memory_space<vmem>>, vector<6x32xf32>
    tpu.vector_store %arg12[%c6_132, %c64_133], %409 {strides = array<i32>} : memref<12x128xf32, #tpu.memory_space<vmem>>, vector<6x32xf32>,
    %411 = vector.extract_strided_slice %348 {offsets = [0, 96], sizes = [6, 32], strides = [1, 1]} : vector<6x128xbf16> to vector<6x32xbf16>
    %412 = vector.extract_strided_slice %351 {offsets = [96, 0], sizes = [32, 8], strides = [1, 1]} : vector<128x8xbf16> to vector<32x8xbf16>
    %cst_134 = arith.constant dense<0.000000e+00> : vector<6x8xf32>
    %413 = tpu.matmul %411, %412, %cst_134 {dimension_numbers = #tpu.dot_dimension_numbers<[1], [0], [0], [1], [0, 0, 1, 1], [], []>} : vector<6x32xbf16>, vector<32x8xbf16>, vector<6x8xf32> -> vector<6x8xf32>
    %cst_135 = arith.constant 0.176776692 : f32
    %414 = vector.broadcast %cst_135 : f32 to vector<6x8xf32>
    %415 = arith.mulf %413, %414 : vector<6x8xf32>
    %cst_136 = arith.constant dense<0xFF800000> : vector<6xf32>
    %416 = vector.multi_reduction <maximumf>, %415, %cst_136 [1] : vector<6x8xf32> to vector<6xf32>
    %417 = vector.shape_cast %416 : vector<6xf32> to vector<6x1xf32>
    %418 = vector.broadcast %417 : vector<6x1xf32> to vector<6x8xf32>
    %419 = arith.subf %415, %418 : vector<6x8xf32>
    %420 = math.exp %419 : vector<6x8xf32>
    %cst_137 = arith.constant dense<0.000000e+00> : vector<6xf32>
    %421 = vector.multi_reduction <add>, %420, %cst_137 [1] : vector<6x8xf32> to vector<6xf32>
    %422 = vector.shape_cast %421 : vector<6xf32> to vector<6x1xf32>
    %423 = tpu.reciprocal %422 {approx = true} : vector<6x1xf32> -> vector<6x1xf32>
    %424 = vector.broadcast %423 : vector<6x1xf32> to vector<6x8xf32>
    %425 = arith.mulf %420, %424 : vector<6x8xf32>
    %426 = arith.truncf %425 : vector<6x8xf32> to vector<6x8xbf16>
    %427 = vector.extract_strided_slice %353 {offsets = [0, 96], sizes = [8, 32], strides = [1, 1]} : vector<8x128xbf16> to vector<8x32xbf16>
    %cst_138 = arith.constant dense<0.000000e+00> : vector<6x32xf32>
    %428 = tpu.matmul %426, %427, %cst_138 {dimension_numbers = #tpu.dot_dimension_numbers<[1], [0], [0], [1], [0, 0, 1, 1], [], []>} : vector<6x8xbf16>, vector<8x32xbf16>, vector<6x32xf32> -> vector<6x32xf32>
    %c6_139 = arith.constant 6 : index
    %c96_140 = arith.constant 96 : index
    %429 = vector.load %arg12[%c6_139, %c96_140] : memref<12x128xf32, #tpu.memory_space<vmem>>, vector<6x32xf32>
    tpu.vector_store %arg12[%c6_139, %c96_140], %428 {strides = array<i32>} : memref<12x128xf32, #tpu.memory_space<vmem>>, vector<6x32xf32>,
    %c0_141 = arith.constant 0 : index
    %c0_142 = arith.constant 0 : index
    %430 = vector.load %arg12[%c0_141, %c0_142] : memref<12x128xf32, #tpu.memory_space<vmem>>, vector<12x128xf32>
    %431 = vector.extract_strided_slice %9 {offsets = [0, 384], sizes = [128, 128], strides = [1, 1]} : vector<128x512xbf16> to vector<128x128xbf16>
    %432 = arith.truncf %430 : vector<12x128xf32> to vector<12x128xbf16>
    %cst_143 = arith.constant dense<0.000000e+00> : vector<12x128xf32>
    %433 = tpu.matmul %432, %431, %cst_143 {dimension_numbers = #tpu.dot_dimension_numbers<[1], [0], [0], [1], [0, 0, 1, 1], [], []>} : vector<12x128xbf16>, vector<128x128xbf16>, vector<12x128xf32> -> vector<12x128xf32>
    %434 = vector.broadcast %19 : vector<1x128xf32> to vector<12x128xf32>
    %435 = arith.addf %433, %434 : vector<12x128xf32>
    %436 = arith.addf %250, %435 : vector<12x128xf32>
    %cst_144 = arith.constant dense<0.000000e+00> : vector<12xf32>
    %437 = vector.multi_reduction <add>, %436, %cst_144 [1] : vector<12x128xf32> to vector<12xf32>
    %438 = vector.shape_cast %437 : vector<12xf32> to vector<12x1xf32>
    %cst_145 = arith.constant 1.280000e+02 : f32
    %439 = vector.broadcast %cst_145 : f32 to vector<12x1xf32>
    %440 = arith.divf %438, %439 : vector<12x1xf32>
    %441 = vector.broadcast %440 : vector<12x1xf32> to vector<12x128xf32>
    %442 = arith.subf %436, %441 : vector<12x128xf32>
    %443 = arith.mulf %442, %442 : vector<12x128xf32>
    %cst_146 = arith.constant dense<0.000000e+00> : vector<12xf32>
    %444 = vector.multi_reduction <add>, %443, %cst_146 [1] : vector<12x128xf32> to vector<12xf32>
    %445 = vector.shape_cast %444 : vector<12xf32> to vector<12x1xf32>
    %cst_147 = arith.constant 1.280000e+02 : f32
    %446 = vector.broadcast %cst_147 : f32 to vector<12x1xf32>
    %447 = arith.divf %445, %446 : vector<12x1xf32>
    %448 = vector.broadcast %440 : vector<12x1xf32> to vector<12x128xf32>
    %449 = arith.subf %436, %448 : vector<12x128xf32>
    %cst_148 = arith.constant 9.99999974E-6 : f32
    %450 = vector.broadcast %cst_148 : f32 to vector<12x1xf32>
    %451 = arith.addf %447, %450 : vector<12x1xf32>
    %452 = math.rsqrt %451 : vector<12x1xf32>
    %453 = vector.broadcast %452 : vector<12x1xf32> to vector<12x128xf32>
    %454 = arith.mulf %449, %453 : vector<12x128xf32>
    %455 = vector.broadcast %24 : vector<1x128xf32> to vector<12x128xf32>
    %456 = arith.mulf %454, %455 : vector<12x128xf32>
    %457 = vector.broadcast %25 : vector<1x128xf32> to vector<12x128xf32>
    %458 = arith.addf %456, %457 : vector<12x128xf32>
    %459 = arith.truncf %458 : vector<12x128xf32> to vector<12x128xbf16>
    %cst_149 = arith.constant dense<0.000000e+00> : vector<12x256xf32>
    %460 = tpu.matmul %459, %11, %cst_149 {dimension_numbers = #tpu.dot_dimension_numbers<[1], [0], [0], [1], [0, 0, 1, 1], [], []>} : vector<12x128xbf16>, vector<128x256xbf16>, vector<12x256xf32> -> vector<12x256xf32>
    %461 = vector.broadcast %20 : vector<1x256xf32> to vector<12x256xf32>
    %462 = arith.addf %460, %461 : vector<12x256xf32>
    %cst_150 = arith.constant 0.000000e+00 : f32
    %463 = vector.broadcast %cst_150 : f32 to vector<12x256xf32>
    %464 = arith.maximumf %462, %463 : vector<12x256xf32>
    %465 = arith.truncf %464 : vector<12x256xf32> to vector<12x256xbf16>
    %cst_151 = arith.constant dense<0.000000e+00> : vector<12x128xf32>
    %466 = tpu.matmul %465, %13, %cst_151 {dimension_numbers = #tpu.dot_dimension_numbers<[1], [0], [0], [1], [0, 0, 1, 1], [], []>} : vector<12x256xbf16>, vector<256x128xbf16>, vector<12x128xf32> -> vector<12x128xf32>
    %467 = vector.broadcast %21 : vector<1x128xf32> to vector<12x128xf32>
    %468 = arith.addf %466, %467 : vector<12x128xf32>
    %469 = arith.addf %458, %468 : vector<12x128xf32>
    %cst_152 = arith.constant dense<0.000000e+00> : vector<12xf32>
    %470 = vector.multi_reduction <add>, %469, %cst_152 [1] : vector<12x128xf32> to vector<12xf32>
    %471 = vector.shape_cast %470 : vector<12xf32> to vector<12x1xf32>
    %cst_153 = arith.constant 1.280000e+02 : f32
    %472 = vector.broadcast %cst_153 : f32 to vector<12x1xf32>
    %473 = arith.divf %471, %472 : vector<12x1xf32>
    %474 = vector.broadcast %473 : vector<12x1xf32> to vector<12x128xf32>
    %475 = arith.subf %469, %474 : vector<12x128xf32>
    %476 = arith.mulf %475, %475 : vector<12x128xf32>
    %cst_154 = arith.constant dense<0.000000e+00> : vector<12xf32>
    %477 = vector.multi_reduction <add>, %476, %cst_154 [1] : vector<12x128xf32> to vector<12xf32>
    %478 = vector.shape_cast %477 : vector<12xf32> to vector<12x1xf32>
    %cst_155 = arith.constant 1.280000e+02 : f32
    %479 = vector.broadcast %cst_155 : f32 to vector<12x1xf32>
    %480 = arith.divf %478, %479 : vector<12x1xf32>
    %481 = vector.broadcast %473 : vector<12x1xf32> to vector<12x128xf32>
    %482 = arith.subf %469, %481 : vector<12x128xf32>
    %cst_156 = arith.constant 9.99999974E-6 : f32
    %483 = vector.broadcast %cst_156 : f32 to vector<12x1xf32>
    %484 = arith.addf %480, %483 : vector<12x1xf32>
    %485 = math.rsqrt %484 : vector<12x1xf32>
    %486 = vector.broadcast %485 : vector<12x1xf32> to vector<12x128xf32>
    %487 = arith.mulf %482, %486 : vector<12x128xf32>
    %488 = vector.broadcast %26 : vector<1x128xf32> to vector<12x128xf32>
    %489 = arith.mulf %487, %488 : vector<12x128xf32>
    %490 = vector.broadcast %27 : vector<1x128xf32> to vector<12x128xf32>
    %491 = arith.addf %489, %490 : vector<12x128xf32>
    %c0_157 = arith.constant 0 : index
    %c0_158 = arith.constant 0 : index
    %492 = vector.load %arg11[%c0_157, %c0_158] : memref<12x128xf32, #tpu.memory_space<vmem>>, vector<12x128xf32>
    tpu.vector_store %arg11[%c0_157, %c0_158], %491 {strides = array<i32>} : memref<12x128xf32, #tpu.memory_space<vmem>>, vector<12x128xf32>,
    %c1_i32 = arith.constant 1 : i32
    %493 = arith.cmpi eq, %arg0, %c1_i32 : i32
    %494 = arith.extui %493 : i1 to i32
    %c0_i32_159 = arith.constant 0 : i32
    %495 = arith.cmpi ne, %494, %c0_i32_159 : i32
    scf.if %495 {
      %c0_160 = arith.constant 0 : index
      %c0_161 = arith.constant 0 : index
      %496 = vector.load %arg11[%c0_160, %c0_161] : memref<12x128xf32, #tpu.memory_space<vmem>>, vector<12x128xf32>
      %c0_162 = arith.constant 0 : index
      %c0_163 = arith.constant 0 : index
      %497 = vector.load %arg9[%c0_162, %c0_163] : memref<2x128xf32, #tpu.memory_space<vmem>>, vector<1x128xf32>
      %c1 = arith.constant 1 : index
      %c0_164 = arith.constant 0 : index
      %498 = vector.load %arg9[%c1, %c0_164] : memref<2x128xf32, #tpu.memory_space<vmem>>, vector<1x128xf32>
      %cst_165 = arith.constant dense<0.000000e+00> : vector<12xf32>
      %499 = vector.multi_reduction <add>, %496, %cst_165 [1] : vector<12x128xf32> to vector<12xf32>
      %500 = vector.shape_cast %499 : vector<12xf32> to vector<12x1xf32>
      %cst_166 = arith.constant 1.280000e+02 : f32
      %501 = vector.broadcast %cst_166 : f32 to vector<12x1xf32>
      %502 = arith.divf %500, %501 : vector<12x1xf32>
      %503 = vector.broadcast %502 : vector<12x1xf32> to vector<12x128xf32>
      %504 = arith.subf %496, %503 : vector<12x128xf32>
      %505 = arith.mulf %504, %504 : vector<12x128xf32>
      %cst_167 = arith.constant dense<0.000000e+00> : vector<12xf32>
      %506 = vector.multi_reduction <add>, %505, %cst_167 [1] : vector<12x128xf32> to vector<12xf32>
      %507 = vector.shape_cast %506 : vector<12xf32> to vector<12x1xf32>
      %cst_168 = arith.constant 1.280000e+02 : f32
      %508 = vector.broadcast %cst_168 : f32 to vector<12x1xf32>
      %509 = arith.divf %507, %508 : vector<12x1xf32>
      %510 = vector.broadcast %502 : vector<12x1xf32> to vector<12x128xf32>
      %511 = arith.subf %496, %510 : vector<12x128xf32>
      %cst_169 = arith.constant 9.99999974E-6 : f32
      %512 = vector.broadcast %cst_169 : f32 to vector<12x1xf32>
      %513 = arith.addf %509, %512 : vector<12x1xf32>
      %514 = math.rsqrt %513 : vector<12x1xf32>
      %515 = vector.broadcast %514 : vector<12x1xf32> to vector<12x128xf32>
      %516 = arith.mulf %511, %515 : vector<12x128xf32>
      %517 = vector.broadcast %497 : vector<1x128xf32> to vector<12x128xf32>
      %518 = arith.mulf %516, %517 : vector<12x128xf32>
      %519 = vector.broadcast %498 : vector<1x128xf32> to vector<12x128xf32>
      %520 = arith.addf %518, %519 : vector<12x128xf32>
      %c0_170 = arith.constant 0 : index
      %c0_171 = arith.constant 0 : index
      %521 = vector.load %arg10[%c0_170, %c0_171] : memref<12x128xf32, #tpu.memory_space<vmem>>, vector<12x128xf32>
      tpu.vector_store %arg10[%c0_170, %c0_171], %520 {strides = array<i32>} : memref<12x128xf32, #tpu.memory_space<vmem>>, vector<12x128xf32>,
    } else {
    }
    return
  }
  func.func @transform_0(%arg0: i32) -> (i32, i32) {
    %c0_i32 = arith.constant 0 : i32
    %c0_i32_0 = arith.constant 0 : i32
    %c0_i32_1 = arith.constant 0 : i32
    return %c0_i32, %c0_i32_0 : i32, i32
  }
  func.func @transform_1(%arg0: i32) -> (i32, i32) {
    %c0_i32 = arith.constant 0 : i32
    %c0_i32_0 = arith.constant 0 : i32
    %c0_i32_1 = arith.constant 0 : i32
    return %c0_i32, %c0_i32_0 : i32, i32
  }
  func.func @transform_2(%arg0: i32) -> (i32, i32) {
    %c0_i32 = arith.constant 0 : i32
    %c0_i32_0 = arith.constant 0 : i32
    %c0_i32_1 = arith.constant 0 : i32
    return %c0_i32, %c0_i32_0 : i32, i32
  }
  func.func @transform_3(%arg0: i32) -> (i32, i32, i32) {
    %c0_i32 = arith.constant 0 : i32
    %c0_i32_0 = arith.constant 0 : i32
    %c0_i32_1 = arith.constant 0 : i32
    return %arg0, %c0_i32, %c0_i32_0 : i32, i32, i32
  }
  func.func @transform_4(%arg0: i32) -> (i32, i32, i32) {
    %c0_i32 = arith.constant 0 : i32
    %c0_i32_0 = arith.constant 0 : i32
    %c0_i32_1 = arith.constant 0 : i32
    return %arg0, %c0_i32, %c0_i32_0 : i32, i32, i32
  }
  func.func @transform_5(%arg0: i32) -> (i32, i32, i32) {
    %c0_i32 = arith.constant 0 : i32
    %c0_i32_0 = arith.constant 0 : i32
    %c0_i32_1 = arith.constant 0 : i32
    return %arg0, %c0_i32, %c0_i32_0 : i32, i32, i32
  }
  func.func @transform_6(%arg0: i32) -> (i32, i32, i32) {
    %c0_i32 = arith.constant 0 : i32
    %c0_i32_0 = arith.constant 0 : i32
    %c0_i32_1 = arith.constant 0 : i32
    return %arg0, %c0_i32, %c0_i32_0 : i32, i32, i32
  }
  func.func @transform_7(%arg0: i32) -> (i32, i32, i32) {
    %c0_i32 = arith.constant 0 : i32
    %c0_i32_0 = arith.constant 0 : i32
    %c0_i32_1 = arith.constant 0 : i32
    return %arg0, %c0_i32, %c0_i32_0 : i32, i32, i32
  }
  func.func @transform_8(%arg0: i32) -> (i32, i32) {
    %c0_i32 = arith.constant 0 : i32
    %c0_i32_0 = arith.constant 0 : i32
    %c0_i32_1 = arith.constant 0 : i32
    return %c0_i32, %c0_i32_0 : i32, i32
  }
  func.func @transform_9(%arg0: i32) -> (i32, i32) {
    %c0_i32 = arith.constant 0 : i32
    %c0_i32_0 = arith.constant 0 : i32
    %c0_i32_1 = arith.constant 0 : i32
    return %c0_i32, %c0_i32_0 : i32, i32
  }
}

</mosaic_0001>

<bundles_post_ra>
// kernel: _lambda_.3
= control target key start
LH: loop header
LB: loop body
LE: loop exit
PB: predicated region body
PF: predicated region fallthrough
CT: control target
= control target key end

     0   :  { %v124_v0 = vmov 0.0   ;;  %vm44_vm0 = vcmask 1041408   ;;  %vm125_vm1 = vmmov 0   ;;  %vm40_vm2 = vcmask 162816   ;;  %s172_s1 = inlined_call_operand.vmem [shape: bf16[20,128], index: 1, kind: input, shape index: {}]   ;;  %s173_s0 = inlined_call_operand.vmem [shape: f32[16,20], index: 0, kind: input, shape index: {}]   ;;  %s174_s2 = inlined_call_operand.vmem [shape: f32[1,128], index: 2, kind: input, shape index: {}]   ;;  %s175_s3 = inlined_call_operand.vmem [shape: f32[8,128], index: 3, kind: input, shape index: {}]   ;;  %s176_s4 = inlined_call_operand.vmem [shape: bf16[16,128], index: 4, kind: output, shape index: {}]  }
   0x1   :  { %112 = vmatprep.subr.bf16.mxu0 %v124_v0  ;;  %v122_v1 = vld [vmem:[%s172_s1] sm:$0xff]   ;;  %116 = vmatprep.mubr.msk.bf16.mxu0 %vm125_vm1, %v124_v0  ;;  %v123_v2 = vld [vmem:[%s172_s1 + $0x8] ss:$0 sps:$4 sm:$0x33]  }
   0x2   :  { %113 = vmatpush3.bf16.msra.mxu0 %v122_v1  ;;  %v18_v3 = vld [vmem:[%s173_s0] sm:$0xff]  ;;  %v19_v4 = vld [vmem:[%s173_s0 + $0x8] sm:$0xff]  ;;  %v46_v5 = vsel %vm44_vm0, %v123_v2, 0 }
   0x3   :  { %114 = vmatprep.subr.bf16.mxu0 %v124_v0  ;;  %v24_v6 = vpack.c.bf16 %v19_v4, %v18_v3  ;;  %v100_v7 = vld [vmem:[%s174_s2] ss:$0 sm:$0xff] }
   0x4   :  { %v89_v11 = vld [vmem:[%s175_s3] sm:$0xff] }
   0x6   :  { %115 = vmatpush3.bf16.msra.mxu0 %v46_v5 }
   0x9   :  { %117 = vmatmul.mubr.msk.bf16.vlgmr.msra.gmra.mrb[0].mxu0 %vm40_vm2, %v24_v6 }
  0xdc   :  { %v82_v8 = vpop.f32.mrb[0].mxu0 }
  0xdd   :  { %v83_v9 = vadd.f32 %v100_v7, %v82_v8  ;;  %v118_v10 = vpop.f32.mrb[1].mxu0 }
  0xde   :  { %v85_v12 = vpop.f32.mrb[2].mxu0 }
  0xdf   :  { %v86_v13 = vadd.f32 %v100_v7, %v85_v12  ;;  %v119_v14 = vpop.f32.mrb[3].mxu0  ;;  %v90_v15 = vadd.f32 %v89_v11, %v83_v9 }
  0xe1   :  { %v93_v16 = vadd.f32 %v89_v11, %v86_v13 }
  0xe3   :  { %v107_v17 = vpack.c.bf16 %v93_v16, %v90_v15 }
  0xe5   :  { %108 = vst [vmem:[%s176_s4] sm:$0xff] %v107_v17  }

// kernel: _lambda_.4
= control target key start
LH: loop header
LB: loop body
LE: loop exit
PB: predicated region body
PF: predicated region fallthrough
CT: control target
= control target key end

     0   :  { %s2660_s21 = smov 0   ;;  %s3035_s0 = inlined_call_operand.vmem [shape: bf16[16,128], index: 0, kind: input, shape index: {}]   ;;  %s3036_s1 = inlined_call_operand.vmem [shape: bf16[2,128,512], index: 1, kind: input, shape index: {}]   ;;  %s3037_s2 = inlined_call_operand.vmem [shape: bf16[2,128,256], index: 2, kind: input, shape index: {}]   ;;  %s3038_s3 = inlined_call_operand.vmem [shape: bf16[2,256,128], index: 3, kind: input, shape index: {}]   ;;  %s3039_s4 = inlined_call_operand.vmem [shape: f32[2,8,384], index: 4, kind: input, shape index: {}]   ;;  %s3040_s5 = inlined_call_operand.vmem [shape: f32[2,128], index: 5, kind: input, shape index: {}]   ;;  %s3041_s6 = inlined_call_operand.vmem [shape: f32[16,128], index: 6, kind: output, shape index: {}]  }
   0x1 LB: > { %s2666_s22 = sadd.s32 4294967295, %s2617_s21   ;;  %p2129_p0 = scmp.ge.s32.totalorder %s2617_s21, 1  ;;  %s2617_s21 = sphi %s2660_s21, %s16_s21  }
   0x2   : > { %p237_p1 = scmp.lt.s32.totalorder %s2617_s21, 3 }
   0x4   : > { %p238_p2 = pnand %p2129_p0, %p237_p1 }
   0x5   : > { %p277_p3 = scmp.lt.s32.totalorder (!%p238_p2), %s2666_s22, 1  ;;  %p2137_p4 = scmp.ne.s32.totalorder (!%p238_p2), %s2666_s22, 0 }
   0x6   : > { %241 = sbr.rel (%p238_p2) target bundleno = 3535 (0xdcf), region = 44 }
   0xd   : > { %s278_s23 = scalar_select %p277_p3, %s2666_s22, 1 }
   0xe   : > { %301 = sbr.rel (%p2137_p4) target bundleno = 21 (0x15), region = 48  ;;  %v2227_v0 = vld [vmem:[%s3035_s0] sm:$0xff] (!%p2137_p4)  }
   0xf   : > { %s2223_s24 = sshll.u32 %s278_s23, 8  ;;  %s2224_s25 = sshll.u32 %s278_s23, 7  ;;  %v2228_v1 = vunpack.c.l.bf16 (!%p2137_p4), %v2227_v0  ;;  %v2229_v2 = vunpack.c.h.bf16 (!%p2137_p4), %v2227_v0 }
  0x10   : > { %s2675_s28 = scalar_lea.vmem %s3036_s1, %s2223_s24  ;;  %s2680_s7 = scalar_lea.vmem %s3037_s2, %s2224_s25 }
  0x11   : > { %s2685_s10 = scalar_lea.vmem %s3038_s3, %s2224_s25  ;;  %s2462_s11 = smul.u32 24, %s278_s23  ;;  %306 = vst [vmem:[#allocation2] sm:$0xff] (!%p2137_p4), %v2228_v1  ;;  %307 = vst [vmem:[#allocation2 + $0x8] sm:$0xff] (!%p2137_p4), %v2229_v2 }
  0x13   : > { %s2690_s14 = scalar_lea.vmem %s3039_s4, %s2462_s11 }
  0x15 PF: > { %v2477_v3 = vld [vmem:[%s2675_s28 + $0x4] ss:$16 sps:$4 sm:$0xff]   ;;  %v2479_v4 = vld [vmem:[%s2675_s28] ss:$16 sps:$4 sm:$0xff]   ;;  %v2619_v5 = vmov 0   ;;  %v2620_v24 = vmov 0.0   ;;  %v394_v28 = vlaneseq }
  0x16   : > { %566 = vmatprep.mubr.bf16.mxu0 %v2619_v5  ;;  %534 = vmatprep.subr.bf16.mxu0 %v2477_v3  ;;  %v2480_v6 = vld [vmem:[%s2675_s28 + $0x24] ss:$16 sps:$4 sm:$0xff]   ;;  %v2482_v7 = vld [vmem:[%s2675_s28 + $0x20] ss:$16 sps:$4 sm:$0xff]   ;;  %v2501_v23 = vld [vmem:[%s2675_s28 + $0x8] ss:$16 sps:$4 sm:$0xff]  }
  0x17   : > { %535 = vmatpush1.bf16.msra.mxu0 %v2479_v4  ;;  %v2483_v8 = vld [vmem:[%s2675_s28 + $0x44] ss:$16 sps:$4 sm:$0xff]   ;;  %v2485_v9 = vld [vmem:[%s2675_s28 + $0x40] ss:$16 sps:$4 sm:$0xff]   ;;  %2310 = vmatprep.subr.bf16.mxu1 %v2620_v24  ;;  %v2504_v25 = vld [vmem:[%s2675_s28 + $0x28] ss:$16 sps:$4 sm:$0xff]  }
  0x18   : > { %536 = vmatprep.subr.bf16.mxu0 %v2480_v6  ;;  %v2486_v10 = vld [vmem:[%s2675_s28 + $0x64] ss:$16 sps:$4 sm:$0xff]   ;;  %v2488_v11 = vld [vmem:[%s2675_s28 + $0x60] ss:$16 sps:$4 sm:$0xff]   ;;  %v2715_v21 = vld [vmem:[#allocation2 + $0x8] sm:$0xff]  ;;  %2311 = vmatpush3.bf16.msra.mxu1 %v2501_v23  ;;  %v2729_v29 = vshrl.u32 %v394_v28, 7 }
  0x19   : > { %v2489_v12 = vld [vmem:[%s2675_s28 + $0x84] ss:$16 sps:$4 sm:$0xff]   ;;  %v2491_v13 = vld [vmem:[%s2675_s28 + $0x80] ss:$16 sps:$4 sm:$0xff]   ;;  %2312 = vmatprep.subr.bf16.mxu1 %v2620_v24  ;;  %v2507_v26 = vld [vmem:[%s2675_s28 + $0x48] ss:$16 sps:$4 sm:$0xff]  }
  0x1a   : > { %v2492_v14 = vld [vmem:[%s2675_s28 + $0xa4] ss:$16 sps:$4 sm:$0xff]   ;;  %v2494_v15 = vld [vmem:[%s2675_s28 + $0xa0] ss:$16 sps:$4 sm:$0xff]   ;;  %v2510_v27 = vld [vmem:[%s2675_s28 + $0x68] ss:$16 sps:$4 sm:$0xff]  }
  0x1b   : > { %537 = vmatpush1.bf16.msra.mxu0 %v2482_v7  ;;  %v2495_v16 = vld [vmem:[%s2675_s28 + $0xc4] ss:$16 sps:$4 sm:$0xff]   ;;  %v2497_v17 = vld [vmem:[%s2675_s28 + $0xc0] ss:$16 sps:$4 sm:$0xff]   ;;  %v2513_v30 = vld [vmem:[%s2675_s28 + $0x88] ss:$16 sps:$4 sm:$0xff]  }
  0x1c   : > { %538 = vmatprep.subr.bf16.mxu0 %v2483_v8  ;;  %v2498_v18 = vld [vmem:[%s2675_s28 + $0xe4] ss:$16 sps:$4 sm:$0xff]   ;;  %v2500_v19 = vld [vmem:[%s2675_s28 + $0xe0] ss:$16 sps:$4 sm:$0xff]   ;;  %2313 = vmatpush3.bf16.msra.mxu1 %v2504_v25  ;;  %v2733_v31 = vsub.s32 0, %v2729_v29  ;;  %v391_v33 = vld [vmem:[%s2690_s14 + $0x8] sm:$0xff] }
  0x1d   : > { %v2713_v20 = vld [vmem:[#allocation2] sm:$0xff]  ;;  %2314 = vmatprep.subr.bf16.mxu1 %v2620_v24  ;;  %v2516_v34 = vld [vmem:[%s2675_s28 + $0xa8] ss:$16 sps:$4 sm:$0xff]   ;;  %s2621_s17 = smov 96   ;;  %s2622_s18 = smov 64   ;;  %vm2623_vm0 = vmmov 0  }
  0x1e   : > { %v393_v22 = vpack.c.bf16 %v2715_v21, %v2713_v20  ;;  %v2736_v32 = vld [vmem:[%s2690_s14] sm:$0xff]  ;;  %v401_v36 = vrot.slane %v391_v33, %v2733_v31  ;;  %v2519_v37 = vld [vmem:[%s2675_s28 + $0xc8] ss:$16 sps:$4 sm:$0xff]   ;;  %2326 = vmatprep.mubr.msk.bf16.mxu1 %vm2623_vm0, %v2620_v24  ;;  %s2624_s19 = smov 32   ;;  %vm660_vm1 = vcmask 261120   ;;  %vm721_vm2 = vcmask 1043456  }
  0x1f   : > { %539 = vmatpush1.bf16.msra.mxu0 %v2485_v9  ;;  %v397_v35 = vrot.slane %v2736_v32, %v2733_v31  ;;  %v2522_v46 = vld [vmem:[%s2675_s28 + $0xe8] ss:$16 sps:$4 sm:$0xff]   ;;  %vm705_vm3 = vcmask 64512   ;;  %vm878_vm4 = vcmask 523520   ;;  %vm990_vm5 = vcmask 785920   ;;  %p2218_p5 = scmp.ne.s32.totalorder %s2666_s22, 1 }
  0x20   : > { %540 = vmatprep.subr.bf16.mxu0 %v2486_v10  ;;  %2315 = vmatpush3.bf16.msra.mxu1 %v2507_v26  ;;  %vm1102_vm6 = vcmask 1048320  }
  0x21   : > { %2316 = vmatprep.subr.bf16.mxu1 %v2620_v24 }
  0x23   : > { %541 = vmatpush1.bf16.msra.mxu0 %v2488_v11 }
  0x24   : > { %542 = vmatprep.subr.bf16.mxu0 %v2489_v12  ;;  %2317 = vmatpush3.bf16.msra.mxu1 %v2510_v27 }
  0x25   : > { %2318 = vmatprep.subr.bf16.mxu1 %v2620_v24 }
  0x27   : > { %543 = vmatpush1.bf16.msra.mxu0 %v2491_v13  ;;  %v392_v13 = vld [vmem:[%s2690_s14 + $0x10] sm:$0xff] }
  0x28   : > { %544 = vmatprep.subr.bf16.mxu0 %v2492_v14  ;;  %2319 = vmatpush3.bf16.msra.mxu1 %v2513_v30  ;;  %v405_v14 = vrot.slane %v392_v13, %v2733_v31 }
  0x29   : > { %2320 = vmatprep.subr.bf16.mxu1 %v2620_v24 }
  0x2b   : > { %545 = vmatpush1.bf16.msra.mxu0 %v2494_v15 }
  0x2c   : > { %546 = vmatprep.subr.bf16.mxu0 %v2495_v16  ;;  %2321 = vmatpush3.bf16.msra.mxu1 %v2516_v34 }
  0x2d   : > { %2322 = vmatprep.subr.bf16.mxu1 %v2620_v24 }
  0x2f   : > { %547 = vmatpush1.bf16.msra.mxu0 %v2497_v17 }
  0x30   : > { %548 = vmatprep.subr.bf16.mxu0 %v2498_v18  ;;  %2323 = vmatpush3.bf16.msra.mxu1 %v2519_v37 }
  0x31   : > { %2324 = vmatprep.subr.bf16.mxu1 %v2620_v24 }
  0x33   : > { %549 = vmatpush1.bf16.msra.mxu0 %v2500_v19 }
  0x34   : > { %2358 = vmatprep.subr.bf16.mxu0 %v2620_v24  ;;  %2325 = vmatpush3.bf16.msra.mxu1 %v2522_v46 }
  0x35   : > { %2330 = vmatprep.subr.bf16.mxu1 %v2620_v24 }
  0x36   : > { %567 = vmatmul.mubr.bf16.vlgmr.msra.gmra.mrb[0].mxu0 %v393_v22 }
  0x37   : > { %2362 = vmatprep.mubr.msk.bf16.mxu0 %vm2623_vm0, %v2620_v24  ;;  %2327 = vmatmul.mubr.bf16.vlgmr.msra.gmra.mrb[0].mxu1 %v393_v22 }
  0x38   : > { %2334 = vmatprep.mubr.msk.bf16.mxu1 %vm2623_vm0, %v2620_v24 }
 0x109   : > { %v568_v38 = vpop.f32.mrb[0].mxu0 }
 0x10a   : > { %v569_v39 = vadd.f32 %v568_v38, %v397_v35  ;;  %v570_v40 = vpop.f32.mrb[1].mxu0  ;;  %v611_v15 = vpop.f32.mrb[0].mxu1 }
 0x10b   : > { %v572_v41 = vpop.f32.mrb[2].mxu0  ;;  %v571_v42 = vadd.f32 %v570_v40, %v401_v36  ;;  %v612_v16 = vadd.f32 %v611_v15, %v405_v14  ;;  %v2328_v17 = vpop.f32.mrb[1].mxu1 }
 0x10c   : > { %v618_v43 = vpack.c.bf16 %v569_v39, %v569_v39  ;;  %v574_v44 = vpop.f32.mrb[3].mxu0  ;;  %v573_v47 = vadd.f32 %v572_v41, %v397_v35  ;;  %v614_v18 = vpop.f32.mrb[2].mxu1 }
 0x10d   : > { %v2747_v45 = vadd.f32 %v574_v44, %v401_v36  ;;  %619 = vxpose.xlu0.b32.start.end [1/1] (short) %v571_v42, 128  ;;  %v2795_v19 = vpack.c.bf16 %v612_v16, %v612_v16  ;;  %v2797_v22 = vadd.f32 %v614_v18, %v405_v14  ;;  %v2329_v23 = vpop.f32.mrb[3].mxu1  ;;  %v2503_v16 = vld [vmem:[%s2675_s28 + $0xc] ss:$16 sps:$4 sm:$0xff]  }
 0x10e   : > { %767 = vrot.lane.b32.xlu1 %v618_v43, %s2621_s17  ;;  %v2760_v48 = vpack.c.bf16 %v573_v47, %v573_v47  ;;  %v2506_v18 = vld [vmem:[%s2675_s28 + $0x2c] ss:$16 sps:$4 sm:$0xff]  }
 0x10f   : > { %v723_v25 = vsel %vm721_vm2, %v2795_v19, 0  ;;  %v2509_v23 = vld [vmem:[%s2675_s28 + $0x4c] ss:$16 sps:$4 sm:$0xff]  }
 0x112   : > { %880 = vrot.lane.b32.xlu1 %v618_v43, %s2622_s18 }
 0x116   : > { %992 = vrot.lane.b32.xlu1 %v618_v43, %s2624_s19 }
 0x11a   : > { %1250 = vrot.lane.b32.xlu1 %v2760_v48, %s2621_s17 }
 0x180   : > { %v2782_v1 = vpop.permute.xlu1 %767 }
 0x184   : > { %v881_v6 = vpop.permute.xlu1 %880 }
 0x188   : > { %v993_v12 = vpop.permute.xlu1 %992 }
 0x18d   : > { %v635_v49 = vpop.trf.xlu0 }
 0x191   : > { %v636_v50 = vpop.trf.xlu0 }
 0x192   : > { %v651_v51 = vpack.c.bf16 %v636_v50, %v635_v49  ;;  %v1251_v49 = vpop.permute.xlu1 %1250 }
 0x194   : > { %2331 = vmatpush3.bf16.msra.mxu1 %v651_v51 }
 0x195   : > { %v637_v52 = vpop.trf.xlu0  ;;  %2332 = vmatprep.subr.bf16.mxu1 %v2620_v24 }
 0x199   : > { %v638_v53 = vpop.trf.xlu0 }
 0x19a   : > { %v652_v54 = vpack.c.bf16 %v638_v53, %v637_v52 }
 0x19c   : > { %2333 = vmatpush3.bf16.msra.mxu1 %v652_v54 }
 0x19d   : > { %v2765_v55 = vpop.trf.xlu0  ;;  %2338 = vmatprep.subr.bf16.mxu1 %v2620_v24 }
 0x19f   : > { %2335 = vmatmul.mubr.msk.bf16.vlgmr.msra.gmra.mrb[4].mxu1 %vm660_vm1, %v618_v43 }
 0x1a0   : > { %2340 = vmatprep.mubr.msk.bf16.mxu1 %vm2623_vm0, %v2620_v24  ;;  %2339 = vmatpush3.bf16.msra.mxu1 %v723_v25  ;;  %v2512_v25 = vld [vmem:[%s2675_s28 + $0x6c] ss:$16 sps:$4 sm:$0xff]  }
 0x1a1   : > { %v2771_v56 = vpop.trf.xlu0  ;;  %2344 = vmatprep.subr.bf16.mxu1 %v2620_v24 }
 0x1a2   : > { %v653_v57 = vpack.c.bf16 %v2771_v56, %v2765_v55 }
 0x1a5   : > { %v2775_v58 = vpop.trf.xlu0 }
 0x1a9   : > { %v2777_v59 = vpop.trf.xlu0 }
 0x1aa   : > { %v654_v60 = vpack.c.bf16 %v2777_v59, %v2775_v58 }
 0x1ad   : > { %v643_v61 = vpop.trf.xlu0 }
 0x1b1   : > { %v644_v62 = vpop.trf.xlu0 }
 0x1b2   : > { %v655_v63 = vpack.c.bf16 %v644_v62, %v643_v61 }
 0x1b4   : > { %2359 = vmatpush3.bf16.msra.mxu0 %v655_v63 }
 0x1b5   : > { %v645_v0 = vpop.trf.xlu0  ;;  %2360 = vmatprep.subr.bf16.mxu0 %v2620_v24 }
 0x1b9   : > { %v646_v2 = vpop.trf.xlu0 }
 0x1ba   : > { %v656_v3 = vpack.c.bf16 %v646_v2, %v645_v0 }
 0x1bc   : > { %2361 = vmatpush3.bf16.msra.mxu0 %v656_v3 }
 0x1bd   : > { %v647_v4 = vpop.trf.xlu0  ;;  %2372 = vmatprep.subr.bf16.mxu0 %v2620_v24 }
 0x1bf   : > { %2363 = vmatmul.mubr.msk.bf16.vlgmr.msra.gmra.mrb[4].mxu0 %vm660_vm1, %v881_v6 }
 0x1c0   : > { %2376 = vmatprep.mubr.msk.bf16.mxu0 %vm2623_vm0, %v2620_v24 }
 0x1c1   : > { %v648_v7 = vpop.trf.xlu0 }
 0x1c2   : > { %v657_v8 = vpack.c.bf16 %v648_v7, %v647_v4 }
 0x1c4   : > { %2373 = vmatpush3.bf16.msra.mxu0 %v657_v8 }
 0x1c5   : > { %v649_v9 = vpop.trf.xlu0  ;;  %2374 = vmatprep.subr.bf16.mxu0 %v2620_v24 }
 0x1c9   : > { %v650_v10 = vpop.trf.xlu0 }
 0x1ca   : > { %v658_v11 = vpack.c.bf16 %v650_v10, %v649_v9 }
 0x1cc   : > { %2375 = vmatpush3.bf16.msra.mxu0 %v658_v11 }
 0x1cd   : > { %2386 = vmatprep.subr.bf16.mxu0 %v2620_v24 }
 0x1cf   : > { %2377 = vmatmul.mubr.msk.bf16.vlgmr.msra.gmra.mrb[8].mxu0 %vm660_vm1, %v993_v12 }
 0x1d0   : > { %2390 = vmatprep.mubr.msk.bf16.mxu0 %vm2623_vm0, %v2620_v24 }
 0x272   : > { %v698_v26 = vpop.f32.mrb[4].mxu1 }
 0x273   : > { %v704_v27 = vmul.f32 0.17677669, %v698_v26  ;;  %v2336_v28 = vpop.f32.mrb[5].mxu1  ;;  %v2515_v26 = vld [vmem:[%s2675_s28 + $0x8c] ss:$16 sps:$4 sm:$0xff]  }
 0x274   : > { %v701_v30 = vpop.f32.mrb[6].mxu1  ;;  %v2521_v28 = vld [vmem:[%s2675_s28 + $0xcc] ss:$16 sps:$4 sm:$0xff]  }
 0x275   : > { %v2337_v31 = vpop.f32.mrb[7].mxu1  ;;  %v706_v33 = vsel %vm705_vm3, %v704_v27, -inf  ;;  %v2524_v30 = vld [vmem:[%s2675_s28 + $0xec] ss:$16 sps:$4 sm:$0xff]  }
 0x276   : > { %707 = vmax.xlane.f32.xlu0 %v706_v33 }
 0x28c   : > { %1473 = vrot.lane.b32.xlu0 %v2760_v48, %s2624_s19 }
 0x292   : > { %v2805_v34 = vpop.f32.mrb[4].mxu0 }
 0x293   : > { %v2364_v35 = vpop.f32.mrb[5].mxu0 }
 0x294   : > { %v922_v36 = vpop.f32.mrb[6].mxu0 }
 0x295   : > { %v2365_v37 = vpop.f32.mrb[7].mxu0 }
 0x2a2   : > { %v1031_v38 = vpop.f32.mrb[8].mxu0 }
 0x2a3   : > { %v2378_v39 = vpop.f32.mrb[9].mxu0 }
 0x2a4   : > { %v1034_v40 = vpop.f32.mrb[10].mxu0 }
 0x2a5   : > { %v2379_v41 = vpop.f32.mrb[11].mxu0 }
 0x2a6   : > { %v925_v41 = vmul.f32 0.17677669, %v2805_v34 }
 0x303   : > { %v708_v42 = vpop.xlane.xlu0 %707 }
 0x304   : > { %v709_v43 = vsub.f32 %v704_v27, %v708_v42  ;;  %v2518_v27 = vld [vmem:[%s2675_s28 + $0xac] ss:$16 sps:$4 sm:$0xff]  }
 0x306   : > { %v710_v44 = vmul.f32 1.442695, %v709_v43 }
 0x307   : > { %v1474_v17 = vpop.permute.xlu0 %1473 }
 0x308   : > { %2565 = vpow2.f32 %v710_v44  ;;  %v926_v44 = vsel %vm705_vm3, %v925_v41, -inf }
 0x312   : > { %v2566_v46 = vpop.eup %2565 }
 0x313   : > { %v712_v47 = vsel %vm705_vm3, %v2566_v46, 0.0 }
 0x314   : > { %713 = vadd.xlane.f32.xlu1 %v712_v47 }
 0x347   : > { %1105 = vxpose.xlu1.b32.start.end [1/1] (short) %v2747_v45, 128  ;;  %v2826_v45 = vmul.f32 0.17677669, %v1031_v38 }
 0x349   : > { %v1038_v54 = vsel %vm705_vm3, %v2826_v45, -inf }
 0x3a1   : > { %1362 = vrot.lane.b32.xlu1 %v2760_v48, %s2622_s18  ;;  %v714_v50 = vpop.xlane.xlu1 %713 }
 0x3a2   : > { %2567 = vrcp.f32 %v714_v50 }
 0x3ac   : > { %v2568_v51 = vpop.eup %2567 }
 0x3ad   : > { %v716_v52 = vmul.f32 %v2568_v51, %v2566_v46 }
 0x3af   : > { %v717_v53 = vpack.c.bf16 %v716_v52, %v716_v52 }
 0x3b1   : > { %2341 = vmatmul.mubr.msk.bf16.vlgmr.msra.gmra.mrb[8].mxu1 %vm705_vm3, %v717_v53 }
 0x3b2   : > { %2345 = vmatpush3.bf16.msra.mxu1 %v653_v57  ;;  %2348 = vmatprep.mubr.msk.bf16.mxu1 %vm2623_vm0, %v2620_v24 }
 0x3b3   : > { %2346 = vmatprep.subr.bf16.mxu1 %v2620_v24 }
 0x3b6   : > { %2347 = vmatpush3.bf16.msra.mxu1 %v654_v60 }
 0x3b7   : > { %2352 = vmatprep.subr.bf16.mxu1 %v2620_v24 }
 0x3b9   : > { %2349 = vmatmul.mubr.msk.bf16.vlgmr.msra.gmra.mrb[12].mxu1 %vm660_vm1, %v2782_v1 }
 0x3ba   : > { %2354 = vmatprep.mubr.msk.bf16.mxu1 %vm2623_vm0, %v2620_v24 }
 0x3c5   : > { %1039 = vmax.xlane.f32.xlu1 %v1038_v54 }
 0x3c7   : > { %v1121_v55 = vpop.trf.xlu1 }
 0x3cb   : > { %v1122_v56 = vpop.trf.xlu1 }
 0x3cc   : > { %v1137_v57 = vpack.c.bf16 %v1122_v56, %v1121_v55 }
 0x3ce   : > { %2387 = vmatpush3.bf16.msra.mxu0 %v1137_v57 }
 0x3cf   : > { %v1123_v58 = vpop.trf.xlu1  ;;  %2388 = vmatprep.subr.bf16.mxu0 %v2620_v24 }
 0x3d3   : > { %v1124_v59 = vpop.trf.xlu1 }
 0x3d4   : > { %v1138_v60 = vpack.c.bf16 %v1124_v59, %v1123_v58 }
 0x3d6   : > { %2389 = vmatpush3.bf16.msra.mxu0 %v1138_v60 }
 0x3d7   : > { %v1125_v61 = vpop.trf.xlu1  ;;  %2400 = vmatprep.subr.bf16.mxu0 %v2620_v24 }
 0x3d9   : > { %2391 = vmatmul.mubr.msk.bf16.vlgmr.msra.gmra.mrb[12].mxu0 %vm660_vm1, %v2760_v48 }
 0x3da   : > { %2404 = vmatprep.mubr.msk.bf16.mxu0 %vm2623_vm0, %v2620_v24 }
 0x3db   : > { %v1126_v62 = vpop.trf.xlu1 }
 0x3dc   : > { %v1139_v63 = vpack.c.bf16 %v1126_v62, %v1125_v61 }
 0x3de   : > { %2401 = vmatpush3.bf16.msra.mxu0 %v1139_v63 }
 0x3df   : > { %v1127_v0 = vpop.trf.xlu1  ;;  %2402 = vmatprep.subr.bf16.mxu0 %v2620_v24 }
 0x3e3   : > { %v1128_v1 = vpop.trf.xlu1 }
 0x3e4   : > { %v1140_v2 = vpack.c.bf16 %v1128_v1, %v1127_v0 }
 0x3e6   : > { %2403 = vmatpush3.bf16.msra.mxu0 %v1140_v2 }
 0x3e7   : > { %v1129_v3 = vpop.trf.xlu1  ;;  %2414 = vmatprep.subr.bf16.mxu0 %v2620_v24 }
 0x3e9   : > { %2405 = vmatmul.mubr.msk.bf16.vlgmr.msra.gmra.mrb[16].mxu0 %vm660_vm1, %v1251_v49 }
 0x3ea   : > { %2418 = vmatprep.mubr.msk.bf16.mxu0 %vm2623_vm0, %v2620_v24 }
 0x3eb   : > { %v1130_v48 = vpop.trf.xlu1 }
 0x3ec   : > { %v1141_v4 = vpack.c.bf16 %v1130_v48, %v1129_v3 }
 0x3ee   : > { %2415 = vmatpush3.bf16.msra.mxu0 %v1141_v4 }
 0x3ef   : > { %v1131_v6 = vpop.trf.xlu1  ;;  %2416 = vmatprep.subr.bf16.mxu0 %v2620_v24 }
 0x3f3   : > { %v1132_v7 = vpop.trf.xlu1 }
 0x3f4   : > { %v1142_v8 = vpack.c.bf16 %v1132_v7, %v1131_v6 }
 0x3f6   : > { %2417 = vmatpush3.bf16.msra.mxu0 %v1142_v8 }
 0x3f7   : > { %2428 = vmatprep.subr.bf16.mxu0 %v2620_v24  ;;  %v1133_v9 = vpop.trf.xlu1 }
 0x3fb   : > { %v1134_v10 = vpop.trf.xlu1 }
 0x3fc   : > { %v1143_v13 = vpack.c.bf16 %v1134_v10, %v1133_v9 }
 0x3ff   : > { %v1135_v11 = vpop.trf.xlu1 }
 0x403   : > { %v1136_v12 = vpop.trf.xlu1 }
 0x404   : > { %v1144_v15 = vpack.c.bf16 %v1136_v12, %v1135_v11 }
 0x413   : > { %v1363_v14 = vpop.permute.xlu1 %1362 }
 0x414   : > { %2419 = vmatmul.mubr.msk.bf16.vlgmr.msra.gmra.mrb[20].mxu0 %vm660_vm1, %v1363_v14 }
 0x415   : > { %2429 = vmatpush3.bf16.msra.mxu0 %v1143_v13  ;;  %2432 = vmatprep.mubr.msk.bf16.mxu0 %vm2623_vm0, %v2620_v24 }
 0x416   : > { %2430 = vmatprep.subr.bf16.mxu0 %v2620_v24 }
 0x419   : > { %2431 = vmatpush3.bf16.msra.mxu0 %v1144_v15 }
 0x41a   : > { %2442 = vmatprep.subr.bf16.mxu0 %v2620_v24 }
 0x41c   : > { %2433 = vmatmul.mubr.msk.bf16.vlgmr.msra.gmra.mrb[24].mxu0 %vm660_vm1, %v1474_v17 }
 0x41d   : > { %2443 = vmatpush3.bf16.msra.mxu0 %v2503_v16  ;;  %2458 = vmatprep.mubr.msk.bf16.mxu0 %vm2623_vm0, %v2620_v24 }
 0x41e   : > { %2444 = vmatprep.subr.bf16.mxu0 %v2620_v24 }
 0x421   : > { %2445 = vmatpush3.bf16.msra.mxu0 %v2506_v18 }
 0x422   : > { %2446 = vmatprep.subr.bf16.mxu0 %v2620_v24 }
 0x425   : > { %2447 = vmatpush3.bf16.msra.mxu0 %v2509_v23 }
 0x426   : > { %2448 = vmatprep.subr.bf16.mxu0 %v2620_v24 }
 0x429   : > { %2449 = vmatpush3.bf16.msra.mxu0 %v2512_v25 }
 0x42a   : > { %2450 = vmatprep.subr.bf16.mxu0 %v2620_v24 }
 0x42d   : > { %2451 = vmatpush3.bf16.msra.mxu0 %v2515_v26 }
 0x42e   : > { %2452 = vmatprep.subr.bf16.mxu0 %v2620_v24 }
 0x431   : > { %2453 = vmatpush3.bf16.msra.mxu0 %v2518_v27 }
 0x432   : > { %2454 = vmatprep.subr.bf16.mxu0 %v2620_v24 }
 0x435   : > { %2455 = vmatpush3.bf16.msra.mxu0 %v2521_v28 }
 0x436   : > { %2456 = vmatprep.subr.bf16.mxu0 %v2620_v24 }
 0x439   : > { %2457 = vmatpush3.bf16.msra.mxu0 %v2524_v30 }
 0x452   : > { %v1040_v6 = vpop.xlane.xlu1 %1039 }
 0x453   : > { %v1041_v8 = vsub.f32 %v2826_v45, %v1040_v6 }
 0x455   : > { %v1042_v11 = vmul.f32 1.442695, %v1041_v8 }
 0x484   : > { %v759_v31 = vpop.f32.mrb[8].mxu1 }
 0x485   : > { %765 = vst.msk [vmem:[#allocation3] sm:$0xff] %vm660_vm1, %v759_v31  ;;  %v2342_v33 = vpop.f32.mrb[9].mxu1 }
 0x486   : > { %v762_v35 = vpop.f32.mrb[10].mxu1 }
 0x487   : > { %v2343_v36 = vpop.f32.mrb[11].mxu1 }
 0x48c   : > { %v806_v37 = vpop.f32.mrb[12].mxu1 }
 0x48d   : > { %v812_v38 = vmul.f32 0.17677669, %v806_v37  ;;  %v2350_v39 = vpop.f32.mrb[13].mxu1 }
 0x48e   : > { %v809_v40 = vpop.f32.mrb[14].mxu1 }
 0x48f   : > { %v2351_v42 = vpop.f32.mrb[15].mxu1  ;;  %v813_v43 = vsel %vm705_vm3, %v812_v38, -inf }
 0x490   : > { %814 = vmax.xlane.f32.xlu0 %v813_v43 }
 0x494   : > { %927 = vmax.xlane.f32.xlu0 %v926_v44 }
 0x4ac   : > { %v1183_v46 = vpop.f32.mrb[12].mxu0 }
 0x4ad   : > { %v1189_v47 = vmul.f32 0.17677669, %v1183_v46  ;;  %v2392_v49 = vpop.f32.mrb[13].mxu0 }
 0x4ae   : > { %v1186_v50 = vpop.f32.mrb[14].mxu0 }
 0x4af   : > { %v2393_v51 = vpop.f32.mrb[15].mxu0  ;;  %v1190_v52 = vsel %vm705_vm3, %v1189_v47, -inf }
 0x4b0   : > { %1191 = vmax.xlane.f32.xlu0 %v1190_v52 }
 0x4bc   : > { %v1289_v53 = vpop.f32.mrb[16].mxu0 }
 0x4bd   : > { %v1295_v54 = vmul.f32 0.17677669, %v1289_v53  ;;  %v2406_v55 = vpop.f32.mrb[17].mxu0 }
 0x4be   : > { %v1292_v56 = vpop.f32.mrb[18].mxu0 }
 0x4bf   : > { %v2407_v34 = vpop.f32.mrb[19].mxu0  ;;  %v1296_v57 = vsel %vm705_vm3, %v1295_v54, -inf }
 0x4c0   : > { %1297 = vmax.xlane.f32.xlu0 %v1296_v57 }
 0x4e7   : > { %v1401_v58 = vpop.f32.mrb[20].mxu0 }
 0x4e8   : > { %v1407_v59 = vmul.f32 0.17677669, %v1401_v58  ;;  %v2420_v60 = vpop.f32.mrb[21].mxu0 }
 0x4e9   : > { %v1404_v61 = vpop.f32.mrb[22].mxu0 }
 0x4ea   : > { %v2421_v62 = vpop.f32.mrb[23].mxu0  ;;  %v1408_v63 = vsel %vm705_vm3, %v1407_v59, -inf }
 0x4eb   : > { %1409 = vmax.xlane.f32.xlu0 %v1408_v63 }
 0x4ef   : > { %v1512_v0 = vpop.f32.mrb[24].mxu0 }
 0x4f0   : > { %v1518_v1 = vmul.f32 0.17677669, %v1512_v0  ;;  %v2434_v2 = vpop.f32.mrb[25].mxu0 }
 0x4f1   : > { %v1515_v3 = vpop.f32.mrb[26].mxu0 }
 0x4f2   : > { %v2435_v48 = vpop.f32.mrb[27].mxu0  ;;  %v1519_v4 = vsel %vm705_vm3, %v1518_v1, -inf }
 0x4f3   : > { %1520 = vmax.xlane.f32.xlu0 %v1519_v4 }
 0x51d   : > { %v815_v7 = vpop.xlane.xlu0 %814 }
 0x51e   : > { %v816_v17 = vsub.f32 %v812_v38, %v815_v7 }
 0x520   : > { %v817_v23 = vmul.f32 1.442695, %v816_v17 }
 0x521   : > { %v928_v9 = vpop.xlane.xlu0 %927 }
 0x522   : > { %v929_v10 = vsub.f32 %v925_v41, %v928_v9 }
 0x524   : > { %v930_v12 = vmul.f32 1.442695, %v929_v10 }
 0x526   : > { %2569 = vpow2.f32 %v930_v12 }
 0x527   : > { %2571 = vpow2.f32 %v1042_v11 }
 0x530   : > { %v2875_v13 = vpop.eup %2569 }
 0x531   : > { %v932_v14 = vsel %vm705_vm3, %v2875_v13, 0.0  ;;  %v2879_v15 = vpop.eup %2571 }
 0x532   : > { %933 = vadd.xlane.f32.xlu0 %v932_v14  ;;  %v1044_v16 = vsel %vm705_vm3, %v2879_v15, 0.0 }
 0x536   : > { %1045 = vadd.xlane.f32.xlu0 %v1044_v16 }
 0x53d   : > { %v1192_v45 = vpop.xlane.xlu0 %1191 }
 0x53e   : > { %v1193_v18 = vsub.f32 %v1189_v47, %v1192_v45 }
 0x540   : > { %v1194_v25 = vmul.f32 1.442695, %v1193_v18 }
 0x542   : > { %2573 = vpow2.f32 %v1194_v25 }
 0x543   : > { %2575 = vpow2.f32 %v817_v23 }
 0x54c   : > { %v2883_v26 = vpop.eup %2573 }
 0x54d   : > { %v1298_v27 = vpop.xlane.xlu0 %1297  ;;  %v1196_v28 = vsel %vm705_vm3, %v2883_v26, 0.0  ;;  %v2576_v30 = vpop.eup %2575 }
 0x54e   : > { %v1299_v31 = vsub.f32 %v1295_v54, %v1298_v27  ;;  %1197 = vadd.xlane.f32.xlu0 %v1196_v28  ;;  %v819_v35 = vsel %vm705_vm3, %v2576_v30, 0.0 }
 0x550   : > { %v1300_v33 = vmul.f32 1.442695, %v1299_v31 }
 0x552   : > { %2577 = vpow2.f32 %v1300_v33  ;;  %820 = vadd.xlane.f32.xlu0 %v819_v35 }
 0x55c   : > { %v2888_v36 = vpop.eup %2577 }
 0x55d   : > { %v1302_v37 = vsel %vm705_vm3, %v2888_v36, 0.0 }
 0x55e   : > { %1303 = vadd.xlane.f32.xlu1 %v1302_v37 }
 0x568   : > { %826 = vrot.lane.b32.xlu0 %v2795_v19, %s2621_s17 }
 0x56f   : > { %938 = vrot.lane.b32.xlu1 %v2795_v19, %s2622_s18 }
 0x573   : > { %1050 = vrot.lane.b32.xlu1 %v2795_v19, %s2624_s19  ;;  %v1145_v19 = vpack.c.bf16 %v2797_v22, %v2797_v22 }
 0x575   : > { %v1206_v4 = vsel %vm721_vm2, %v1145_v19, 0 }
 0x578   : > { %v1410_v38 = vpop.xlane.xlu0 %1409 }
 0x579   : > { %v1411_v39 = vsub.f32 %v1407_v59, %v1410_v38 }
 0x57b   : > { %v1412_v40 = vmul.f32 1.442695, %v1411_v39 }
 0x57d   : > { %2579 = vpow2.f32 %v1412_v40 }
 0x580   : > { %v1521_v41 = vpop.xlane.xlu0 %1520 }
 0x581   : > { %v1522_v42 = vsub.f32 %v1518_v1, %v1521_v41 }
 0x583   : > { %v1523_v43 = vmul.f32 1.442695, %v1522_v42 }
 0x585   : > { %2581 = vpow2.f32 %v1523_v43 }
 0x587   : > { %v2898_v44 = vpop.eup %2579 }
 0x588   : > { %v1414_v46 = vsel %vm705_vm3, %v2898_v44, 0.0 }
 0x589   : > { %1415 = vadd.xlane.f32.xlu0 %v1414_v46 }
 0x58f   : > { %v2902_v47 = vpop.eup %2581 }
 0x590   : > { %v1525_v49 = vsel %vm705_vm3, %v2902_v47, 0.0 }
 0x597   : > { %1526 = vadd.xlane.f32.xlu1 %v1525_v49 }
 0x59f   : > { %1309 = vrot.lane.b32.xlu0 %v1145_v19, %s2621_s17 }
 0x5a3   : > { %1531 = vrot.lane.b32.xlu0 %v1145_v19, %s2624_s19 }
 0x5a8   : > { %1420 = vrot.lane.b32.xlu1 %v1145_v19, %s2622_s18 }
 0x5bf   : > { %v934_v50 = vpop.xlane.xlu0 %933 }
 0x5c3   : > { %v1046_v51 = vpop.xlane.xlu0 %1045 }
 0x5db   : > { %v1198_v52 = vpop.xlane.xlu0 %1197 }
 0x5df   : > { %v821_v53 = vpop.xlane.xlu0 %820 }
 0x5e0   : > { %2583 = vrcp.f32 %v821_v53 }
 0x5e1   : > { %2585 = vrcp.f32 %v934_v50 }
 0x5e2   : > { %2587 = vrcp.f32 %v1046_v51 }
 0x5e3   : > { %v827_v54 = vpop.permute.xlu0 %826  ;;  %2589 = vrcp.f32 %v1198_v52 }
 0x5e4   : > { %v832_v55 = vsel %vm721_vm2, %v827_v54, 0 }
 0x5e5   : > { %2353 = vmatpush3.bf16.msra.mxu1 %v832_v55 }
 0x5e6   : > { %2366 = vmatprep.subr.bf16.mxu1 %v2620_v24 }
 0x5ea   : > { %v2584_v56 = vpop.eup %2583 }
 0x5eb   : > { %v823_v22 = vmul.f32 %v2584_v56, %v2576_v30  ;;  %v1304_v34 = vpop.xlane.xlu1 %1303  ;;  %v2586_v58 = vpop.eup %2585 }
 0x5ec   : > { %v936_v61 = vmul.f32 %v2586_v58, %v2875_v13  ;;  %v2588_v0 = vpop.eup %2587  ;;  %2591 = vrcp.f32 %v1304_v34 }
 0x5ed   : > { %v824_v57 = vpack.c.bf16 %v823_v22, %v823_v22  ;;  %v1048_v2 = vmul.f32 %v2588_v0, %v2879_v15  ;;  %v2590_v48 = vpop.eup %2589 }
 0x5ee   : > { %v937_v63 = vpack.c.bf16 %v936_v61, %v936_v61  ;;  %v1200_v6 = vmul.f32 %v2590_v48, %v2883_v26 }
 0x5ef   : > { %v939_v59 = vpop.permute.xlu1 %938  ;;  %2355 = vmatmul.mubr.msk.bf16.vlgmr.msra.gmra.mrb[16].mxu1 %vm705_vm3, %v824_v57  ;;  %v1049_v3 = vpack.c.bf16 %v1048_v2, %v1048_v2  ;;  %v1589_v2 = vsub.s32 1, %v2729_v29 }
 0x5f0   : > { %v944_v60 = vsel %vm721_vm2, %v939_v59, 0  ;;  %2368 = vmatprep.mubr.msk.bf16.mxu1 %vm2623_vm0, %v2620_v24  ;;  %v1201_v7 = vpack.c.bf16 %v1200_v6, %v1200_v6 }
 0x5f1   : > { %2367 = vmatpush3.bf16.msra.mxu1 %v944_v60 }
 0x5f2   : > { %2380 = vmatprep.subr.bf16.mxu1 %v2620_v24 }
 0x5f3   : > { %v1051_v62 = vpop.permute.xlu1 %1050 }
 0x5f4   : > { %v1056_v1 = vsel %vm721_vm2, %v1051_v62, 0 }
 0x5f6   : > { %v2592_v8 = vpop.eup %2591 }
 0x5f7   : > { %2369 = vmatmul.mubr.msk.bf16.vlgmr.msra.gmra.mrb[20].mxu1 %vm705_vm3, %v937_v63  ;;  %v1306_v10 = vmul.f32 %v2592_v8, %v2888_v36 }
 0x5f8   : > { %2381 = vmatpush3.bf16.msra.mxu1 %v1056_v1  ;;  %2382 = vmatprep.mubr.msk.bf16.mxu1 %vm2623_vm0, %v2620_v24 }
 0x5f9   : > { %2394 = vmatprep.subr.bf16.mxu1 %v2620_v24  ;;  %v1307_v13 = vpack.c.bf16 %v1306_v10, %v1306_v10 }
 0x5ff   : > { %2383 = vmatmul.mubr.msk.bf16.vlgmr.msra.gmra.mrb[24].mxu1 %vm705_vm3, %v1049_v3  ;;  %v1590_v3 = vrot.slane %v2736_v32, %v1589_v2  ;;  %v2528_v32 = vld [vmem:[%s2680_s7 + $0x10] ss:$8 sps:$4 sm:$0xff]  }
 0x600   : > { %2395 = vmatpush3.bf16.msra.mxu1 %v1206_v4  ;;  %2396 = vmatprep.mubr.msk.bf16.mxu1 %vm2623_vm0, %v2620_v24 }
 0x601   : > { %2408 = vmatprep.subr.bf16.mxu1 %v2620_v24 }
 0x607   : > { %2397 = vmatmul.mubr.msk.bf16.vlgmr.msra.gmra.mrb[28].mxu1 %vm705_vm3, %v1201_v7 }
 0x608   : > { %2410 = vmatprep.mubr.msk.bf16.mxu1 %vm2623_vm0, %v2620_v24 }
 0x616   : > { %v1416_v9 = vpop.xlane.xlu0 %1415 }
 0x617   : > { %2593 = vrcp.f32 %v1416_v9 }
 0x61a   : > { %v1310_v11 = vpop.permute.xlu0 %1309 }
 0x61b   : > { %v1315_v12 = vsel %vm721_vm2, %v1310_v11, 0 }
 0x61c   : > { %2409 = vmatpush3.bf16.msra.mxu1 %v1315_v12  ;;  %v2525_v12 = vld [vmem:[%s2680_s7] ss:$8 sps:$4 sm:$0xff]  }
 0x61d   : > { %2422 = vmatprep.subr.bf16.mxu1 %v2620_v24 }
 0x61e   : > { %v1532_v18 = vpop.permute.xlu0 %1531 }
 0x61f   : > { %2411 = vmatmul.mubr.msk.bf16.vlgmr.msra.gmra.mrb[32].mxu1 %vm705_vm3, %v1307_v13  ;;  %v1537_v25 = vsel %vm721_vm2, %v1532_v18, 0  ;;  %v2527_v13 = vld [vmem:[%s2680_s7 + $0x4] ss:$8 sps:$4 sm:$0xff]  }
 0x620   : > { %2424 = vmatprep.mubr.msk.bf16.mxu1 %vm2623_vm0, %v2620_v24 }
 0x621   : > { %v2594_v14 = vpop.eup %2593 }
 0x622   : > { %v1418_v16 = vmul.f32 %v2594_v14, %v2898_v44  ;;  %v2530_v14 = vld [vmem:[%s2680_s7 + $0x14] ss:$8 sps:$4 sm:$0xff]  }
 0x624   : > { %v1527_v15 = vpop.xlane.xlu1 %1526  ;;  %v1419_v23 = vpack.c.bf16 %v1418_v16, %v1418_v16 }
 0x625   : > { %2595 = vrcp.f32 %v1527_v15 }
 0x628   : > { %v1421_v17 = vpop.permute.xlu1 %1420 }
 0x629   : > { %v1426_v45 = vsel %vm721_vm2, %v1421_v17, 0 }
 0x62a   : > { %2423 = vmatpush3.bf16.msra.mxu1 %v1426_v45 }
 0x62b   : > { %2436 = vmatprep.subr.bf16.mxu1 %v2620_v24 }
 0x62d   : > { %2425 = vmatmul.mubr.msk.bf16.vlgmr.msra.gmra.mrb[36].mxu1 %vm705_vm3, %v1419_v23 }
 0x62e   : > { %2437 = vmatpush3.bf16.msra.mxu1 %v1537_v25  ;;  %2438 = vmatprep.mubr.msk.bf16.mxu1 %vm2623_vm0, %v2620_v24  ;;  %v2533_v25 = vld [vmem:[%s2680_s7 + $0x24] ss:$8 sps:$4 sm:$0xff]  }
 0x62f   : > { %v2596_v26 = vpop.eup %2595  ;;  %1790 = vmatprep.subr.bf16.mxu1 %v2527_v13 }
 0x630   : > { %v1529_v27 = vmul.f32 %v2596_v26, %v2902_v47  ;;  %v2531_v26 = vld [vmem:[%s2680_s7 + $0x20] ss:$8 sps:$4 sm:$0xff]  }
 0x632   : > { %v1530_v28 = vpack.c.bf16 %v1529_v27, %v1529_v27  ;;  %v2536_v27 = vld [vmem:[%s2680_s7 + $0x34] ss:$8 sps:$4 sm:$0xff]  }
 0x635   : > { %2439 = vmatmul.mubr.msk.bf16.vlgmr.msra.gmra.mrb[40].mxu1 %vm705_vm3, %v1530_v28  ;;  %v2534_v28 = vld [vmem:[%s2680_s7 + $0x30] ss:$8 sps:$4 sm:$0xff]  }
 0x636   : > { %1822 = vmatprep.mubr.bf16.mxu1 %v2619_v5  ;;  %1791 = vmatpush1.bf16.msra.mxu1 %v2525_v12 }
 0x637   : > { %1792 = vmatprep.subr.bf16.mxu1 %v2530_v14 }
 0x63a   : > { %1793 = vmatpush1.bf16.msra.mxu1 %v2528_v32 }
 0x63b   : > { %1794 = vmatprep.subr.bf16.mxu1 %v2533_v25 }
 0x63e   : > { %1795 = vmatpush1.bf16.msra.mxu1 %v2531_v26 }
 0x63f   : > { %1796 = vmatprep.subr.bf16.mxu1 %v2536_v27 }
 0x642   : > { %1797 = vmatpush1.bf16.msra.mxu1 %v2534_v28  ;;  %v1841_v28 = vsub.s32 3, %v2729_v29 }
 0x6c2   : > { %v868_v30 = vpop.f32.mrb[16].mxu1 }
 0x6c3   : > { %875 = vrot.lane.b32.xlu0 %v868_v30, %s2624_s19  ;;  %v2356_v31 = vpop.f32.mrb[17].mxu1  ;;  %v2539_v30 = vld [vmem:[%s2680_s7 + $0x44] ss:$8 sps:$4 sm:$0xff]  }
 0x6c4   : > { %v871_v33 = vpop.f32.mrb[18].mxu1  ;;  %v2537_v31 = vld [vmem:[%s2680_s7 + $0x40] ss:$8 sps:$4 sm:$0xff]   ;;  %1798 = vmatprep.subr.bf16.mxu1 %v2539_v30 }
 0x6c5   : > { %v2357_v35 = vpop.f32.mrb[19].mxu1  ;;  %1799 = vmatpush1.bf16.msra.mxu1 %v2537_v31  ;;  %v2542_v33 = vld [vmem:[%s2680_s7 + $0x54] ss:$8 sps:$4 sm:$0xff]  }
 0x6c6   : > { %v2540_v35 = vld [vmem:[%s2680_s7 + $0x50] ss:$8 sps:$4 sm:$0xff]   ;;  %1800 = vmatprep.subr.bf16.mxu1 %v2542_v33 }
 0x6c9   : > { %1801 = vmatpush1.bf16.msra.mxu1 %v2540_v35 }
 0x6ca   : > { %v980_v36 = vpop.f32.mrb[20].mxu1 }
 0x6cb   : > { %987 = vrot.lane.b32.xlu0 %v980_v36, %s2622_s18  ;;  %v2370_v37 = vpop.f32.mrb[21].mxu1  ;;  %v2545_v36 = vld [vmem:[%s2680_s7 + $0x64] ss:$8 sps:$4 sm:$0xff]  }
 0x6cc   : > { %v983_v38 = vpop.f32.mrb[22].mxu1  ;;  %v2543_v37 = vld [vmem:[%s2680_s7 + $0x60] ss:$8 sps:$4 sm:$0xff]   ;;  %1802 = vmatprep.subr.bf16.mxu1 %v2545_v36 }
 0x6cd   : > { %v2371_v24 = vpop.f32.mrb[23].mxu1  ;;  %v2548_v38 = vld [vmem:[%s2680_s7 + $0x74] ss:$8 sps:$4 sm:$0xff]   ;;  %1803 = vmatpush1.bf16.msra.mxu1 %v2543_v37 }
 0x6ce   : > { %v2546_v24 = vld [vmem:[%s2680_s7 + $0x70] ss:$8 sps:$4 sm:$0xff]   ;;  %1804 = vmatprep.subr.bf16.mxu1 %v2548_v38 }
 0x6d1   : > { %1805 = vmatpush1.bf16.msra.mxu1 %v2546_v24 }
 0x6d2   : > { %v1092_v39 = vpop.f32.mrb[24].mxu1 }
 0x6d3   : > { %1099 = vrot.lane.b32.xlu0 %v1092_v39, %s2621_s17  ;;  %v2384_v40 = vpop.f32.mrb[25].mxu1  ;;  %v2549_v39 = vld [vmem:[%s2685_s10 + $0x40] sm:$0xff]  }
 0x6d4   : > { %v1095_v41 = vpop.f32.mrb[26].mxu1  ;;  %v2550_v40 = vld [vmem:[%s2685_s10] sm:$0xff]   ;;  %2288 = vmatprep.subr.bf16.mxu0 %v2549_v39 }
 0x6d5   : > { %v2385_v42 = vpop.f32.mrb[27].mxu1  ;;  %v2551_v41 = vld [vmem:[%s2685_s10 + $0x48] sm:$0xff]  }
 0x6d6   : > { %v2552_v42 = vld [vmem:[%s2685_s10 + $0x8] sm:$0xff]  }
 0x6da   : > { %v1242_v43 = vpop.f32.mrb[28].mxu1 }
 0x6db   : > { %1248 = vst.msk [vmem:[#allocation3 + $0x8] sm:$0xff] %vm660_vm1, %v1242_v43  ;;  %v2398_v5 = vpop.f32.mrb[29].mxu1  ;;  %v2553_v43 = vld [vmem:[%s2685_s10 + $0x50] sm:$0xff]  }
 0x6dc   : > { %v1245_v44 = vpop.f32.mrb[30].mxu1  ;;  %v2554_v5 = vld [vmem:[%s2685_s10 + $0x10] sm:$0xff]  }
 0x6dd   : > { %v2399_v46 = vpop.f32.mrb[31].mxu1  ;;  %v2555_v44 = vld [vmem:[%s2685_s10 + $0x58] sm:$0xff]  }
 0x6de   : > { %v2556_v46 = vld [vmem:[%s2685_s10 + $0x18] sm:$0xff]  }
 0x6f2   : > { %v1351_v47 = vpop.f32.mrb[32].mxu1 }
 0x6f3   : > { %1358 = vrot.lane.b32.xlu1 %v1351_v47, %s2624_s19  ;;  %v2412_v49 = vpop.f32.mrb[33].mxu1  ;;  %v2557_v47 = vld [vmem:[%s2685_s10 + $0x60] sm:$0xff]  }
 0x6f4   : > { %v1354_v19 = vpop.f32.mrb[34].mxu1  ;;  %v2558_v49 = vld [vmem:[%s2685_s10 + $0x20] sm:$0xff]  }
 0x6f5   : > { %v2413_v50 = vpop.f32.mrb[35].mxu1  ;;  %v2559_v19 = vld [vmem:[%s2685_s10 + $0x68] sm:$0xff]  }
 0x700   : > { %v1462_v51 = vpop.f32.mrb[36].mxu1 }
 0x701   : > { %1469 = vrot.lane.b32.xlu1 %v1462_v51, %s2622_s18  ;;  %v2426_v52 = vpop.f32.mrb[37].mxu1 }
 0x702   : > { %v1465_v53 = vpop.f32.mrb[38].mxu1 }
 0x703   : > { %v2427_v54 = vpop.f32.mrb[39].mxu1 }
 0x708   : > { %v1573_v55 = vpop.f32.mrb[40].mxu1 }
 0x709   : > { %1580 = vrot.lane.b32.xlu1 %v1573_v55, %s2621_s17  ;;  %v2440_v56 = vpop.f32.mrb[41].mxu1 }
 0x70a   : > { %v1576_v22 = vpop.f32.mrb[42].mxu1  ;;  %v1691_v56 = vsub.s32 4, %v2729_v29 }
 0x70b   : > { %v2441_v34 = vpop.f32.mrb[43].mxu1 }
 0x735   : > { %v876_v57 = vpop.permute.xlu0 %875 }
 0x736   : > { %879 = vst.msk [vmem:[#allocation3] sm:$0xff] %vm878_vm4, %v876_v57  ;;  %v2999_v57 = vld [vmem:[%s2690_s14] sm:$0xff] }
 0x737   : > { %v1842_v31 = vrot.slane %v2999_v57, %v1841_v28 }
 0x73d   : > { %v988_v58 = vpop.permute.xlu0 %987 }
 0x73e   : > { %991 = vst.msk [vmem:[#allocation3] sm:$0xff] %vm990_vm5, %v988_v58  ;;  %v1692_v58 = vrot.slane %v2999_v57, %v1691_v56  ;;  %v2006_v56 = vsub.s32 6, %v2729_v29 }
 0x745   : > { %v1100_v59 = vpop.permute.xlu0 %1099 }
 0x746   : > { %1103 = vst.msk [vmem:[#allocation3] sm:$0xff] %vm1102_vm6, %v1100_v59  ;;  %v1697_v59 = vsub.s32 5, %v2729_v29 }
 0x74d   : > { %v1584_v63 = vld [vmem:[#allocation3] sm:$0xff] }
 0x765   : > { %v1359_v60 = vpop.permute.xlu1 %1358 }
 0x766   : > { %1361 = vst.msk [vmem:[#allocation3 + $0x8] sm:$0xff] %vm878_vm4, %v1359_v60 }
 0x773   : > { %v1470_v61 = vpop.permute.xlu1 %1469 }
 0x774   : > { %1472 = vst.msk [vmem:[#allocation3 + $0x8] sm:$0xff] %vm990_vm5, %v1470_v61 }
 0x77b   : > { %v1581_v62 = vpop.permute.xlu1 %1580 }
 0x77c   : > { %1583 = vst.msk [vmem:[#allocation3 + $0x8] sm:$0xff] %vm1102_vm6, %v1581_v62 }
 0x783   : > { %v1585_v0 = vld [vmem:[#allocation3 + $0x8] sm:$0xff] }
 0x784   : > { %v1586_v1 = vpack.c.bf16 %v1585_v0, %v1584_v63  ;;  %v1698_v63 = vrot.slane %v2999_v57, %v1697_v59 }
 0x786   : > { %2459 = vmatmul.mubr.bf16.vlgmr.msra.gmra.mrb[28].mxu0 %v1586_v1 }
 0x787   : > { %2289 = vmatpush3.bf16.msra.mxu0 %v2550_v40 }
 0x788   : > { %2290 = vmatprep.subr.bf16.mxu0 %v2551_v41 }
 0x78b   : > { %2291 = vmatpush3.bf16.msra.mxu0 %v2552_v42 }
 0x78c   : > { %2292 = vmatprep.subr.bf16.mxu0 %v2553_v43 }
 0x78f   : > { %2293 = vmatpush3.bf16.msra.mxu0 %v2554_v5 }
 0x790   : > { %2294 = vmatprep.subr.bf16.mxu0 %v2555_v44 }
 0x793   : > { %2295 = vmatpush3.bf16.msra.mxu0 %v2556_v46 }
 0x794   : > { %2296 = vmatprep.subr.bf16.mxu0 %v2557_v47 }
 0x797   : > { %2297 = vmatpush3.bf16.msra.mxu0 %v2558_v49 }
 0x798   : > { %2298 = vmatprep.subr.bf16.mxu0 %v2559_v19 }
 0x859   : > { %v1657_v48 = vpop.f32.mrb[28].mxu0 }
 0x85a   : > { %v1658_v4 = vadd.f32 %v1657_v48, %v1590_v3  ;;  %v2460_v6 = vpop.f32.mrb[29].mxu0  ;;  %v2560_v48 = vld [vmem:[%s2685_s10 + $0x28] sm:$0xff]  }
 0x85b   : > { %v1660_v7 = vpop.f32.mrb[30].mxu0  ;;  %2299 = vmatpush3.bf16.msra.mxu0 %v2560_v48  ;;  %v2562_v6 = vld [vmem:[%s2685_s10 + $0x30] sm:$0xff]  }
 0x85c   : > { %v1661_v8 = vadd.f32 %v1660_v7, %v1590_v3  ;;  %v2461_v9 = vpop.f32.mrb[31].mxu0  ;;  %v1664_v10 = vadd.f32 %v1658_v4, %v2713_v20  ;;  %v2561_v4 = vld [vmem:[%s2685_s10 + $0x70] sm:$0xff]   ;;  %v2563_v7 = vld [vmem:[%s2685_s10 + $0x78] sm:$0xff]  }
 0x85d   : > { %2300 = vmatprep.subr.bf16.mxu0 %v2561_v4  ;;  %v1704_v9 = vsub.s32 2, %v2729_v29 }
 0x85e   : > { %1666 = vadd.xlane.f32.xlu0 %v1664_v10  ;;  %v1665_v11 = vadd.f32 %v1661_v8, %v2715_v21  ;;  %v2564_v8 = vld [vmem:[%s2685_s10 + $0x38] sm:$0xff]  }
 0x85f   : > { %2301 = vmatpush3.bf16.msra.mxu0 %v2562_v6 }
 0x860   : > { %1668 = vadd.xlane.f32.xlu1 %v1665_v11  ;;  %2302 = vmatprep.subr.bf16.mxu0 %v2563_v7 }
 0x863   : > { %2303 = vmatpush3.bf16.msra.mxu0 %v2564_v8 }
 0x8eb   : > { %v1667_v15 = vpop.xlane.xlu0 %1666 }
 0x8ec   : > { %v1671_v16 = vmul.f32 0.0078125, %v1667_v15 }
 0x8ed   : > { %v1669_v17 = vpop.xlane.xlu1 %1668 }
 0x8ee   : > { %v2965_v20 = vsub.f32 %v1664_v10, %v1671_v16  ;;  %v1672_v21 = vmul.f32 0.0078125, %v1669_v17  ;;  %v1705_v10 = vrot.slane %v2999_v57, %v1704_v9 }
 0x8f0   : > { %v2967_v45 = vsub.f32 %v1665_v11, %v1672_v21  ;;  %v1675_v18 = vmul.f32 %v2965_v20, %v2965_v20  ;;  %v2606_v11 = vld [vmem:[%s2690_s14 + $0x8] sm:$0xff] }
 0x8f1   : > { %v1709_v12 = vrot.slane %v2606_v11, %v1704_v9 }
 0x8f2   : > { %1677 = vadd.xlane.f32.xlu0 %v1675_v18  ;;  %v1676_v23 = vmul.f32 %v2967_v45, %v2967_v45 }
 0x8f6   : > { %1679 = vadd.xlane.f32.xlu0 %v1676_v23 }
 0x97f   : > { %v1678_v50 = vpop.xlane.xlu0 %1677 }
 0x980   : > { %v1681_v51 = vmul.f32 0.0078125, %v1678_v50 }
 0x982   : > { %v1683_v52 = vadd.f32 1e-05, %v1681_v51 }
 0x983   : > { %v1680_v53 = vpop.xlane.xlu0 %1679 }
 0x984   : > { %2597 = vrsqrt.f32 %v1683_v52  ;;  %v1682_v54 = vmul.f32 0.0078125, %v1680_v53 }
 0x986   : > { %v1684_v55 = vadd.f32 1e-05, %v1682_v54 }
 0x988   : > { %2599 = vrsqrt.f32 %v1684_v55 }
 0x98e   : > { %v2598_v22 = vpop.eup %2597 }
 0x98f   : > { %v1687_v34 = vmul.f32 %v2598_v22, %v2965_v20  ;;  %v2012_v22 = vsub.s32 7, %v2729_v29 }
 0x991   : > { %v1693_v62 = vmul.f32 %v1692_v58, %v1687_v34  ;;  %v2007_v34 = vrot.slane %v2999_v57, %v2006_v56  ;;  %v2013_v59 = vrot.slane %v2999_v57, %v2012_v22 }
 0x992   : > { %v2600_v60 = vpop.eup %2599 }
 0x993   : > { %v1688_v61 = vmul.f32 %v2600_v60, %v2967_v45  ;;  %v1699_v1 = vadd.f32 %v1698_v63, %v1693_v62 }
 0x995   : > { %v1694_v0 = vmul.f32 %v1692_v58, %v1688_v61 }
 0x997   : > { %v1700_v2 = vadd.f32 %v1698_v63, %v1694_v0 }
 0x999   : > { %v1701_v3 = vpack.c.bf16 %v1700_v2, %v1699_v1 }
 0x99b   : > { %1823 = vmatmul.mubr.bf16.vlgmr.msra.gmra.mrb[44].mxu1 %v1701_v3 }
 0xa6e   : > { %v1824_v13 = vpop.f32.mrb[44].mxu1 }
 0xa6f   : > { %v1825_v14 = vadd.f32 %v1824_v13, %v1705_v10  ;;  %v1826_v32 = vpop.f32.mrb[45].mxu1 }
 0xa70   : > { %v1827_v15 = vadd.f32 %v1826_v32, %v1709_v12  ;;  %v1828_v16 = vpop.f32.mrb[46].mxu1 }
 0xa71   : > { %v1829_v17 = vadd.f32 %v1828_v16, %v1705_v10  ;;  %v1830_v20 = vpop.f32.mrb[47].mxu1  ;;  %v1833_v45 = vmax.f32 %v1825_v14, 0.0 }
 0xa72   : > { %v1831_v21 = vadd.f32 %v1830_v20, %v1709_v12  ;;  %v1834_v23 = vmax.f32 %v1827_v15, 0.0 }
 0xa73   : > { %v1835_v18 = vmax.f32 %v1829_v17, 0.0  ;;  %v2219_v17 = vld [vmem:[%s3040_s5] ss:$0 sm:$0xff] (!%p2218_p5) }
 0xa74   : > { %v1836_v25 = vmax.f32 %v1831_v21, 0.0  ;;  %v2220_v21 = vld [vmem:[%s3040_s5 + $0x1] ss:$0 sm:$0xff] (!%p2218_p5) }
 0xa75   : > { %v1837_v26 = vpack.c.bf16 %v1835_v18, %v1833_v45 }
 0xa76   : > { %v1838_v27 = vpack.c.bf16 %v1836_v25, %v1834_v23 }
 0xa78   : > { %1971 = vmatprep.mubr.bf16.mxu0 %v1838_v27 }
 0xa79   : > { %1972 = vmatmul.mubr.bf16.vlgmr.msra.gmra.mrb[32].mxu0 %v1837_v26 }
 0xb4c   : > { %v2304_v30 = vpop.f32.mrb[32].mxu0 }
 0xb4d   : > { %v2305_v33 = vpop.f32.mrb[33].mxu0 }
 0xb4e   : > { %v2306_v35 = vadd.f32 %v2305_v33, %v2304_v30  ;;  %v2307_v36 = vpop.f32.mrb[34].mxu0 }
 0xb4f   : > { %v2308_v37 = vpop.f32.mrb[35].mxu0 }
 0xb50   : > { %v1974_v38 = vadd.f32 %v2306_v35, %v1842_v31  ;;  %v2309_v24 = vadd.f32 %v2308_v37, %v2307_v36 }
 0xb52   : > { %v1977_v39 = vadd.f32 %v2309_v24, %v1842_v31  ;;  %v1980_v40 = vadd.f32 %v1974_v38, %v1699_v1 }
 0xb54   : > { %1982 = vadd.xlane.f32.xlu1 %v1980_v40  ;;  %v1981_v41 = vadd.f32 %v1977_v39, %v1700_v2 }
 0xb56   : > { %1984 = vadd.xlane.f32.xlu0 %v1981_v41 }
 0xbe1   : > { %v1983_v42 = vpop.xlane.xlu1 %1982 }
 0xbe2   : > { %v1986_v43 = vmul.f32 0.0078125, %v1983_v42 }
 0xbe3   : > { %v1985_v5 = vpop.xlane.xlu0 %1984 }
 0xbe4   : > { %v1988_v44 = vsub.f32 %v1980_v40, %v1986_v43  ;;  %v1987_v46 = vmul.f32 0.0078125, %v1985_v5 }
 0xbe6   : > { %v1989_v47 = vsub.f32 %v1981_v41, %v1987_v46  ;;  %v1990_v49 = vmul.f32 %v1988_v44, %v1988_v44 }
 0xbe8   : > { %1992 = vadd.xlane.f32.xlu1 %v1990_v49  ;;  %v1991_v19 = vmul.f32 %v1989_v47, %v1989_v47 }
 0xbea   : > { %1994 = vadd.xlane.f32.xlu0 %v1991_v19 }
 0xc75   : > { %v1993_v50 = vpop.xlane.xlu1 %1992 }
 0xc76   : > { %v1996_v51 = vmul.f32 0.0078125, %v1993_v50 }
 0xc77   : > { %v1995_v52 = vpop.xlane.xlu0 %1994 }
 0xc78   : > { %v1998_v53 = vadd.f32 1e-05, %v1996_v51  ;;  %v1997_v54 = vmul.f32 0.0078125, %v1995_v52 }
 0xc7a   : > { %2601 = vrsqrt.f32 %v1998_v53  ;;  %v1999_v55 = vadd.f32 1e-05, %v1997_v54 }
 0xc7c   : > { %2603 = vrsqrt.f32 %v1999_v55 }
 0xc84   : > { %v2602_v58 = vpop.eup %2601 }
 0xc85   : > { %v2002_v60 = vmul.f32 %v2602_v58, %v1988_v44 }
 0xc86   : > { %v2604_v61 = vpop.eup %2603 }
 0xc87   : > { %v2008_v62 = vmul.f32 %v2007_v34, %v2002_v60  ;;  %v2003_v63 = vmul.f32 %v2604_v61, %v1989_v47  ;;  %2021 = sbr.rel (%p2218_p5) target bundleno = 3535 (0xdcf), region = 52 }
 0xc89   : > { %v2014_v0 = vadd.f32 %v2013_v59, %v2008_v62  ;;  %v2009_v1 = vmul.f32 %v2007_v34, %v2003_v63 }
 0xc8b   : > { %2016 = vst [vmem:[#allocation2] sm:$0xff] %v2014_v0  ;;  %v2015_v2 = vadd.f32 %v2013_v59, %v2009_v1 }
 0xc8d   : > { %2017 = vst [vmem:[#allocation2 + $0x8] sm:$0xff] %v2015_v2 }
 0xc92   : > { %v2022_v3 = vld [vmem:[#allocation2] sm:$0xff] }
 0xc93   : > { %2026 = vadd.xlane.f32.xlu0 %v2022_v3 }
 0xc94   : > { %v2023_v29 = vld [vmem:[#allocation2 + $0x8] sm:$0xff] }
 0xc97   : > { %2028 = vadd.xlane.f32.xlu0 %v2023_v29 }
 0xd20   : > { %v2027_v48 = vpop.xlane.xlu0 %2026 }
 0xd21   : > { %v2030_v4 = vmul.f32 0.0078125, %v2027_v48 }
 0xd23   : > { %v2032_v6 = vsub.f32 %v2022_v3, %v2030_v4 }
 0xd24   : > { %v2029_v57 = vpop.xlane.xlu0 %2028 }
 0xd25   : > { %v2031_v7 = vmul.f32 0.0078125, %v2029_v57  ;;  %v2034_v8 = vmul.f32 %v2032_v6, %v2032_v6 }
 0xd27   : > { %v2033_v9 = vsub.f32 %v2023_v29, %v2031_v7  ;;  %2036 = vadd.xlane.f32.xlu1 %v2034_v8 }
 0xd29   : > { %v2035_v10 = vmul.f32 %v2033_v9, %v2033_v9 }
 0xd2b   : > { %2038 = vadd.xlane.f32.xlu1 %v2035_v10 }
 0xdb4   : > { %v2037_v11 = vpop.xlane.xlu1 %2036 }
 0xdb5   : > { %v2040_v12 = vmul.f32 0.0078125, %v2037_v11 }
 0xdb7   : > { %v2042_v13 = vadd.f32 1e-05, %v2040_v12 }
 0xdb8   : > { %v2039_v14 = vpop.xlane.xlu1 %2038 }
 0xdb9   : > { %2607 = vrsqrt.f32 %v2042_v13  ;;  %v2041_v32 = vmul.f32 0.0078125, %v2039_v14 }
 0xdbb   : > { %v2043_v15 = vadd.f32 1e-05, %v2041_v32 }
 0xdbd   : > { %2609 = vrsqrt.f32 %v2043_v15 }
 0xdc3   : > { %v2608_v16 = vpop.eup %2607 }
 0xdc4   : > { %v2046_v20 = vmul.f32 %v2608_v16, %v2032_v6 }
 0xdc6   : > { %v2052_v45 = vmul.f32 %v2219_v17, %v2046_v20 }
 0xdc7   : > { %v2610_v18 = vpop.eup %2609 }
 0xdc8   : > { %v2058_v23 = vadd.f32 %v2220_v21, %v2052_v45  ;;  %v2047_v25 = vmul.f32 %v2610_v18, %v2033_v9 }
 0xdca   : > { %2060 = vst [vmem:[%s3041_s6] sm:$0xff] %v2058_v23  ;;  %v2053_v26 = vmul.f32 %v2219_v17, %v2047_v25 }
 0xdcc   : > { %v2059_v27 = vadd.f32 %v2220_v21, %v2053_v26 }
 0xdce   : > { %2061 = vst [vmem:[%s3041_s6 + $0x8] sm:$0xff] %v2059_v27 }
 0xdcf PF: > { %s16_s21 = sadd.s32 1, %s2617_s21  }
 0xdd0   : > { %p13_p6 = scmp.ge.s32.totalorder %s16_s21, 4  }
 0xdd2   :  { %15 = sbr.rel (!%p13_p6) target bundleno = 1 (0x1), region = 87 }

// kernel: _lambda_.5
= control target key start
LH: loop header
LB: loop body
LE: loop exit
PB: predicated region body
PF: predicated region fallthrough
CT: control target
= control target key end

     0   :  { %s4525_s30 = smov 0   ;;  %s5224_s0 = inlined_call_operand.vmem [shape: bf16[12,128], index: 0, kind: input, shape index: {}]   ;;  %s5225_s1 = inlined_call_operand.vmem [shape: bf16[16,128], index: 1, kind: input, shape index: {}]   ;;  %s5226_s2 = inlined_call_operand.vmem [shape: f32[2,6], index: 2, kind: input, shape index: {}]   ;;  %s5227_s3 = inlined_call_operand.vmem [shape: bf16[2,128,512], index: 3, kind: input, shape index: {}]   ;;  %s5228_s4 = inlined_call_operand.vmem [shape: bf16[2,128,512], index: 4, kind: input, shape index: {}]   ;;  %s5229_s5 = inlined_call_operand.vmem [shape: bf16[2,128,256], index: 5, kind: input, shape index: {}]   ;;  %s5230_s6 = inlined_call_operand.vmem [shape: bf16[2,256,128], index: 6, kind: input, shape index: {}]   ;;  %s5231_s7 = inlined_call_operand.vmem [shape: f32[2,12,384], index: 7, kind: input, shape index: {}]   ;;  %s5232_s8 = inlined_call_operand.vmem [shape: f32[2,128], index: 8, kind: input, shape index: {}]   ;;  %s5233_s9 = inlined_call_operand.vmem [shape: f32[12,128], index: 9, kind: output, shape index: {}]  }
   0x1 LB: > { %s4531_s10 = sadd.s32 4294967295, %s4467_s30   ;;  %p3632_p0 = scmp.ge.s32.totalorder %s4467_s30, 1  ;;  %s4467_s30 = sphi %s4525_s30, %s19_s30  }
   0x2   : > { %p322_p1 = scmp.lt.s32.totalorder %s4467_s30, 3 }
   0x4   : > { %p323_p2 = pnand %p3632_p0, %p322_p1 }
   0x5   : > { %p373_p3 = scmp.lt.s32.totalorder (!%p323_p2), %s4531_s10, 1  ;;  %p3642_p4 = scmp.ne.s32.totalorder (!%p323_p2), %s4531_s10, 0 }
   0x6   : > { %326 = sbr.rel (%p323_p2) target bundleno = 5802 (0x16aa), region = 56 }
   0xd   : > { %s374_s11 = scalar_select %p373_p3, %s4531_s10, 1 }
   0xe   : > { %402 = sbr.rel (%p3642_p4) target bundleno = 21 (0x15), region = 60  ;;  %v403_v0 = vld [vmem:[%s5224_s0] sm:$0xf] (!%p3642_p4)  ;;  %v404_v1 = vld [vmem:[%s5224_s0 + $0x4] sm:$0x3] (!%p3642_p4) }
   0xf   : > { %s3777_s12 = sshll.u32 %s374_s11, 8  ;;  %s3779_s13 = sshll.u32 %s374_s11, 7  ;;  %v405_v2 = vunpack.c.l.bf16 (!%p3642_p4), %v403_v0  ;;  %v406_v3 = vunpack.c.l.bf16 (!%p3642_p4), %v404_v1 }
  0x10   : > { %s4540_s16 = scalar_lea.vmem %s5227_s3, %s3777_s12  ;;  %s4545_s19 = scalar_lea.vmem %s5228_s4, %s3777_s12 }
  0x11   : > { %s4550_s22 = scalar_lea.vmem %s5229_s5, %s3779_s13  ;;  %s4555_s25 = scalar_lea.vmem %s5230_s6, %s3779_s13  ;;  %407 = vst [vmem:[#allocation2] sm:$0xff] (!%p3642_p4), %v405_v2  ;;  %408 = vst [vmem:[#allocation2 + $0x8] sm:$0xf] (!%p3642_p4), %v406_v3 }
  0x12   : > { %s4223_s26 = smul.u32 48, %s374_s11 }
  0x14   : > { %s4560_s29 = scalar_lea.vmem %s5231_s7, %s4223_s26 }
  0x15 PF: > { %v4238_v4 = vld [vmem:[%s4540_s16 + $0x4] ss:$16 sps:$4 sm:$0xff]   ;;  %v4240_v5 = vld [vmem:[%s4540_s16] ss:$16 sps:$4 sm:$0xff]   ;;  %v4469_v6 = vmov 0   ;;  %v4470_v25 = vmov 0.0   ;;  %v531_v29 = vlaneseq }
  0x16   : > { %703 = vmatprep.mubr.bf16.mxu0 %v4469_v6  ;;  %671 = vmatprep.subr.bf16.mxu0 %v4238_v4  ;;  %v4241_v7 = vld [vmem:[%s4540_s16 + $0x24] ss:$16 sps:$4 sm:$0xff]   ;;  %v4243_v8 = vld [vmem:[%s4540_s16 + $0x20] ss:$16 sps:$4 sm:$0xff]   ;;  %v4262_v24 = vld [vmem:[%s4540_s16 + $0x8] ss:$16 sps:$4 sm:$0xff]  }
  0x17   : > { %672 = vmatpush1.bf16.msra.mxu0 %v4240_v5  ;;  %v4244_v9 = vld [vmem:[%s4540_s16 + $0x44] ss:$16 sps:$4 sm:$0xff]   ;;  %v4246_v10 = vld [vmem:[%s4540_s16 + $0x40] ss:$16 sps:$4 sm:$0xff]   ;;  %3919 = vmatprep.subr.bf16.mxu1 %v4470_v25  ;;  %v4265_v26 = vld [vmem:[%s4540_s16 + $0x28] ss:$16 sps:$4 sm:$0xff]  }
  0x18   : > { %673 = vmatprep.subr.bf16.mxu0 %v4241_v7  ;;  %v4247_v11 = vld [vmem:[%s4540_s16 + $0x64] ss:$16 sps:$4 sm:$0xff]   ;;  %v4249_v12 = vld [vmem:[%s4540_s16 + $0x60] ss:$16 sps:$4 sm:$0xff]   ;;  %v410_v22 = vld [vmem:[#allocation2 + $0x8] sm:$0xf]  ;;  %3920 = vmatpush3.bf16.msra.mxu1 %v4262_v24 }
  0x19   : > { %v4250_v13 = vld [vmem:[%s4540_s16 + $0x84] ss:$16 sps:$4 sm:$0xff]   ;;  %v4252_v14 = vld [vmem:[%s4540_s16 + $0x80] ss:$16 sps:$4 sm:$0xff]   ;;  %3921 = vmatprep.subr.bf16.mxu1 %v4470_v25  ;;  %v4268_v27 = vld [vmem:[%s4540_s16 + $0x48] ss:$16 sps:$4 sm:$0xff]  }
  0x1a   : > { %v4253_v15 = vld [vmem:[%s4540_s16 + $0xa4] ss:$16 sps:$4 sm:$0xff]   ;;  %v4255_v16 = vld [vmem:[%s4540_s16 + $0xa0] ss:$16 sps:$4 sm:$0xff]   ;;  %v4271_v28 = vld [vmem:[%s4540_s16 + $0x68] ss:$16 sps:$4 sm:$0xff]  }
  0x1b   : > { %674 = vmatpush1.bf16.msra.mxu0 %v4243_v8  ;;  %v4256_v17 = vld [vmem:[%s4540_s16 + $0xc4] ss:$16 sps:$4 sm:$0xff]   ;;  %v4258_v18 = vld [vmem:[%s4540_s16 + $0xc0] ss:$16 sps:$4 sm:$0xff]   ;;  %v4597_v30 = vshrl.u32 %v531_v29, 7  ;;  %v527_v34 = vld [vmem:[%s4560_s29 + $0x8] sm:$0xff] }
  0x1c   : > { %675 = vmatprep.subr.bf16.mxu0 %v4244_v9  ;;  %v4259_v19 = vld [vmem:[%s4540_s16 + $0xe4] ss:$16 sps:$4 sm:$0xff]   ;;  %v4261_v20 = vld [vmem:[%s4540_s16 + $0xe0] ss:$16 sps:$4 sm:$0xff]   ;;  %3922 = vmatpush3.bf16.msra.mxu1 %v4265_v26  ;;  %v4274_v31 = vld [vmem:[%s4540_s16 + $0x88] ss:$16 sps:$4 sm:$0xff]  }
  0x1d   : > { %v409_v21 = vld [vmem:[#allocation2] sm:$0xff]  ;;  %3923 = vmatprep.subr.bf16.mxu1 %v4470_v25  ;;  %v4601_v32 = vsub.s32 0, %v4597_v30  ;;  %v4277_v35 = vld [vmem:[%s4540_s16 + $0xa8] ss:$16 sps:$4 sm:$0xff]   ;;  %s4471_s11 = smov 96   ;;  %vm1261_vm0 = vcmask 1041408  }
  0x1e   : > { %v530_v23 = vpack.c.bf16 %v410_v22, %v409_v21  ;;  %v4604_v33 = vld [vmem:[%s4560_s29] sm:$0xff]  ;;  %v4280_v38 = vld [vmem:[%s4540_s16 + $0xc8] ss:$16 sps:$4 sm:$0xff]   ;;  %s4472_s13 = smov 64   ;;  %vm4473_vm1 = vmmov 0   ;;  %s4474_s18 = smov 32  }
  0x1f   : > { %676 = vmatpush1.bf16.msra.mxu0 %v4246_v10  ;;  %v534_v36 = vrot.slane %v4604_v33, %v4601_v32  ;;  %v538_v37 = vrot.slane %v527_v34, %v4601_v32  ;;  %v4283_v48 = vld [vmem:[%s4540_s16 + $0xe8] ss:$16 sps:$4 sm:$0xff]   ;;  %3935 = vmatprep.mubr.msk.bf16.mxu1 %vm4473_vm1, %v4470_v25  ;;  %vm808_vm2 = vcmask 261120   ;;  %vm871_vm3 = vcmask 1042432   ;;  %p3772_p5 = scmp.ne.s32.totalorder %s4531_s10, 1 }
  0x20   : > { %677 = vmatprep.subr.bf16.mxu0 %v4247_v11  ;;  %3924 = vmatpush3.bf16.msra.mxu1 %v4268_v27  ;;  %v758_v34 = vand.u32 127, %v531_v29  ;;  %vm854_vm5 = vcmask 46080   ;;  %vm867_vm6 = vcmask 48128   ;;  %vm915_vm7 = vcmask 259072  }
  0x21   : > { %3925 = vmatprep.subr.bf16.mxu1 %v4470_v25  ;;  %vm1030_vm8 = vcmask 521472   ;;  %vm1143_vm9 = vcmask 783872   ;;  %vm1256_vm10 = vcmask 1046272   ;;  %vm1840_vm11 = vcmask 1043456  }
  0x22   : > { %vm759_vm4 = vcmp.gt.s32.totalorder %v758_v34, %v4597_v30  ;;  %vm2193_vm12 = vcmask 62464   ;;  %vm2206_vm13 = vcmask 64512  }
  0x23   : > { %678 = vmatpush1.bf16.msra.mxu0 %v4249_v12 }
  0x24   : > { %679 = vmatprep.subr.bf16.mxu0 %v4250_v13  ;;  %3926 = vmatpush3.bf16.msra.mxu1 %v4271_v28 }
  0x25   : > { %3927 = vmatprep.subr.bf16.mxu1 %v4470_v25 }
  0x27   : > { %680 = vmatpush1.bf16.msra.mxu0 %v4252_v14 }
  0x28   : > { %681 = vmatprep.subr.bf16.mxu0 %v4253_v15  ;;  %3928 = vmatpush3.bf16.msra.mxu1 %v4274_v31 }
  0x29   : > { %3929 = vmatprep.subr.bf16.mxu1 %v4470_v25 }
  0x2b   : > { %682 = vmatpush1.bf16.msra.mxu0 %v4255_v16 }
  0x2c   : > { %683 = vmatprep.subr.bf16.mxu0 %v4256_v17  ;;  %3930 = vmatpush3.bf16.msra.mxu1 %v4277_v35  ;;  %v4683_v35 = vld [vmem:[%s5226_s2] sm:$0x3] }
  0x2d   : > { %3931 = vmatprep.subr.bf16.mxu1 %v4470_v25 }
  0x2f   : > { %684 = vmatpush1.bf16.msra.mxu0 %v4258_v18  ;;  %v4662_v18 = vld [vmem:[%s4560_s29 + $0x10] sm:$0xff] }
  0x30   : > { %685 = vmatprep.subr.bf16.mxu0 %v4259_v19  ;;  %3932 = vmatpush3.bf16.msra.mxu1 %v4280_v38  ;;  %v542_v19 = vrot.slane %v4662_v18, %v4601_v32 }
  0x31   : > { %3933 = vmatprep.subr.bf16.mxu1 %v4470_v25 }
  0x33   : > { %686 = vmatpush1.bf16.msra.mxu0 %v4261_v20 }
  0x34   : > { %3967 = vmatprep.subr.bf16.mxu0 %v4470_v25  ;;  %3934 = vmatpush3.bf16.msra.mxu1 %v4283_v48 }
  0x35   : > { %3939 = vmatprep.subr.bf16.mxu1 %v4470_v25 }
  0x36   : > { %704 = vmatmul.mubr.bf16.vlgmr.msra.gmra.mrb[0].mxu0 %v530_v23 }
  0x37   : > { %3971 = vmatprep.mubr.msk.bf16.mxu0 %vm4473_vm1, %v4470_v25  ;;  %3936 = vmatmul.mubr.bf16.vlgmr.msra.gmra.mrb[0].mxu1 %v530_v23 }
  0x38   : > { %3943 = vmatprep.mubr.msk.bf16.mxu1 %vm4473_vm1, %v4470_v25 }
 0x109   : > { %v705_v39 = vpop.f32.mrb[0].mxu0 }
 0x10a   : > { %v706_v40 = vadd.f32 %v705_v39, %v534_v36  ;;  %v707_v41 = vpop.f32.mrb[1].mxu0  ;;  %v748_v20 = vpop.f32.mrb[0].mxu1 }
 0x10b   : > { %v708_v42 = vadd.f32 %v707_v41, %v538_v37  ;;  %v709_v43 = vpop.f32.mrb[2].mxu0  ;;  %v4666_v21 = vadd.f32 %v748_v20, %v542_v19  ;;  %v3937_v22 = vpop.f32.mrb[1].mxu1 }
 0x10c   : > { %v761_v44 = vpack.c.bf16 %v706_v40, %v706_v40  ;;  %v710_v45 = vadd.f32 %v709_v43, %v534_v36  ;;  %v711_v46 = vpop.f32.mrb[3].mxu0  ;;  %v751_v23 = vpop.f32.mrb[2].mxu1  ;;  %v806_v36 = vrot.slane %v4683_v35, %v4601_v32 }
 0x10d   : > { %v712_v47 = vadd.f32 %v711_v46, %v538_v37  ;;  %762 = vxpose.xlu0.b32.start.end [1/1] (short) %v708_v42, 128  ;;  %v1262_v50 = vrot.slane %v708_v42, 6  ;;  %v4670_v24 = vpack.c.bf16 %v4666_v21, %v4666_v21  ;;  %v4672_v26 = vadd.f32 %v751_v23, %v542_v19  ;;  %v3938_v27 = vpop.f32.mrb[3].mxu1 }
 0x10e   : > { %v1258_v49 = vpack.c.bf16 %v710_v45, %v706_v40  ;;  %918 = vrot.lane.b32.xlu1 %v761_v44, %s4471_s11  ;;  %v4689_v37 = vsel %vm759_vm4, -1e+09, %v4470_v25 }
 0x10f   : > { %v1263_v51 = vrot.slane %v712_v47, 6  ;;  %v1306_v28 = vpack.c.bf16 %v4672_v26, %v4666_v21  ;;  %v873_v31 = vsel %vm871_vm3, %v4670_v24, 0  ;;  %v4692_v38 = vadd.f32 %v806_v36, %v4689_v37 }
 0x110   : > { %v4628_v53 = vrot.slane %v1258_v49, 3 }
 0x111   : > { %v4618_v52 = vsel %vm1261_vm0, %v1262_v50, %v1263_v51 }
 0x112   : > { %1032 = vrot.lane.b32.xlu1 %v761_v44, %s4472_s13 }
 0x116   : > { %1145 = vrot.lane.b32.xlu1 %v761_v44, %s4474_s18 }
 0x11a   : > { %1420 = vrot.lane.b32.xlu1 %v4628_v53, %s4471_s11 }
 0x180   : > { %v4650_v7 = vpop.permute.xlu1 %918 }
 0x184   : > { %v1033_v11 = vpop.permute.xlu1 %1032 }
 0x188   : > { %v1146_v17 = vpop.permute.xlu1 %1145 }
 0x18d   : > { %v778_v54 = vpop.trf.xlu0 }
 0x191   : > { %v779_v55 = vpop.trf.xlu0 }
 0x192   : > { %v794_v56 = vpack.c.bf16 %v779_v55, %v778_v54 }
 0x194   : > { %3940 = vmatpush3.bf16.msra.mxu1 %v794_v56 }
 0x195   : > { %v780_v57 = vpop.trf.xlu0  ;;  %3941 = vmatprep.subr.bf16.mxu1 %v4470_v25 }
 0x199   : > { %v781_v58 = vpop.trf.xlu0 }
 0x19a   : > { %v795_v59 = vpack.c.bf16 %v781_v58, %v780_v57 }
 0x19c   : > { %3942 = vmatpush3.bf16.msra.mxu1 %v795_v59 }
 0x19d   : > { %v4633_v60 = vpop.trf.xlu0  ;;  %3947 = vmatprep.subr.bf16.mxu1 %v4470_v25 }
 0x19f   : > { %3944 = vmatmul.mubr.msk.bf16.vlgmr.msra.gmra.mrb[4].mxu1 %vm808_vm2, %v761_v44 }
 0x1a0   : > { %3949 = vmatprep.mubr.msk.bf16.mxu1 %vm4473_vm1, %v4470_v25  ;;  %3948 = vmatpush3.bf16.msra.mxu1 %v873_v31 }
 0x1a1   : > { %v4639_v61 = vpop.trf.xlu0  ;;  %3953 = vmatprep.subr.bf16.mxu1 %v4470_v25 }
 0x1a2   : > { %v796_v62 = vpack.c.bf16 %v4639_v61, %v4633_v60 }
 0x1a5   : > { %v4643_v63 = vpop.trf.xlu0 }
 0x1a9   : > { %v4645_v0 = vpop.trf.xlu0 }
 0x1aa   : > { %v797_v1 = vpack.c.bf16 %v4645_v0, %v4643_v63 }
 0x1ad   : > { %v786_v2 = vpop.trf.xlu0 }
 0x1b1   : > { %v787_v3 = vpop.trf.xlu0 }
 0x1b2   : > { %v798_v4 = vpack.c.bf16 %v787_v3, %v786_v2  ;;  %v1421_v2 = vpop.permute.xlu1 %1420 }
 0x1b4   : > { %3968 = vmatpush3.bf16.msra.mxu0 %v798_v4 }
 0x1b5   : > { %v788_v5 = vpop.trf.xlu0  ;;  %3969 = vmatprep.subr.bf16.mxu0 %v4470_v25 }
 0x1b9   : > { %v789_v8 = vpop.trf.xlu0 }
 0x1ba   : > { %v799_v9 = vpack.c.bf16 %v789_v8, %v788_v5 }
 0x1bc   : > { %3970 = vmatpush3.bf16.msra.mxu0 %v799_v9 }
 0x1bd   : > { %v790_v10 = vpop.trf.xlu0  ;;  %3981 = vmatprep.subr.bf16.mxu0 %v4470_v25 }
 0x1bf   : > { %3972 = vmatmul.mubr.msk.bf16.vlgmr.msra.gmra.mrb[4].mxu0 %vm808_vm2, %v1033_v11 }
 0x1c0   : > { %3985 = vmatprep.mubr.msk.bf16.mxu0 %vm4473_vm1, %v4470_v25 }
 0x1c1   : > { %v791_v12 = vpop.trf.xlu0 }
 0x1c2   : > { %v800_v13 = vpack.c.bf16 %v791_v12, %v790_v10 }
 0x1c4   : > { %3982 = vmatpush3.bf16.msra.mxu0 %v800_v13 }
 0x1c5   : > { %v792_v14 = vpop.trf.xlu0  ;;  %3983 = vmatprep.subr.bf16.mxu0 %v4470_v25 }
 0x1c9   : > { %v793_v15 = vpop.trf.xlu0 }
 0x1ca   : > { %v801_v16 = vpack.c.bf16 %v793_v15, %v792_v14 }
 0x1cc   : > { %3984 = vmatpush3.bf16.msra.mxu0 %v801_v16 }
 0x1cd   : > { %3995 = vmatprep.subr.bf16.mxu0 %v4470_v25 }
 0x1cf   : > { %3986 = vmatmul.mubr.msk.bf16.vlgmr.msra.gmra.mrb[8].mxu0 %vm808_vm2, %v1146_v17 }
 0x1d0   : > { %3999 = vmatprep.mubr.msk.bf16.mxu0 %vm4473_vm1, %v4470_v25 }
 0x272   : > { %v846_v39 = vpop.f32.mrb[4].mxu1 }
 0x273   : > { %v852_v40 = vmul.f32 0.17677669, %v846_v39  ;;  %v3945_v41 = vpop.f32.mrb[5].mxu1 }
 0x274   : > { %v849_v29 = vpop.f32.mrb[6].mxu1  ;;  %v4264_v41 = vld [vmem:[%s4540_s16 + $0xc] ss:$16 sps:$4 sm:$0xff]  }
 0x275   : > { %v3946_v42 = vpop.f32.mrb[7].mxu1  ;;  %v853_v43 = vadd.f32 %v852_v40, %v4692_v38 }
 0x276   : > { %v4267_v42 = vld [vmem:[%s4540_s16 + $0x2c] ss:$16 sps:$4 sm:$0xff]  }
 0x277   : > { %v855_v44 = vsel %vm854_vm5, %v853_v43, -inf }
 0x278   : > { %856 = vmax.xlane.f32.xlu0 %v855_v44  ;;  %v4273_v44 = vld [vmem:[%s4540_s16 + $0x6c] ss:$16 sps:$4 sm:$0xff]  }
 0x28e   : > { %1644 = vrot.lane.b32.xlu0 %v4628_v53, %s4474_s18 }
 0x292   : > { %v4698_v45 = vpop.f32.mrb[4].mxu0 }
 0x293   : > { %v3973_v46 = vpop.f32.mrb[5].mxu0 }
 0x294   : > { %v1074_v47 = vpop.f32.mrb[6].mxu0  ;;  %v4276_v46 = vld [vmem:[%s4540_s16 + $0x8c] ss:$16 sps:$4 sm:$0xff]  }
 0x295   : > { %v3974_v48 = vpop.f32.mrb[7].mxu0  ;;  %v4279_v47 = vld [vmem:[%s4540_s16 + $0xac] ss:$16 sps:$4 sm:$0xff]  }
 0x296   : > { %v4282_v48 = vld [vmem:[%s4540_s16 + $0xcc] ss:$16 sps:$4 sm:$0xff]  }
 0x2a2   : > { %v1184_v49 = vpop.f32.mrb[8].mxu0 }
 0x2a3   : > { %v3987_v50 = vpop.f32.mrb[9].mxu0 }
 0x2a4   : > { %v1187_v51 = vpop.f32.mrb[10].mxu0 }
 0x2a5   : > { %v3988_v54 = vpop.f32.mrb[11].mxu0 }
 0x305   : > { %v857_v55 = vpop.xlane.xlu0 %856 }
 0x306   : > { %v858_v56 = vsub.f32 %v853_v43, %v857_v55  ;;  %v4270_v43 = vld [vmem:[%s4540_s16 + $0x4c] ss:$16 sps:$4 sm:$0xff]  }
 0x308   : > { %v859_v57 = vmul.f32 1.442695, %v858_v56 }
 0x309   : > { %v1645_v29 = vpop.permute.xlu0 %1644 }
 0x30a   : > { %4375 = vpow2.f32 %v859_v57  ;;  %v1077_v57 = vmul.f32 0.17677669, %v4698_v45 }
 0x314   : > { %v4376_v58 = vpop.eup %4375 }
 0x315   : > { %v861_v59 = vsel %vm854_vm5, %v4376_v58, 0.0 }
 0x316   : > { %862 = vadd.xlane.f32.xlu1 %v861_v59 }
 0x349   : > { %1266 = vxpose.xlu1.b32.start.end [1/1] (short) %v4618_v52, 128  ;;  %v1190_v52 = vmul.f32 0.17677669, %v1184_v49  ;;  %v4285_v49 = vld [vmem:[%s4540_s16 + $0xec] ss:$16 sps:$4 sm:$0xff]  }
 0x34b   : > { %v4720_v60 = vadd.f32 %v1190_v52, %v4692_v38 }
 0x34d   : > { %v1192_v61 = vsel %vm854_vm5, %v4720_v60, -inf }
 0x3a3   : > { %1532 = vrot.lane.b32.xlu1 %v4628_v53, %s4472_s13  ;;  %v863_v3 = vpop.xlane.xlu1 %862 }
 0x3a4   : > { %4377 = vrcp.f32 %v863_v3 }
 0x3ae   : > { %v4378_v4 = vpop.eup %4377 }
 0x3af   : > { %v865_v5 = vmul.f32 %v4378_v4, %v4376_v58 }
 0x3b1   : > { %v866_v8 = vpack.c.bf16 %v865_v5, %v865_v5 }
 0x3b3   : > { %3950 = vmatmul.mubr.msk.bf16.vlgmr.msra.gmra.mrb[8].mxu1 %vm867_vm6, %v866_v8  ;;  %v1078_v8 = vadd.f32 %v1077_v57, %v4692_v38 }
 0x3b4   : > { %3954 = vmatpush3.bf16.msra.mxu1 %v796_v62  ;;  %3957 = vmatprep.mubr.msk.bf16.mxu1 %vm4473_vm1, %v4470_v25 }
 0x3b5   : > { %3955 = vmatprep.subr.bf16.mxu1 %v4470_v25  ;;  %v1079_v52 = vsel %vm854_vm5, %v1078_v8, -inf }
 0x3b8   : > { %3956 = vmatpush3.bf16.msra.mxu1 %v797_v1 }
 0x3b9   : > { %3961 = vmatprep.subr.bf16.mxu1 %v4470_v25 }
 0x3bb   : > { %3958 = vmatmul.mubr.msk.bf16.vlgmr.msra.gmra.mrb[12].mxu1 %vm808_vm2, %v4650_v7 }
 0x3bc   : > { %3963 = vmatprep.mubr.msk.bf16.mxu1 %vm4473_vm1, %v4470_v25 }
 0x3c7   : > { %1193 = vmax.xlane.f32.xlu1 %v1192_v61  ;;  %v4767_v61 = vsub.s32 1, %v4597_v30 }
 0x3c9   : > { %v1282_v62 = vpop.trf.xlu1  ;;  %v1310_v45 = vrot.slane %v4683_v35, %v4767_v61 }
 0x3cd   : > { %v1283_v9 = vpop.trf.xlu1 }
 0x3ce   : > { %v1298_v63 = vpack.c.bf16 %v1283_v9, %v1282_v62  ;;  %v1311_v62 = vadd.f32 %v1310_v45, %v4689_v37 }
 0x3d0   : > { %3996 = vmatpush3.bf16.msra.mxu0 %v1298_v63 }
 0x3d1   : > { %v1284_v0 = vpop.trf.xlu1  ;;  %3997 = vmatprep.subr.bf16.mxu0 %v4470_v25 }
 0x3d5   : > { %v1285_v1 = vpop.trf.xlu1 }
 0x3d6   : > { %v1299_v7 = vpack.c.bf16 %v1285_v1, %v1284_v0 }
 0x3d8   : > { %3998 = vmatpush3.bf16.msra.mxu0 %v1299_v7 }
 0x3d9   : > { %v1286_v10 = vpop.trf.xlu1  ;;  %4009 = vmatprep.subr.bf16.mxu0 %v4470_v25 }
 0x3db   : > { %4000 = vmatmul.mubr.msk.bf16.vlgmr.msra.gmra.mrb[12].mxu0 %vm808_vm2, %v4628_v53 }
 0x3dc   : > { %4013 = vmatprep.mubr.msk.bf16.mxu0 %vm4473_vm1, %v4470_v25 }
 0x3dd   : > { %v1287_v11 = vpop.trf.xlu1 }
 0x3de   : > { %v1300_v12 = vpack.c.bf16 %v1287_v11, %v1286_v10 }
 0x3e0   : > { %4010 = vmatpush3.bf16.msra.mxu0 %v1300_v12 }
 0x3e1   : > { %v1288_v13 = vpop.trf.xlu1  ;;  %4011 = vmatprep.subr.bf16.mxu0 %v4470_v25 }
 0x3e5   : > { %v1289_v14 = vpop.trf.xlu1 }
 0x3e6   : > { %v1301_v15 = vpack.c.bf16 %v1289_v14, %v1288_v13 }
 0x3e8   : > { %4012 = vmatpush3.bf16.msra.mxu0 %v1301_v15 }
 0x3e9   : > { %v1290_v16 = vpop.trf.xlu1  ;;  %4023 = vmatprep.subr.bf16.mxu0 %v4470_v25 }
 0x3eb   : > { %4014 = vmatmul.mubr.msk.bf16.vlgmr.msra.gmra.mrb[16].mxu0 %vm808_vm2, %v1421_v2 }
 0x3ec   : > { %4027 = vmatprep.mubr.msk.bf16.mxu0 %vm4473_vm1, %v4470_v25 }
 0x3ed   : > { %v1291_v53 = vpop.trf.xlu1 }
 0x3ee   : > { %v1302_v17 = vpack.c.bf16 %v1291_v53, %v1290_v16 }
 0x3f0   : > { %4024 = vmatpush3.bf16.msra.mxu0 %v1302_v17 }
 0x3f1   : > { %v1292_v19 = vpop.trf.xlu1  ;;  %4025 = vmatprep.subr.bf16.mxu0 %v4470_v25 }
 0x3f5   : > { %v1293_v20 = vpop.trf.xlu1 }
 0x3f6   : > { %v1303_v22 = vpack.c.bf16 %v1293_v20, %v1292_v19 }
 0x3f8   : > { %4026 = vmatpush3.bf16.msra.mxu0 %v1303_v22 }
 0x3f9   : > { %4037 = vmatprep.subr.bf16.mxu0 %v4470_v25  ;;  %v1294_v23 = vpop.trf.xlu1 }
 0x3fd   : > { %v1295_v27 = vpop.trf.xlu1 }
 0x3fe   : > { %v1304_v36 = vpack.c.bf16 %v1295_v27, %v1294_v23 }
 0x401   : > { %v1296_v31 = vpop.trf.xlu1 }
 0x405   : > { %v1297_v34 = vpop.trf.xlu1 }
 0x406   : > { %v1305_v40 = vpack.c.bf16 %v1297_v34, %v1296_v31 }
 0x415   : > { %v1533_v39 = vpop.permute.xlu1 %1532 }
 0x416   : > { %4028 = vmatmul.mubr.msk.bf16.vlgmr.msra.gmra.mrb[20].mxu0 %vm808_vm2, %v1533_v39 }
 0x417   : > { %4038 = vmatpush3.bf16.msra.mxu0 %v1304_v36  ;;  %4041 = vmatprep.mubr.msk.bf16.mxu0 %vm4473_vm1, %v4470_v25 }
 0x418   : > { %4039 = vmatprep.subr.bf16.mxu0 %v4470_v25 }
 0x41b   : > { %4040 = vmatpush3.bf16.msra.mxu0 %v1305_v40 }
 0x41c   : > { %4051 = vmatprep.subr.bf16.mxu0 %v4470_v25 }
 0x41e   : > { %4042 = vmatmul.mubr.msk.bf16.vlgmr.msra.gmra.mrb[24].mxu0 %vm808_vm2, %v1645_v29 }
 0x41f   : > { %4052 = vmatpush3.bf16.msra.mxu0 %v4264_v41  ;;  %4067 = vmatprep.mubr.msk.bf16.mxu0 %vm4473_vm1, %v4470_v25 }
 0x420   : > { %4053 = vmatprep.subr.bf16.mxu0 %v4470_v25 }
 0x423   : > { %4054 = vmatpush3.bf16.msra.mxu0 %v4267_v42 }
 0x424   : > { %4055 = vmatprep.subr.bf16.mxu0 %v4470_v25 }
 0x427   : > { %4056 = vmatpush3.bf16.msra.mxu0 %v4270_v43 }
 0x428   : > { %4057 = vmatprep.subr.bf16.mxu0 %v4470_v25 }
 0x42b   : > { %4058 = vmatpush3.bf16.msra.mxu0 %v4273_v44 }
 0x42c   : > { %4059 = vmatprep.subr.bf16.mxu0 %v4470_v25 }
 0x42f   : > { %4060 = vmatpush3.bf16.msra.mxu0 %v4276_v46 }
 0x430   : > { %4061 = vmatprep.subr.bf16.mxu0 %v4470_v25 }
 0x433   : > { %4062 = vmatpush3.bf16.msra.mxu0 %v4279_v47 }
 0x434   : > { %4063 = vmatprep.subr.bf16.mxu0 %v4470_v25 }
 0x437   : > { %4064 = vmatpush3.bf16.msra.mxu0 %v4282_v48 }
 0x438   : > { %4065 = vmatprep.subr.bf16.mxu0 %v4470_v25 }
 0x43b   : > { %4066 = vmatpush3.bf16.msra.mxu0 %v4285_v49 }
 0x454   : > { %v1194_v29 = vpop.xlane.xlu1 %1193 }
 0x455   : > { %v1195_v43 = vsub.f32 %v4720_v60, %v1194_v29 }
 0x457   : > { %v1196_v47 = vmul.f32 1.442695, %v1195_v43 }
 0x486   : > { %v909_v50 = vpop.f32.mrb[8].mxu1 }
 0x487   : > { %916 = vst.msk [vmem:[#allocation3] sm:$0x3f] %vm915_vm7, %v909_v50  ;;  %v3951_v51 = vpop.f32.mrb[9].mxu1 }
 0x488   : > { %v912_v54 = vpop.f32.mrb[10].mxu1 }
 0x489   : > { %v3952_v55 = vpop.f32.mrb[11].mxu1 }
 0x48e   : > { %v957_v56 = vpop.f32.mrb[12].mxu1 }
 0x48f   : > { %v963_v58 = vmul.f32 0.17677669, %v957_v56  ;;  %v3959_v59 = vpop.f32.mrb[13].mxu1 }
 0x490   : > { %v960_v2 = vpop.f32.mrb[14].mxu1 }
 0x491   : > { %v3960_v3 = vpop.f32.mrb[15].mxu1  ;;  %v964_v4 = vadd.f32 %v963_v58, %v4692_v38 }
 0x493   : > { %v965_v5 = vsel %vm854_vm5, %v964_v4, -inf }
 0x494   : > { %966 = vmax.xlane.f32.xlu0 %v965_v5 }
 0x498   : > { %1080 = vmax.xlane.f32.xlu0 %v1079_v52 }
 0x4ae   : > { %v1351_v9 = vpop.f32.mrb[12].mxu0 }
 0x4af   : > { %v1357_v63 = vmul.f32 0.17677669, %v1351_v9  ;;  %v4001_v0 = vpop.f32.mrb[13].mxu0 }
 0x4b0   : > { %v1354_v1 = vpop.f32.mrb[14].mxu0 }
 0x4b1   : > { %v4002_v7 = vpop.f32.mrb[15].mxu0  ;;  %v1358_v10 = vadd.f32 %v1357_v63, %v1311_v62 }
 0x4b3   : > { %v1359_v38 = vsel %vm854_vm5, %v1358_v10, -inf }
 0x4b4   : > { %1360 = vmax.xlane.f32.xlu0 %v1359_v38 }
 0x4be   : > { %v1459_v11 = vpop.f32.mrb[16].mxu0 }
 0x4bf   : > { %v1465_v12 = vmul.f32 0.17677669, %v1459_v11  ;;  %v4015_v13 = vpop.f32.mrb[17].mxu0 }
 0x4c0   : > { %v1462_v14 = vpop.f32.mrb[18].mxu0 }
 0x4c1   : > { %v4016_v15 = vpop.f32.mrb[19].mxu0  ;;  %v1466_v16 = vadd.f32 %v1465_v12, %v1311_v62 }
 0x4c3   : > { %v1467_v53 = vsel %vm854_vm5, %v1466_v16, -inf }
 0x4c4   : > { %1468 = vmax.xlane.f32.xlu0 %v1467_v53 }
 0x4e9   : > { %v1571_v35 = vpop.f32.mrb[20].mxu0 }
 0x4ea   : > { %v1577_v37 = vmul.f32 0.17677669, %v1571_v35  ;;  %v4029_v17 = vpop.f32.mrb[21].mxu0 }
 0x4eb   : > { %v1574_v19 = vpop.f32.mrb[22].mxu0 }
 0x4ec   : > { %v4030_v20 = vpop.f32.mrb[23].mxu0  ;;  %v1578_v22 = vadd.f32 %v1577_v37, %v1311_v62 }
 0x4ee   : > { %v1579_v23 = vsel %vm854_vm5, %v1578_v22, -inf }
 0x4ef   : > { %1580 = vmax.xlane.f32.xlu0 %v1579_v23 }
 0x4f1   : > { %v1683_v27 = vpop.f32.mrb[24].mxu0 }
 0x4f2   : > { %v1689_v31 = vmul.f32 0.17677669, %v1683_v27  ;;  %v4043_v34 = vpop.f32.mrb[25].mxu0 }
 0x4f3   : > { %v1686_v36 = vpop.f32.mrb[26].mxu0 }
 0x4f4   : > { %v4044_v39 = vpop.f32.mrb[27].mxu0  ;;  %v1690_v40 = vadd.f32 %v1689_v31, %v1311_v62 }
 0x4f6   : > { %v1691_v41 = vsel %vm854_vm5, %v1690_v40, -inf }
 0x4f7   : > { %1692 = vmax.xlane.f32.xlu0 %v1691_v41 }
 0x521   : > { %v967_v42 = vpop.xlane.xlu0 %966 }
 0x522   : > { %v968_v55 = vsub.f32 %v964_v4, %v967_v42 }
 0x524   : > { %v969_v57 = vmul.f32 1.442695, %v968_v55 }
 0x525   : > { %v1081_v44 = vpop.xlane.xlu0 %1080 }
 0x526   : > { %v1082_v46 = vsub.f32 %v1078_v8, %v1081_v44 }
 0x528   : > { %v1083_v48 = vmul.f32 1.442695, %v1082_v46 }
 0x52a   : > { %4379 = vpow2.f32 %v1083_v48 }
 0x52b   : > { %4381 = vpow2.f32 %v1196_v47 }
 0x534   : > { %v4777_v49 = vpop.eup %4379 }
 0x535   : > { %v1085_v50 = vsel %vm854_vm5, %v4777_v49, 0.0  ;;  %v4781_v51 = vpop.eup %4381 }
 0x536   : > { %1086 = vadd.xlane.f32.xlu0 %v1085_v50  ;;  %v1198_v54 = vsel %vm854_vm5, %v4781_v51, 0.0 }
 0x53a   : > { %1199 = vadd.xlane.f32.xlu0 %v1198_v54 }
 0x541   : > { %v1361_v60 = vpop.xlane.xlu0 %1360 }
 0x542   : > { %v1362_v56 = vsub.f32 %v1358_v10, %v1361_v60 }
 0x544   : > { %v1363_v58 = vmul.f32 1.442695, %v1362_v56 }
 0x546   : > { %4383 = vpow2.f32 %v1363_v58 }
 0x547   : > { %4385 = vpow2.f32 %v969_v57 }
 0x550   : > { %v4785_v59 = vpop.eup %4383 }
 0x551   : > { %v1469_v2 = vpop.xlane.xlu0 %1468  ;;  %v1365_v3 = vsel %vm854_vm5, %v4785_v59, 0.0  ;;  %v4386_v5 = vpop.eup %4385 }
 0x552   : > { %v1470_v8 = vsub.f32 %v1466_v16, %v1469_v2  ;;  %1366 = vadd.xlane.f32.xlu0 %v1365_v3  ;;  %v971_v45 = vsel %vm854_vm5, %v4386_v5, 0.0 }
 0x554   : > { %v1471_v52 = vmul.f32 1.442695, %v1470_v8 }
 0x556   : > { %4387 = vpow2.f32 %v1471_v52  ;;  %972 = vadd.xlane.f32.xlu0 %v971_v45 }
 0x560   : > { %v4790_v4 = vpop.eup %4387 }
 0x561   : > { %v1473_v62 = vsel %vm854_vm5, %v4790_v4, 0.0 }
 0x562   : > { %1474 = vadd.xlane.f32.xlu1 %v1473_v62 }
 0x56c   : > { %978 = vrot.lane.b32.xlu0 %v4670_v24, %s4471_s11 }
 0x573   : > { %1091 = vrot.lane.b32.xlu1 %v4670_v24, %s4472_s13 }
 0x577   : > { %1204 = vrot.lane.b32.xlu1 %v4670_v24, %s4474_s18  ;;  %v1372_v24 = vrot.slane %v1306_v28, 3 }
 0x579   : > { %v1377_v29 = vsel %vm871_vm3, %v1372_v24, 0 }
 0x57c   : > { %v1581_v9 = vpop.xlane.xlu0 %1580 }
 0x57d   : > { %v1582_v63 = vsub.f32 %v1578_v22, %v1581_v9 }
 0x57f   : > { %v1583_v0 = vmul.f32 1.442695, %v1582_v63 }
 0x581   : > { %4389 = vpow2.f32 %v1583_v0 }
 0x584   : > { %v1693_v1 = vpop.xlane.xlu0 %1692 }
 0x585   : > { %v1694_v7 = vsub.f32 %v1690_v40, %v1693_v1 }
 0x587   : > { %v1695_v10 = vmul.f32 1.442695, %v1694_v7 }
 0x589   : > { %4391 = vpow2.f32 %v1695_v10 }
 0x58b   : > { %v4800_v38 = vpop.eup %4389 }
 0x58c   : > { %v1585_v11 = vsel %vm854_vm5, %v4800_v38, 0.0 }
 0x58d   : > { %1586 = vadd.xlane.f32.xlu0 %v1585_v11 }
 0x593   : > { %v4804_v12 = vpop.eup %4391 }
 0x594   : > { %v1697_v13 = vsel %vm854_vm5, %v4804_v12, 0.0 }
 0x59b   : > { %1698 = vadd.xlane.f32.xlu1 %v1697_v13 }
 0x5a3   : > { %1479 = vrot.lane.b32.xlu0 %v1372_v24, %s4471_s11 }
 0x5a7   : > { %1703 = vrot.lane.b32.xlu0 %v1372_v24, %s4474_s18 }
 0x5ac   : > { %1591 = vrot.lane.b32.xlu1 %v1372_v24, %s4472_s13 }
 0x5c3   : > { %v1087_v14 = vpop.xlane.xlu0 %1086 }
 0x5c7   : > { %v1200_v15 = vpop.xlane.xlu0 %1199 }
 0x5df   : > { %v1367_v16 = vpop.xlane.xlu0 %1366 }
 0x5e3   : > { %v973_v53 = vpop.xlane.xlu0 %972 }
 0x5e4   : > { %4393 = vrcp.f32 %v973_v53 }
 0x5e5   : > { %4395 = vrcp.f32 %v1087_v14 }
 0x5e6   : > { %4397 = vrcp.f32 %v1200_v15 }
 0x5e7   : > { %v979_v35 = vpop.permute.xlu0 %978  ;;  %4399 = vrcp.f32 %v1367_v16 }
 0x5e8   : > { %v984_v37 = vsel %vm871_vm3, %v979_v35, 0 }
 0x5e9   : > { %3962 = vmatpush3.bf16.msra.mxu1 %v984_v37 }
 0x5ea   : > { %3975 = vmatprep.subr.bf16.mxu1 %v4470_v25 }
 0x5ee   : > { %v4394_v21 = vpop.eup %4393 }
 0x5ef   : > { %v975_v26 = vmul.f32 %v4394_v21, %v4386_v5  ;;  %v1475_v28 = vpop.xlane.xlu1 %1474  ;;  %v4396_v19 = vpop.eup %4395 }
 0x5f0   : > { %v1089_v23 = vmul.f32 %v4396_v19, %v4777_v49  ;;  %v4398_v34 = vpop.eup %4397  ;;  %4401 = vrcp.f32 %v1475_v28 }
 0x5f1   : > { %v976_v17 = vpack.c.bf16 %v975_v26, %v975_v26  ;;  %v1202_v39 = vmul.f32 %v4398_v34, %v4781_v51  ;;  %v4400_v41 = vpop.eup %4399 }
 0x5f2   : > { %v1090_v31 = vpack.c.bf16 %v1089_v23, %v1089_v23  ;;  %v1369_v42 = vmul.f32 %v4400_v41, %v4785_v59 }
 0x5f3   : > { %v1092_v20 = vpop.permute.xlu1 %1091  ;;  %3964 = vmatmul.mubr.msk.bf16.vlgmr.msra.gmra.mrb[16].mxu1 %vm867_vm6, %v976_v17  ;;  %v1203_v40 = vpack.c.bf16 %v1202_v39, %v1202_v39 }
 0x5f4   : > { %v1097_v22 = vsel %vm871_vm3, %v1092_v20, 0  ;;  %3977 = vmatprep.mubr.msk.bf16.mxu1 %vm4473_vm1, %v4470_v25  ;;  %v1370_v43 = vpack.c.bf16 %v1369_v42, %v1369_v42  ;;  %v4289_v42 = vld [vmem:[%s4545_s19 + $0x4] ss:$16 sps:$4 sm:$0xff]  }
 0x5f5   : > { %3976 = vmatpush3.bf16.msra.mxu1 %v1097_v22 }
 0x5f6   : > { %3989 = vmatprep.subr.bf16.mxu1 %v4470_v25 }
 0x5f7   : > { %v1205_v27 = vpop.permute.xlu1 %1204 }
 0x5f8   : > { %v1210_v36 = vsel %vm871_vm3, %v1205_v27, 0 }
 0x5fa   : > { %v4402_v44 = vpop.eup %4401 }
 0x5fb   : > { %3978 = vmatmul.mubr.msk.bf16.vlgmr.msra.gmra.mrb[20].mxu1 %vm867_vm6, %v1090_v31  ;;  %v1477_v47 = vmul.f32 %v4402_v44, %v4790_v4  ;;  %v1762_v44 = vrot.slane %v4604_v33, %v4767_v61 }
 0x5fc   : > { %3990 = vmatpush3.bf16.msra.mxu1 %v1210_v36  ;;  %3991 = vmatprep.mubr.msk.bf16.mxu1 %vm4473_vm1, %v4470_v25 }
 0x5fd   : > { %4003 = vmatprep.subr.bf16.mxu1 %v4470_v25  ;;  %v1478_v50 = vpack.c.bf16 %v1477_v47, %v1477_v47 }
 0x603   : > { %3992 = vmatmul.mubr.msk.bf16.vlgmr.msra.gmra.mrb[24].mxu1 %vm867_vm6, %v1203_v40 }
 0x604   : > { %4004 = vmatpush3.bf16.msra.mxu1 %v1377_v29  ;;  %4005 = vmatprep.mubr.msk.bf16.mxu1 %vm4473_vm1, %v4470_v25  ;;  %v4286_v29 = vld [vmem:[%s4545_s19 + $0x8] ss:$16 sps:$4 sm:$0xff]  }
 0x605   : > { %4017 = vmatprep.subr.bf16.mxu1 %v4470_v25  ;;  %2064 = vmatprep.subr.bf16.mxu0 %v4286_v29 }
 0x60b   : > { %4006 = vmatmul.mubr.msk.bf16.vlgmr.msra.gmra.mrb[28].mxu1 %vm867_vm6, %v1370_v43  ;;  %v4291_v43 = vld [vmem:[%s4545_s19 + $0x28] ss:$16 sps:$4 sm:$0xff]  }
 0x60c   : > { %4019 = vmatprep.mubr.msk.bf16.mxu1 %vm4473_vm1, %v4470_v25 }
 0x61a   : > { %v1587_v46 = vpop.xlane.xlu0 %1586 }
 0x61b   : > { %4403 = vrcp.f32 %v1587_v46 }
 0x61e   : > { %v1480_v48 = vpop.permute.xlu0 %1479 }
 0x61f   : > { %v1485_v49 = vsel %vm871_vm3, %v1480_v48, 0 }
 0x620   : > { %4018 = vmatpush3.bf16.msra.mxu1 %v1485_v49 }
 0x621   : > { %4031 = vmatprep.subr.bf16.mxu1 %v4470_v25 }
 0x622   : > { %v1704_v57 = vpop.permute.xlu0 %1703 }
 0x623   : > { %4020 = vmatmul.mubr.msk.bf16.vlgmr.msra.gmra.mrb[32].mxu1 %vm867_vm6, %v1478_v50  ;;  %v1709_v59 = vsel %vm871_vm3, %v1704_v57, 0  ;;  %v4294_v57 = vld [vmem:[%s4545_s19 + $0x24] ss:$16 sps:$4 sm:$0xff]  }
 0x624   : > { %4033 = vmatprep.mubr.msk.bf16.mxu1 %vm4473_vm1, %v4470_v25 }
 0x625   : > { %v4404_v51 = vpop.eup %4403 }
 0x626   : > { %v1589_v55 = vmul.f32 %v4404_v51, %v4800_v38 }
 0x628   : > { %v1699_v54 = vpop.xlane.xlu1 %1698  ;;  %v1590_v58 = vpack.c.bf16 %v1589_v55, %v1589_v55 }
 0x629   : > { %4405 = vrcp.f32 %v1699_v54  ;;  %v4451_v54 = vld [vmem:[#allocation2] sm:$0xff] }
 0x62c   : > { %v1592_v60 = vpop.permute.xlu1 %1591 }
 0x62d   : > { %v1597_v56 = vsel %vm871_vm3, %v1592_v60, 0  ;;  %v4452_v60 = vld [vmem:[#allocation2 + $0x8] sm:$0xf] }
 0x62e   : > { %4032 = vmatpush3.bf16.msra.mxu1 %v1597_v56 }
 0x62f   : > { %4045 = vmatprep.subr.bf16.mxu1 %v4470_v25 }
 0x631   : > { %4034 = vmatmul.mubr.msk.bf16.vlgmr.msra.gmra.mrb[36].mxu1 %vm867_vm6, %v1590_v58  ;;  %v4296_v58 = vld [vmem:[%s4545_s19 + $0x48] ss:$16 sps:$4 sm:$0xff]  }
 0x632   : > { %4046 = vmatpush3.bf16.msra.mxu1 %v1709_v59  ;;  %4047 = vmatprep.mubr.msk.bf16.mxu1 %vm4473_vm1, %v4470_v25  ;;  %v4299_v59 = vld [vmem:[%s4545_s19 + $0x44] ss:$16 sps:$4 sm:$0xff]  }
 0x633   : > { %v4406_v2 = vpop.eup %4405  ;;  %4071 = vmatprep.subr.bf16.mxu1 %v4470_v25 }
 0x634   : > { %v1701_v3 = vmul.f32 %v4406_v2, %v4804_v12  ;;  %v4301_v2 = vld [vmem:[%s4545_s19 + $0x68] ss:$16 sps:$4 sm:$0xff]  }
 0x636   : > { %v1702_v5 = vpack.c.bf16 %v1701_v3, %v1701_v3  ;;  %v4304_v3 = vld [vmem:[%s4545_s19 + $0x64] ss:$16 sps:$4 sm:$0xff]  }
 0x639   : > { %4048 = vmatmul.mubr.msk.bf16.vlgmr.msra.gmra.mrb[40].mxu1 %vm867_vm6, %v1702_v5  ;;  %v4306_v5 = vld [vmem:[%s4545_s19 + $0x88] ss:$16 sps:$4 sm:$0xff]  }
 0x63a   : > { %4087 = vmatprep.mubr.msk.bf16.mxu1 %vm4473_vm1, %v4470_v25 }
 0x6c6   : > { %v1020_v8 = vpop.f32.mrb[16].mxu1 }
 0x6c7   : > { %1027 = vrot.lane.b32.xlu0 %v1020_v8, %s4474_s18  ;;  %v3965_v52 = vpop.f32.mrb[17].mxu1  ;;  %v4309_v8 = vld [vmem:[%s4545_s19 + $0x84] ss:$16 sps:$4 sm:$0xff]  }
 0x6c8   : > { %v1023_v45 = vpop.f32.mrb[18].mxu1  ;;  %v4311_v52 = vld [vmem:[%s4545_s19 + $0xa8] ss:$16 sps:$4 sm:$0xff]  }
 0x6c9   : > { %v3966_v4 = vpop.f32.mrb[19].mxu1  ;;  %v4314_v45 = vld [vmem:[%s4545_s19 + $0xa4] ss:$16 sps:$4 sm:$0xff]  }
 0x6ca   : > { %v4316_v4 = vld [vmem:[%s4545_s19 + $0xc8] ss:$16 sps:$4 sm:$0xff]  }
 0x6ce   : > { %v1133_v62 = vpop.f32.mrb[20].mxu1 }
 0x6cf   : > { %1140 = vrot.lane.b32.xlu0 %v1133_v62, %s4472_s13  ;;  %v3979_v9 = vpop.f32.mrb[21].mxu1  ;;  %v4327_v62 = vld [vmem:[%s4545_s19] ss:$16 sps:$4 sm:$0xff]  }
 0x6d0   : > { %v1136_v63 = vpop.f32.mrb[22].mxu1  ;;  %4072 = vmatpush3.bf16.msra.mxu1 %v4327_v62  ;;  %v4319_v9 = vld [vmem:[%s4545_s19 + $0xc4] ss:$16 sps:$4 sm:$0xff]  }
 0x6d1   : > { %v3980_v0 = vpop.f32.mrb[23].mxu1  ;;  %4073 = vmatprep.subr.bf16.mxu1 %v4470_v25  ;;  %v4321_v63 = vld [vmem:[%s4545_s19 + $0xe8] ss:$16 sps:$4 sm:$0xff]  }
 0x6d2   : > { %v4324_v0 = vld [vmem:[%s4545_s19 + $0xe4] ss:$16 sps:$4 sm:$0xff]  }
 0x6d6   : > { %v1246_v1 = vpop.f32.mrb[24].mxu1 }
 0x6d7   : > { %1253 = vrot.lane.b32.xlu0 %v1246_v1, %s4471_s11  ;;  %v3993_v7 = vpop.f32.mrb[25].mxu1  ;;  %v4326_v1 = vld [vmem:[%s5225_s1] sm:$0xff]  }
 0x6d8   : > { %v1249_v10 = vpop.f32.mrb[26].mxu1 }
 0x6d9   : > { %v3994_v38 = vpop.f32.mrb[27].mxu1 }
 0x6de   : > { %v1413_v11 = vpop.f32.mrb[28].mxu1 }
 0x6df   : > { %1419 = vst.msk [vmem:[#allocation3 + $0x6] sm:$0x3f] %vm915_vm7, %v1413_v11  ;;  %v4007_v12 = vpop.f32.mrb[29].mxu1 }
 0x6e0   : > { %v1416_v13 = vpop.f32.mrb[30].mxu1 }
 0x6e1   : > { %v4008_v24 = vpop.f32.mrb[31].mxu1 }
 0x6f6   : > { %v1521_v14 = vpop.f32.mrb[32].mxu1 }
 0x6f7   : > { %1528 = vrot.lane.b32.xlu1 %v1521_v14, %s4474_s18  ;;  %v4021_v15 = vpop.f32.mrb[33].mxu1 }
 0x6f8   : > { %v1524_v16 = vpop.f32.mrb[34].mxu1 }
 0x6f9   : > { %v4022_v53 = vpop.f32.mrb[35].mxu1  ;;  %v4328_v16 = vld [vmem:[%s4545_s19 + $0x20] ss:$16 sps:$4 sm:$0xff]  }
 0x6fa   : > { %4074 = vmatpush3.bf16.msra.mxu1 %v4328_v16  ;;  %v4329_v53 = vld [vmem:[%s4545_s19 + $0x40] ss:$16 sps:$4 sm:$0xff]  }
 0x6fb   : > { %4075 = vmatprep.subr.bf16.mxu1 %v4470_v25 }
 0x6fe   : > { %4076 = vmatpush3.bf16.msra.mxu1 %v4329_v53 }
 0x6ff   : > { %4077 = vmatprep.subr.bf16.mxu1 %v4470_v25 }
 0x704   : > { %v1633_v35 = vpop.f32.mrb[36].mxu1 }
 0x705   : > { %1640 = vrot.lane.b32.xlu1 %v1633_v35, %s4472_s13  ;;  %v4035_v37 = vpop.f32.mrb[37].mxu1  ;;  %v4330_v35 = vld [vmem:[%s4545_s19 + $0x60] ss:$16 sps:$4 sm:$0xff]  }
 0x706   : > { %v1636_v21 = vpop.f32.mrb[38].mxu1  ;;  %4078 = vmatpush3.bf16.msra.mxu1 %v4330_v35  ;;  %v4331_v37 = vld [vmem:[%s4545_s19 + $0x80] ss:$16 sps:$4 sm:$0xff]  }
 0x707   : > { %v4036_v26 = vpop.f32.mrb[39].mxu1  ;;  %4079 = vmatprep.subr.bf16.mxu1 %v4470_v25  ;;  %v4332_v21 = vld [vmem:[%s4545_s19 + $0xa0] ss:$16 sps:$4 sm:$0xff]  }
 0x708   : > { %v4333_v26 = vld [vmem:[%s4545_s19 + $0xc0] ss:$16 sps:$4 sm:$0xff]  }
 0x70a   : > { %4080 = vmatpush3.bf16.msra.mxu1 %v4331_v37 }
 0x70b   : > { %4081 = vmatprep.subr.bf16.mxu1 %v4470_v25 }
 0x70c   : > { %v1745_v28 = vpop.f32.mrb[40].mxu1 }
 0x70d   : > { %1752 = vrot.lane.b32.xlu1 %v1745_v28, %s4471_s11  ;;  %v4049_v17 = vpop.f32.mrb[41].mxu1  ;;  %v4334_v28 = vld [vmem:[%s4545_s19 + $0xe0] ss:$16 sps:$4 sm:$0xff]  }
 0x70e   : > { %v1748_v19 = vpop.f32.mrb[42].mxu1  ;;  %4082 = vmatpush3.bf16.msra.mxu1 %v4332_v21  ;;  %v4912_v17 = vsub.s32 2, %v4597_v30 }
 0x70f   : > { %v4050_v20 = vpop.f32.mrb[43].mxu1  ;;  %4083 = vmatprep.subr.bf16.mxu1 %v4470_v25  ;;  %v4453_v19 = vld [vmem:[%s4560_s29 + $0x8] sm:$0xff] }
 0x710   : > { %v1973_v20 = vrot.slane %v4453_v19, %v4912_v17 }
 0x712   : > { %4084 = vmatpush3.bf16.msra.mxu1 %v4333_v26 }
 0x713   : > { %4085 = vmatprep.subr.bf16.mxu1 %v4470_v25 }
 0x716   : > { %4086 = vmatpush3.bf16.msra.mxu1 %v4334_v28 }
 0x717   : > { %4091 = vmatprep.subr.bf16.mxu1 %v4470_v25 }
 0x739   : > { %v1028_v22 = vpop.permute.xlu0 %1027 }
 0x73a   : > { %1031 = vst.msk [vmem:[#allocation3] sm:$0x3f] %vm1030_vm8, %v1028_v22 }
 0x741   : > { %v1141_v23 = vpop.permute.xlu0 %1140 }
 0x742   : > { %1144 = vst.msk [vmem:[#allocation3] sm:$0x3f] %vm1143_vm9, %v1141_v23  ;;  %v1977_v23 = vrot.slane %v4662_v18, %v4912_v17  ;;  %v1866_v18 = vsub.s32 6, %v4597_v30 }
 0x749   : > { %v1254_v27 = vpop.permute.xlu0 %1253 }
 0x74a   : > { %1257 = vst.msk [vmem:[#allocation3] sm:$0x3f] %vm1256_vm10, %v1254_v27 }
 0x769   : > { %v1529_v31 = vpop.permute.xlu1 %1528 }
 0x76a   : > { %1531 = vst.msk [vmem:[#allocation3 + $0x6] sm:$0x3f] %vm1030_vm8, %v1529_v31 }
 0x777   : > { %v1641_v34 = vpop.permute.xlu1 %1640 }
 0x778   : > { %1643 = vst.msk [vmem:[#allocation3 + $0x6] sm:$0x3f] %vm1143_vm9, %v1641_v34 }
 0x77f   : > { %v1753_v36 = vpop.permute.xlu1 %1752 }
 0x780   : > { %1755 = vst.msk [vmem:[#allocation3 + $0x6] sm:$0x3f] %vm1256_vm10, %v1753_v36 }
 0x787   : > { %v1756_v39 = vld [vmem:[#allocation3] sm:$0xff]  ;;  %v1757_v40 = vld [vmem:[#allocation3 + $0x8] sm:$0xf] }
 0x788   : > { %v1758_v41 = vpack.c.bf16 %v1757_v40, %v1756_v39 }
 0x78a   : > { %4068 = vmatmul.mubr.bf16.vlgmr.msra.gmra.mrb[28].mxu0 %v1758_v41 }
 0x78b   : > { %2096 = vmatprep.mubr.bf16.mxu0 %v4469_v6  ;;  %2065 = vmatpush1.bf16.msra.mxu0 %v4289_v42 }
 0x78c   : > { %2066 = vmatprep.subr.bf16.mxu0 %v4291_v43 }
 0x78f   : > { %2067 = vmatpush1.bf16.msra.mxu0 %v4294_v57 }
 0x790   : > { %2068 = vmatprep.subr.bf16.mxu0 %v4296_v58 }
 0x793   : > { %2069 = vmatpush1.bf16.msra.mxu0 %v4299_v59 }
 0x794   : > { %2070 = vmatprep.subr.bf16.mxu0 %v4301_v2 }
 0x797   : > { %2071 = vmatpush1.bf16.msra.mxu0 %v4304_v3 }
 0x798   : > { %2072 = vmatprep.subr.bf16.mxu0 %v4306_v5 }
 0x79b   : > { %2073 = vmatpush1.bf16.msra.mxu0 %v4309_v8 }
 0x79c   : > { %2074 = vmatprep.subr.bf16.mxu0 %v4311_v52 }
 0x79f   : > { %2075 = vmatpush1.bf16.msra.mxu0 %v4314_v45 }
 0x7a0   : > { %2076 = vmatprep.subr.bf16.mxu0 %v4316_v4 }
 0x7a3   : > { %2077 = vmatpush1.bf16.msra.mxu0 %v4319_v9 }
 0x7a4   : > { %2078 = vmatprep.subr.bf16.mxu0 %v4321_v63 }
 0x7a7   : > { %2079 = vmatpush1.bf16.msra.mxu0 %v4324_v0 }
 0x7a8   : > { %4119 = vmatprep.subr.bf16.mxu0 %v4470_v25 }
 0x7aa   : > { %2097 = vmatmul.mubr.bf16.vlgmr.msra.gmra.mrb[32].mxu0 %v4326_v1 }
 0x7ab   : > { %4123 = vmatprep.mubr.msk.bf16.mxu0 %vm4473_vm1, %v4470_v25 }
 0x85d   : > { %v1829_v46 = vpop.f32.mrb[28].mxu0 }
 0x85e   : > { %v1830_v47 = vadd.f32 %v1829_v46, %v1762_v44  ;;  %v4069_v48 = vpop.f32.mrb[29].mxu0 }
 0x85f   : > { %v1832_v49 = vpop.f32.mrb[30].mxu0 }
 0x860   : > { %v1833_v50 = vadd.f32 %v1832_v49, %v1762_v44  ;;  %v4070_v51 = vpop.f32.mrb[31].mxu0  ;;  %v1836_v55 = vadd.f32 %v4451_v54, %v1830_v47  ;;  %v4924_v49 = vld [vmem:[%s4560_s29] sm:$0xff] }
 0x861   : > { %v1872_v51 = vsub.s32 7, %v4597_v30 }
 0x862   : > { %1838 = vadd.xlane.f32.xlu1 %v1836_v55  ;;  %v1837_v56 = vadd.f32 %v4452_v60, %v1833_v50  ;;  %v1867_v50 = vrot.slane %v4924_v49, %v1866_v18 }
 0x864   : > { %v1841_v33 = vsel %vm1840_vm11, %v1837_v56, 0.0 }
 0x865   : > { %1842 = vadd.xlane.f32.xlu0 %v1841_v33 }
 0x87d   : > { %v2098_v22 = vpop.f32.mrb[32].mxu0 }
 0x87e   : > { %v2099_v27 = vadd.f32 %v2098_v22, %v1973_v20  ;;  %v2100_v31 = vpop.f32.mrb[33].mxu0 }
 0x87f   : > { %v2102_v34 = vpop.f32.mrb[34].mxu0 }
 0x880   : > { %v4918_v36 = vadd.f32 %v2102_v34, %v1973_v20  ;;  %v2104_v39 = vpop.f32.mrb[35].mxu0 }
 0x881   : > { %v4920_v40 = vadd.f32 %v2104_v39, %v1977_v23 }
 0x895   : > { %2108 = vxpose.xlu1.b32.start.end [1/1] (short) %v2099_v27, 128 }
 0x8ef   : > { %v1839_v7 = vpop.xlane.xlu1 %1838 }
 0x8f0   : > { %v1845_v10 = vmul.f32 0.0078125, %v1839_v7 }
 0x8f2   : > { %v1847_v38 = vsub.f32 %v1836_v55, %v1845_v10  ;;  %v1843_v11 = vpop.xlane.xlu0 %1842 }
 0x8f3   : > { %v1846_v12 = vmul.f32 0.0078125, %v1843_v11 }
 0x8f4   : > { %v1849_v13 = vmul.f32 %v1847_v38, %v1847_v38 }
 0x8f5   : > { %v1848_v24 = vsub.f32 %v1837_v56, %v1846_v12  ;;  %v1873_v56 = vrot.slane %v4924_v49, %v1872_v51 }
 0x8f6   : > { %1851 = vadd.xlane.f32.xlu0 %v1849_v13 }
 0x8f7   : > { %v1850_v14 = vmul.f32 %v1848_v24, %v1848_v24 }
 0x8f9   : > { %v1853_v15 = vsel %vm1840_vm11, %v1850_v14, 0.0  ;;  %v1880_v14 = vrot.slane %v4924_v49, %v4912_v17 }
 0x8fa   : > { %1854 = vadd.xlane.f32.xlu0 %v1853_v15 }
 0x915   : > { %v2124_v2 = vpop.trf.xlu1 }
 0x919   : > { %v2125_v3 = vpop.trf.xlu1 }
 0x91a   : > { %v2140_v5 = vpack.c.bf16 %v2125_v3, %v2124_v2 }
 0x91d   : > { %v2126_v8 = vpop.trf.xlu1 }
 0x921   : > { %v2127_v52 = vpop.trf.xlu1 }
 0x922   : > { %v2141_v45 = vpack.c.bf16 %v2127_v52, %v2126_v8 }
 0x925   : > { %v4939_v4 = vpop.trf.xlu1 }
 0x929   : > { %v4941_v62 = vpop.trf.xlu1 }
 0x92a   : > { %v2142_v9 = vpack.c.bf16 %v4941_v62, %v4939_v4 }
 0x92d   : > { %v4945_v63 = vpop.trf.xlu1 }
 0x931   : > { %v4947_v0 = vpop.trf.xlu1 }
 0x932   : > { %v2143_v1 = vpack.c.bf16 %v4947_v0, %v4945_v63 }
 0x935   : > { %v2132_v7 = vpop.trf.xlu1 }
 0x939   : > { %v2133_v10 = vpop.trf.xlu1 }
 0x93d   : > { %v2134_v11 = vpop.trf.xlu1 }
 0x941   : > { %v2135_v12 = vpop.trf.xlu1 }
 0x942   : > { %v2145_v13 = vpack.c.bf16 %v2135_v12, %v2134_v11 }
 0x983   : > { %v1852_v41 = vpop.xlane.xlu0 %1851 }
 0x984   : > { %v1856_v29 = vmul.f32 0.0078125, %v1852_v41 }
 0x986   : > { %v1858_v42 = vadd.f32 1e-05, %v1856_v29 }
 0x987   : > { %v1855_v43 = vpop.xlane.xlu0 %1854 }
 0x988   : > { %4407 = vrsqrt.f32 %v1858_v42  ;;  %v1857_v44 = vmul.f32 0.0078125, %v1855_v43 }
 0x98a   : > { %v1859_v46 = vadd.f32 1e-05, %v1857_v44 }
 0x98c   : > { %4409 = vrsqrt.f32 %v1859_v46 }
 0x992   : > { %v4408_v47 = vpop.eup %4407 }
 0x993   : > { %v1862_v48 = vmul.f32 %v4408_v47, %v1847_v38  ;;  %v2144_v38 = vpack.c.bf16 %v2133_v10, %v2132_v7 }
 0x995   : > { %v1868_v60 = vmul.f32 %v1867_v50, %v1862_v48  ;;  %4120 = vmatpush3.bf16.msra.mxu0 %v2144_v38 }
 0x996   : > { %v4410_v54 = vpop.eup %4409  ;;  %4121 = vmatprep.subr.bf16.mxu0 %v4470_v25 }
 0x997   : > { %v1863_v55 = vmul.f32 %v4410_v54, %v1848_v24  ;;  %v4929_v57 = vadd.f32 %v1873_v56, %v1868_v60  ;;  %v2101_v24 = vadd.f32 %v2100_v31, %v1977_v23  ;;  %v2136_v23 = vpop.trf.xlu1 }
 0x999   : > { %v1869_v33 = vmul.f32 %v1867_v50, %v1863_v55  ;;  %4122 = vmatpush3.bf16.msra.mxu0 %v2145_v13  ;;  %v4955_v16 = vpack.c.bf16 %v2101_v24, %v2101_v24 }
 0x99a   : > { %4133 = vmatprep.subr.bf16.mxu0 %v4470_v25 }
 0x99b   : > { %v4931_v58 = vadd.f32 %v1873_v56, %v1869_v33  ;;  %v2211_v20 = vsel %vm1840_vm11, %v4955_v16, 0  ;;  %v2137_v27 = vpop.trf.xlu1 }
 0x99c   : > { %v2146_v39 = vpack.c.bf16 %v2137_v27, %v2136_v23 }
 0x99d   : > { %v1876_v59 = vpack.c.bf16 %v4931_v58, %v4929_v57 }
 0x99f   : > { %4088 = vmatmul.mubr.bf16.vlgmr.msra.gmra.mrb[44].mxu1 %v1876_v59  ;;  %v2138_v31 = vpop.trf.xlu1 }
 0x9a0   : > { %4095 = vmatprep.mubr.msk.bf16.mxu1 %vm4473_vm1, %v4470_v25  ;;  %4092 = vmatpush3.bf16.msra.mxu1 %v2140_v5 }
 0x9a1   : > { %4093 = vmatprep.subr.bf16.mxu1 %v4470_v25 }
 0x9a3   : > { %v2139_v29 = vpop.trf.xlu1 }
 0x9a4   : > { %4094 = vmatpush3.bf16.msra.mxu1 %v2141_v45  ;;  %v2147_v42 = vpack.c.bf16 %v2139_v29, %v2138_v31 }
 0x9a5   : > { %4099 = vmatprep.subr.bf16.mxu1 %v4470_v25 }
 0xa72   : > { %v1963_v15 = vpop.f32.mrb[44].mxu1 }
 0xa73   : > { %v1964_v53 = vadd.f32 %v1963_v15, %v1880_v14  ;;  %v4089_v35 = vpop.f32.mrb[45].mxu1 }
 0xa74   : > { %v1966_v37 = vpop.f32.mrb[46].mxu1 }
 0xa75   : > { %v2107_v21 = vpack.c.bf16 %v1964_v53, %v1964_v53  ;;  %v1967_v26 = vadd.f32 %v1966_v37, %v1880_v14  ;;  %v4090_v28 = vpop.f32.mrb[47].mxu1 }
 0xa77   : > { %v2589_v19 = vpack.c.bf16 %v1967_v26, %v1964_v53  ;;  %2255 = vrot.lane.b32.xlu0 %v2107_v21, %s4471_s11  ;;  %4096 = vmatmul.mubr.msk.bf16.vlgmr.msra.gmra.mrb[48].mxu1 %vm808_vm2, %v2107_v21 }
 0xa78   : > { %4100 = vmatpush3.bf16.msra.mxu1 %v2211_v20  ;;  %4101 = vmatprep.mubr.msk.bf16.mxu1 %vm4473_vm1, %v4470_v25 }
 0xa79   : > { %v4963_v22 = vrot.slane %v2589_v19, 3  ;;  %4105 = vmatprep.subr.bf16.mxu1 %v4470_v25 }
 0xa7b   : > { %2367 = vrot.lane.b32.xlu0 %v2107_v21, %s4472_s13  ;;  %2848 = vrot.lane.b32.xlu1 %v4963_v22, %s4472_s13 }
 0xa7f   : > { %2478 = vrot.lane.b32.xlu0 %v2107_v21, %s4474_s18 }
 0xae9   : > { %v2256_v34 = vpop.permute.xlu0 %2255 }
 0xaed   : > { %v2368_v41 = vpop.permute.xlu0 %2367  ;;  %v2849_v27 = vpop.permute.xlu1 %2848 }
 0xaee   : > { %4124 = vmatmul.mubr.msk.bf16.vlgmr.msra.gmra.mrb[36].mxu0 %vm808_vm2, %v2368_v41 }
 0xaef   : > { %4134 = vmatpush3.bf16.msra.mxu0 %v2146_v39  ;;  %4137 = vmatprep.mubr.msk.bf16.mxu0 %vm4473_vm1, %v4470_v25 }
 0xaf0   : > { %4135 = vmatprep.subr.bf16.mxu0 %v4470_v25 }
 0xaf1   : > { %v2479_v43 = vpop.permute.xlu0 %2478 }
 0xaf3   : > { %4136 = vmatpush3.bf16.msra.mxu0 %v2147_v42  ;;  %v4288_v42 = vld [vmem:[%s4545_s19 + $0xc] ss:$16 sps:$4 sm:$0xff]  }
 0xaf4   : > { %4147 = vmatprep.subr.bf16.mxu0 %v4470_v25 }
 0xaf6   : > { %4138 = vmatmul.mubr.msk.bf16.vlgmr.msra.gmra.mrb[40].mxu0 %vm808_vm2, %v2479_v43 }
 0xaf7   : > { %4151 = vmatprep.mubr.msk.bf16.mxu0 %vm4473_vm1, %v4470_v25 }
 0xb4a   : > { %v2186_v44 = vpop.f32.mrb[48].mxu1 }
 0xb4b   : > { %v2192_v46 = vmul.f32 0.17677669, %v2186_v44  ;;  %v4097_v18 = vpop.f32.mrb[49].mxu1  ;;  %v4293_v44 = vld [vmem:[%s4545_s19 + $0x2c] ss:$16 sps:$4 sm:$0xff]  }
 0xb4c   : > { %v2189_v47 = vpop.f32.mrb[50].mxu1  ;;  %v4303_v18 = vld [vmem:[%s4545_s19 + $0x6c] ss:$16 sps:$4 sm:$0xff]  }
 0xb4d   : > { %v4098_v48 = vpop.f32.mrb[51].mxu1  ;;  %v2194_v50 = vsel %vm2193_vm12, %v2192_v46, -inf  ;;  %v4308_v47 = vld [vmem:[%s4545_s19 + $0x8c] ss:$16 sps:$4 sm:$0xff]  }
 0xb4e   : > { %2195 = vmax.xlane.f32.xlu0 %v2194_v50  ;;  %v4313_v48 = vld [vmem:[%s4545_s19 + $0xac] ss:$16 sps:$4 sm:$0xff]  }
 0xb4f   : > { %v4318_v50 = vld [vmem:[%s4545_s19 + $0xcc] ss:$16 sps:$4 sm:$0xff]  }
 0xb64   : > { %2736 = vrot.lane.b32.xlu0 %v4963_v22, %s4471_s11 }
 0xbc1   : > { %v2406_v51 = vpop.f32.mrb[36].mxu0 }
 0xbc2   : > { %v4125_v54 = vpop.f32.mrb[37].mxu0 }
 0xbc3   : > { %v2409_v55 = vpop.f32.mrb[38].mxu0 }
 0xbc4   : > { %v4126_v60 = vpop.f32.mrb[39].mxu0 }
 0xbc9   : > { %v4981_v56 = vpop.f32.mrb[40].mxu0 }
 0xbca   : > { %v4139_v33 = vpop.f32.mrb[41].mxu0 }
 0xbcb   : > { %v2520_v59 = vpop.f32.mrb[42].mxu0 }
 0xbcc   : > { %v4140_v2 = vpop.f32.mrb[43].mxu0 }
 0xbdb   : > { %v2196_v3 = vpop.xlane.xlu0 %2195 }
 0xbdc   : > { %v2197_v5 = vsub.f32 %v2192_v46, %v2196_v3  ;;  %v4298_v46 = vld [vmem:[%s4545_s19 + $0x4c] ss:$16 sps:$4 sm:$0xff]  }
 0xbde   : > { %v2198_v8 = vmul.f32 1.442695, %v2197_v5 }
 0xbdf   : > { %v2737_v7 = vpop.permute.xlu0 %2736 }
 0xbe0   : > { %4411 = vpow2.f32 %v2198_v8  ;;  %v2523_v8 = vmul.f32 0.17677669, %v4981_v56 }
 0xbea   : > { %v4412_v52 = vpop.eup %4411 }
 0xbeb   : > { %v2200_v45 = vsel %vm2193_vm12, %v4412_v52, 0.0 }
 0xbec   : > { %2201 = vadd.xlane.f32.xlu0 %v2200_v45 }
 0xc19   : > { %2590 = vxpose.xlu0.b32.start.end [1/1] (short) %v4918_v36, 128  ;;  %v5001_v36 = vmul.f32 0.17677669, %v2406_v51  ;;  %v4323_v51 = vld [vmem:[%s4545_s19 + $0xec] ss:$16 sps:$4 sm:$0xff]  }
 0xc1b   : > { %v2413_v62 = vsel %vm2193_vm12, %v5001_v36, -inf }
 0xc79   : > { %v2202_v10 = vpop.xlane.xlu0 %2201 }
 0xc7a   : > { %4413 = vrcp.f32 %v2202_v10 }
 0xc7e   : > { %2959 = vrot.lane.b32.xlu0 %v4963_v22, %s4474_s18 }
 0xc84   : > { %v4414_v38 = vpop.eup %4413 }
 0xc85   : > { %v2204_v11 = vmul.f32 %v4414_v38, %v4412_v52 }
 0xc87   : > { %v2205_v12 = vpack.c.bf16 %v2204_v11, %v2204_v11 }
 0xc89   : > { %4102 = vmatmul.mubr.msk.bf16.vlgmr.msra.gmra.mrb[52].mxu1 %vm2206_vm13, %v2205_v12 }
 0xc8a   : > { %4106 = vmatpush3.bf16.msra.mxu1 %v2142_v9  ;;  %4109 = vmatprep.mubr.msk.bf16.mxu1 %vm4473_vm1, %v4470_v25 }
 0xc8b   : > { %4107 = vmatprep.subr.bf16.mxu1 %v4470_v25 }
 0xc8e   : > { %4108 = vmatpush3.bf16.msra.mxu1 %v2143_v1 }
 0xc8f   : > { %4113 = vmatprep.subr.bf16.mxu1 %v4470_v25 }
 0xc91   : > { %4110 = vmatmul.mubr.msk.bf16.vlgmr.msra.gmra.mrb[56].mxu1 %vm808_vm2, %v2256_v34 }
 0xc92   : > { %4115 = vmatprep.mubr.msk.bf16.mxu1 %vm4473_vm1, %v4470_v25 }
 0xc99   : > { %v2606_v4 = vpop.trf.xlu0 }
 0xc9d   : > { %2414 = vmax.xlane.f32.xlu0 %v2413_v62  ;;  %v2607_v9 = vpop.trf.xlu0 }
 0xc9e   : > { %v2622_v13 = vpack.c.bf16 %v2607_v9, %v2606_v4 }
 0xca0   : > { %4148 = vmatpush3.bf16.msra.mxu0 %v2622_v13 }
 0xca1   : > { %v2608_v24 = vpop.trf.xlu0  ;;  %4149 = vmatprep.subr.bf16.mxu0 %v4470_v25 }
 0xca5   : > { %v2609_v63 = vpop.trf.xlu0 }
 0xca6   : > { %v2623_v0 = vpack.c.bf16 %v2609_v63, %v2608_v24 }
 0xca8   : > { %4150 = vmatpush3.bf16.msra.mxu0 %v2623_v0 }
 0xca9   : > { %v2610_v1 = vpop.trf.xlu0  ;;  %4161 = vmatprep.subr.bf16.mxu0 %v4470_v25 }
 0xcab   : > { %4152 = vmatmul.mubr.msk.bf16.vlgmr.msra.gmra.mrb[44].mxu0 %vm808_vm2, %v4963_v22 }
 0xcac   : > { %4165 = vmatprep.mubr.msk.bf16.mxu0 %vm4473_vm1, %v4470_v25 }
 0xcad   : > { %v2611_v14 = vpop.trf.xlu0 }
 0xcae   : > { %v2624_v15 = vpack.c.bf16 %v2611_v14, %v2610_v1 }
 0xcb0   : > { %4162 = vmatpush3.bf16.msra.mxu0 %v2624_v15 }
 0xcb1   : > { %v2612_v53 = vpop.trf.xlu0  ;;  %4163 = vmatprep.subr.bf16.mxu0 %v4470_v25 }
 0xcb5   : > { %v2613_v35 = vpop.trf.xlu0 }
 0xcb6   : > { %v2625_v37 = vpack.c.bf16 %v2613_v35, %v2612_v53 }
 0xcb8   : > { %4164 = vmatpush3.bf16.msra.mxu0 %v2625_v37 }
 0xcb9   : > { %v2614_v21 = vpop.trf.xlu0  ;;  %4175 = vmatprep.subr.bf16.mxu0 %v4470_v25 }
 0xcbb   : > { %4166 = vmatmul.mubr.msk.bf16.vlgmr.msra.gmra.mrb[48].mxu0 %vm808_vm2, %v2737_v7  ;;  %v2524_v7 = vsel %vm2193_vm12, %v2523_v8, -inf }
 0xcbc   : > { %4179 = vmatprep.mubr.msk.bf16.mxu0 %vm4473_vm1, %v4470_v25 }
 0xcbd   : > { %v2615_v26 = vpop.trf.xlu0 }
 0xcbe   : > { %v2626_v28 = vpack.c.bf16 %v2615_v26, %v2614_v21 }
 0xcc0   : > { %4176 = vmatpush3.bf16.msra.mxu0 %v2626_v28 }
 0xcc1   : > { %v2616_v19 = vpop.trf.xlu0  ;;  %4177 = vmatprep.subr.bf16.mxu0 %v4470_v25 }
 0xcc5   : > { %v2617_v20 = vpop.trf.xlu0 }
 0xcc6   : > { %v2627_v22 = vpack.c.bf16 %v2617_v20, %v2616_v19 }
 0xcc8   : > { %4178 = vmatpush3.bf16.msra.mxu0 %v2627_v22 }
 0xcc9   : > { %v2618_v23 = vpop.trf.xlu0  ;;  %4189 = vmatprep.subr.bf16.mxu0 %v4470_v25 }
 0xccb   : > { %4180 = vmatmul.mubr.msk.bf16.vlgmr.msra.gmra.mrb[52].mxu0 %vm808_vm2, %v2849_v27 }
 0xccc   : > { %4193 = vmatprep.mubr.msk.bf16.mxu0 %vm4473_vm1, %v4470_v25 }
 0xccd   : > { %v2619_v31 = vpop.trf.xlu0 }
 0xcce   : > { %v2628_v34 = vpack.c.bf16 %v2619_v31, %v2618_v23 }
 0xcd0   : > { %4190 = vmatpush3.bf16.msra.mxu0 %v2628_v34 }
 0xcd1   : > { %v2620_v39 = vpop.trf.xlu0  ;;  %4191 = vmatprep.subr.bf16.mxu0 %v4470_v25 }
 0xcd5   : > { %v2621_v41 = vpop.trf.xlu0 }
 0xcd6   : > { %v2629_v29 = vpack.c.bf16 %v2621_v41, %v2620_v39 }
 0xcd8   : > { %4192 = vmatpush3.bf16.msra.mxu0 %v2629_v29 }
 0xcd9   : > { %4203 = vmatprep.subr.bf16.mxu0 %v4470_v25 }
 0xcf0   : > { %v2960_v43 = vpop.permute.xlu0 %2959 }
 0xcf1   : > { %4194 = vmatmul.mubr.msk.bf16.vlgmr.msra.gmra.mrb[56].mxu0 %vm808_vm2, %v2960_v43 }
 0xcf2   : > { %4204 = vmatpush3.bf16.msra.mxu0 %v4288_v42  ;;  %4219 = vmatprep.mubr.msk.bf16.mxu0 %vm4473_vm1, %v4470_v25 }
 0xcf3   : > { %4205 = vmatprep.subr.bf16.mxu0 %v4470_v25 }
 0xcf6   : > { %4206 = vmatpush3.bf16.msra.mxu0 %v4293_v44 }
 0xcf7   : > { %4207 = vmatprep.subr.bf16.mxu0 %v4470_v25 }
 0xcfa   : > { %4208 = vmatpush3.bf16.msra.mxu0 %v4298_v46 }
 0xcfb   : > { %4209 = vmatprep.subr.bf16.mxu0 %v4470_v25 }
 0xcfe   : > { %4210 = vmatpush3.bf16.msra.mxu0 %v4303_v18 }
 0xcff   : > { %4211 = vmatprep.subr.bf16.mxu0 %v4470_v25 }
 0xd02   : > { %4212 = vmatpush3.bf16.msra.mxu0 %v4308_v47 }
 0xd03   : > { %4213 = vmatprep.subr.bf16.mxu0 %v4470_v25 }
 0xd06   : > { %4214 = vmatpush3.bf16.msra.mxu0 %v4313_v48 }
 0xd07   : > { %4215 = vmatprep.subr.bf16.mxu0 %v4470_v25 }
 0xd0a   : > { %4216 = vmatpush3.bf16.msra.mxu0 %v4318_v50 }
 0xd0b   : > { %4217 = vmatprep.subr.bf16.mxu0 %v4470_v25 }
 0xd0e   : > { %4218 = vmatpush3.bf16.msra.mxu0 %v4323_v51 }
 0xd2a   : > { %v2415_v21 = vpop.xlane.xlu0 %2414 }
 0xd2b   : > { %v2416_v26 = vsub.f32 %v5001_v36, %v2415_v21 }
 0xd2d   : > { %v2417_v28 = vmul.f32 1.442695, %v2416_v26 }
 0xd2f   : > { %4415 = vpow2.f32 %v2417_v28 }
 0xd39   : > { %v5050_v34 = vpop.eup %4415 }
 0xd3a   : > { %v2419_v39 = vsel %vm2193_vm12, %v5050_v34, 0.0 }
 0xd5c   : > { %v2247_v54 = vpop.f32.mrb[52].mxu1 }
 0xd5d   : > { %2253 = vst.msk [vmem:[#allocation3] sm:$0x3f] %vm915_vm7, %v2247_v54  ;;  %v4103_v55 = vpop.f32.mrb[53].mxu1 }
 0xd5e   : > { %v2250_v60 = vpop.f32.mrb[54].mxu1 }
 0xd5f   : > { %v4104_v33 = vpop.f32.mrb[55].mxu1 }
 0xd64   : > { %v2294_v59 = vpop.f32.mrb[56].mxu1 }
 0xd65   : > { %v2300_v2 = vmul.f32 0.17677669, %v2294_v59  ;;  %v4111_v3 = vpop.f32.mrb[57].mxu1 }
 0xd66   : > { %v2297_v5 = vpop.f32.mrb[58].mxu1 }
 0xd67   : > { %v4112_v52 = vpop.f32.mrb[59].mxu1  ;;  %v2301_v45 = vsel %vm2193_vm12, %v2300_v2, -inf }
 0xd68   : > { %2302 = vmax.xlane.f32.xlu1 %v2301_v45 }
 0xd6c   : > { %2525 = vmax.xlane.f32.xlu1 %v2524_v7 }
 0xd7e   : > { %v2670_v10 = vpop.f32.mrb[44].mxu0 }
 0xd7f   : > { %v2676_v38 = vmul.f32 0.17677669, %v2670_v10  ;;  %v4153_v11 = vpop.f32.mrb[45].mxu0 }
 0xd80   : > { %v2673_v12 = vpop.f32.mrb[46].mxu0 }
 0xd81   : > { %v4154_v4 = vpop.f32.mrb[47].mxu0  ;;  %v2677_v62 = vsel %vm2193_vm12, %v2676_v38, -inf }
 0xd82   : > { %2678 = vmax.xlane.f32.xlu1 %v2677_v62 }
 0xd8e   : > { %v2775_v9 = vpop.f32.mrb[48].mxu0 }
 0xd8f   : > { %v2781_v13 = vmul.f32 0.17677669, %v2775_v9  ;;  %v4167_v24 = vpop.f32.mrb[49].mxu0 }
 0xd90   : > { %v2778_v63 = vpop.f32.mrb[50].mxu0 }
 0xd91   : > { %v4168_v56 = vpop.f32.mrb[51].mxu0  ;;  %v2782_v0 = vsel %vm2193_vm12, %v2781_v13, -inf }
 0xd92   : > { %2783 = vmax.xlane.f32.xlu1 %v2782_v0 }
 0xd9e   : > { %v2887_v1 = vpop.f32.mrb[52].mxu0 }
 0xd9f   : > { %v2893_v14 = vmul.f32 0.17677669, %v2887_v1  ;;  %v4181_v15 = vpop.f32.mrb[53].mxu0 }
 0xda0   : > { %v2890_v53 = vpop.f32.mrb[54].mxu0 }
 0xda1   : > { %v4182_v35 = vpop.f32.mrb[55].mxu0  ;;  %v2894_v37 = vsel %vm2193_vm12, %v2893_v14, -inf }
 0xda2   : > { %2895 = vmax.xlane.f32.xlu1 %v2894_v37 }
 0xdc4   : > { %v2998_v19 = vpop.f32.mrb[56].mxu0 }
 0xdc5   : > { %v3004_v20 = vmul.f32 0.17677669, %v2998_v19  ;;  %v4195_v22 = vpop.f32.mrb[57].mxu0 }
 0xdc6   : > { %v3001_v23 = vpop.f32.mrb[58].mxu0 }
 0xdc7   : > { %v4196_v27 = vpop.f32.mrb[59].mxu0  ;;  %v3005_v31 = vsel %vm2193_vm12, %v3004_v20, -inf }
 0xdc8   : > { %3006 = vmax.xlane.f32.xlu1 %v3005_v31 }
 0xdcc   : > { %2420 = vadd.xlane.f32.xlu1 %v2419_v39 }
 0xdf5   : > { %v2303_v41 = vpop.xlane.xlu1 %2302 }
 0xdf6   : > { %v2304_v29 = vsub.f32 %v2300_v2, %v2303_v41 }
 0xdf8   : > { %v2305_v43 = vmul.f32 1.442695, %v2304_v29 }
 0xdf9   : > { %v2526_v42 = vpop.xlane.xlu1 %2525 }
 0xdfa   : > { %v2527_v36 = vsub.f32 %v2523_v8, %v2526_v42 }
 0xdfc   : > { %v2528_v44 = vmul.f32 1.442695, %v2527_v36 }
 0xdfe   : > { %4417 = vpow2.f32 %v2528_v44 }
 0xdff   : > { %4419 = vpow2.f32 %v2305_v43 }
 0xe08   : > { %v5054_v46 = vpop.eup %4417 }
 0xe09   : > { %v2530_v18 = vsel %vm2193_vm12, %v5054_v46, 0.0  ;;  %v4420_v47 = vpop.eup %4419 }
 0xe0a   : > { %2531 = vadd.xlane.f32.xlu1 %v2530_v18  ;;  %v2307_v48 = vsel %vm2193_vm12, %v4420_v47, 0.0 }
 0xe0e   : > { %2308 = vadd.xlane.f32.xlu1 %v2307_v48 }
 0xe0f   : > { %v2679_v50 = vpop.xlane.xlu1 %2678 }
 0xe10   : > { %v2680_v51 = vsub.f32 %v2676_v38, %v2679_v50  ;;  %v2630_v38 = vpack.c.bf16 %v4920_v40, %v4920_v40 }
 0xe12   : > { %v2681_v54 = vmul.f32 1.442695, %v2680_v51  ;;  %v2693_v31 = vsel %vm1840_vm11, %v2630_v38, 0 }
 0xe14   : > { %4421 = vpow2.f32 %v2681_v54 }
 0xe1e   : > { %v5059_v55 = vpop.eup %4421 }
 0xe1f   : > { %2314 = vrot.lane.b32.xlu1 %v4955_v16, %s4471_s11  ;;  %v2784_v60 = vpop.xlane.xlu1 %2783  ;;  %v2683_v33 = vsel %vm2193_vm12, %v5059_v55, 0.0 }
 0xe20   : > { %v2785_v59 = vsub.f32 %v2781_v13, %v2784_v60  ;;  %2684 = vadd.xlane.f32.xlu0 %v2683_v33 }
 0xe22   : > { %v2786_v2 = vmul.f32 1.442695, %v2785_v59 }
 0xe24   : > { %4423 = vpow2.f32 %v2786_v2 }
 0xe2e   : > { %v5065_v3 = vpop.eup %4423 }
 0xe2f   : > { %v2896_v5 = vpop.xlane.xlu1 %2895  ;;  %v2788_v8 = vsel %vm2193_vm12, %v5065_v3, 0.0 }
 0xe30   : > { %v2897_v52 = vsub.f32 %v2893_v14, %v2896_v5  ;;  %2789 = vadd.xlane.f32.xlu0 %v2788_v8 }
 0xe32   : > { %v2898_v45 = vmul.f32 1.442695, %v2897_v52 }
 0xe34   : > { %4425 = vpow2.f32 %v2898_v45 }
 0xe3e   : > { %v5069_v7 = vpop.eup %4425 }
 0xe3f   : > { %v2900_v10 = vsel %vm2193_vm12, %v5069_v7, 0.0 }
 0xe43   : > { %2901 = vadd.xlane.f32.xlu1 %v2900_v10 }
 0xe46   : > { %2425 = vrot.lane.b32.xlu0 %v4955_v16, %s4472_s13 }
 0xe4a   : > { %2536 = vrot.lane.b32.xlu0 %v4955_v16, %s4474_s18 }
 0xe54   : > { %2795 = vrot.lane.b32.xlu1 %v2630_v38, %s4471_s11 }
 0xe55   : > { %v3007_v11 = vpop.xlane.xlu1 %3006 }
 0xe56   : > { %v3008_v12 = vsub.f32 %v3004_v20, %v3007_v11 }
 0xe58   : > { %v3009_v4 = vmul.f32 1.442695, %v3008_v12  ;;  %3017 = vrot.lane.b32.xlu1 %v2630_v38, %s4474_s18 }
 0xe59   : > { %v2421_v16 = vpop.xlane.xlu1 %2420 }
 0xe5a   : > { %4427 = vpow2.f32 %v3009_v4 }
 0xe64   : > { %v5081_v62 = vpop.eup %4427 }
 0xe65   : > { %v3011_v9 = vsel %vm2193_vm12, %v5081_v62, 0.0 }
 0xe69   : > { %3012 = vadd.xlane.f32.xlu0 %v3011_v9 }
 0xe7f   : > { %2906 = vrot.lane.b32.xlu0 %v2630_v38, %s4472_s13 }
 0xe97   : > { %v2532_v13 = vpop.xlane.xlu1 %2531 }
 0xe9b   : > { %v2309_v24 = vpop.xlane.xlu1 %2308 }
 0xe9c   : > { %4429 = vrcp.f32 %v2309_v24 }
 0xe9d   : > { %4431 = vrcp.f32 %v2421_v16 }
 0xe9e   : > { %4433 = vrcp.f32 %v2532_v13 }
 0xe9f   : > { %v2315_v40 = vpop.permute.xlu1 %2314 }
 0xea0   : > { %v2320_v63 = vsel %vm1840_vm11, %v2315_v40, 0 }
 0xea1   : > { %4114 = vmatpush3.bf16.msra.mxu1 %v2320_v63 }
 0xea2   : > { %4127 = vmatprep.subr.bf16.mxu1 %v4470_v25 }
 0xea6   : > { %v4430_v56 = vpop.eup %4429 }
 0xea7   : > { %v2311_v0 = vmul.f32 %v4430_v56, %v4420_v47  ;;  %v4432_v15 = vpop.eup %4431 }
 0xea8   : > { %v2423_v35 = vmul.f32 %v4432_v15, %v5050_v34  ;;  %v4434_v28 = vpop.eup %4433 }
 0xea9   : > { %v2312_v1 = vpack.c.bf16 %v2311_v0, %v2311_v0  ;;  %v2534_v22 = vmul.f32 %v4434_v28, %v5054_v46 }
 0xeaa   : > { %v2424_v26 = vpack.c.bf16 %v2423_v35, %v2423_v35 }
 0xeab   : > { %4116 = vmatmul.mubr.msk.bf16.vlgmr.msra.gmra.mrb[60].mxu1 %vm2206_vm13, %v2312_v1  ;;  %v2535_v23 = vpack.c.bf16 %v2534_v22, %v2534_v22 }
 0xeac   : > { %4129 = vmatprep.mubr.msk.bf16.mxu1 %vm4473_vm1, %v4470_v25 }
 0xead   : > { %v2685_v14 = vpop.xlane.xlu0 %2684 }
 0xeae   : > { %4435 = vrcp.f32 %v2685_v14 }
 0xeb8   : > { %v4436_v27 = vpop.eup %4435 }
 0xeb9   : > { %v2687_v34 = vmul.f32 %v4436_v27, %v5059_v55 }
 0xebb   : > { %v2688_v29 = vpack.c.bf16 %v2687_v34, %v2687_v34 }
 0xebd   : > { %v2790_v53 = vpop.xlane.xlu0 %2789 }
 0xebe   : > { %4437 = vrcp.f32 %v2790_v53 }
 0xec1   : > { %v2426_v37 = vpop.permute.xlu0 %2425 }
 0xec2   : > { %v2431_v21 = vsel %vm1840_vm11, %v2426_v37, 0 }
 0xec3   : > { %4128 = vmatpush3.bf16.msra.mxu1 %v2431_v21 }
 0xec4   : > { %4141 = vmatprep.subr.bf16.mxu1 %v4470_v25 }
 0xec5   : > { %v2537_v19 = vpop.permute.xlu0 %2536 }
 0xec6   : > { %v2542_v20 = vsel %vm1840_vm11, %v2537_v19, 0  ;;  %4130 = vmatmul.mubr.msk.bf16.vlgmr.msra.gmra.mrb[64].mxu1 %vm2206_vm13, %v2424_v26 }
 0xec7   : > { %4142 = vmatpush3.bf16.msra.mxu1 %v2542_v20  ;;  %4143 = vmatprep.mubr.msk.bf16.mxu1 %vm4473_vm1, %v4470_v25 }
 0xec8   : > { %4155 = vmatprep.subr.bf16.mxu1 %v4470_v25  ;;  %v4438_v42 = vpop.eup %4437 }
 0xec9   : > { %v2792_v43 = vmul.f32 %v4438_v42, %v5065_v3 }
 0xecb   : > { %v2793_v44 = vpack.c.bf16 %v2792_v43, %v2792_v43 }
 0xece   : > { %4144 = vmatmul.mubr.msk.bf16.vlgmr.msra.gmra.mrb[68].mxu1 %vm2206_vm13, %v2535_v23 }
 0xecf   : > { %4156 = vmatpush3.bf16.msra.mxu1 %v2693_v31  ;;  %4157 = vmatprep.mubr.msk.bf16.mxu1 %vm4473_vm1, %v4470_v25  ;;  %v3075_v31 = vsub.s32 3, %v4597_v30 }
 0xed0   : > { %v2902_v39 = vpop.xlane.xlu1 %2901  ;;  %4169 = vmatprep.subr.bf16.mxu1 %v4470_v25 }
 0xed1   : > { %4439 = vrcp.f32 %v2902_v39  ;;  %v3076_v34 = vrot.slane %v4924_v49, %v3075_v31  ;;  %v4338_v49 = vld [vmem:[%s4550_s22 + $0x10] ss:$8 sps:$4 sm:$0xff]  }
 0xed4   : > { %v2796_v41 = vpop.permute.xlu1 %2795 }
 0xed5   : > { %v2801_v36 = vsel %vm1840_vm11, %v2796_v41, 0 }
 0xed6   : > { %4158 = vmatmul.mubr.msk.bf16.vlgmr.msra.gmra.mrb[72].mxu1 %vm2206_vm13, %v2688_v29 }
 0xed7   : > { %4170 = vmatpush3.bf16.msra.mxu1 %v2801_v36  ;;  %4171 = vmatprep.mubr.msk.bf16.mxu1 %vm4473_vm1, %v4470_v25 }
 0xed8   : > { %4183 = vmatprep.subr.bf16.mxu1 %v4470_v25  ;;  %v3018_v51 = vpop.permute.xlu1 %3017 }
 0xed9   : > { %v3023_v55 = vsel %vm1840_vm11, %v3018_v51, 0 }
 0xedb   : > { %v4440_v46 = vpop.eup %4439 }
 0xedc   : > { %v2904_v47 = vmul.f32 %v4440_v46, %v5069_v7 }
 0xede   : > { %4172 = vmatmul.mubr.msk.bf16.vlgmr.msra.gmra.mrb[76].mxu1 %vm2206_vm13, %v2793_v44  ;;  %v2905_v54 = vpack.c.bf16 %v2904_v47, %v2904_v47  ;;  %v4335_v47 = vld [vmem:[%s4550_s22] ss:$8 sps:$4 sm:$0xff]  }
 0xedf   : > { %4185 = vmatprep.mubr.msk.bf16.mxu1 %vm4473_vm1, %v4470_v25 }
 0xef6   : > { %v3013_v18 = vpop.xlane.xlu0 %3012 }
 0xef7   : > { %4441 = vrcp.f32 %v3013_v18 }
 0xefa   : > { %v2907_v48 = vpop.permute.xlu0 %2906 }
 0xefb   : > { %v2912_v50 = vsel %vm1840_vm11, %v2907_v48, 0  ;;  %v4337_v48 = vld [vmem:[%s4550_s22 + $0x4] ss:$8 sps:$4 sm:$0xff]  }
 0xefc   : > { %4184 = vmatpush3.bf16.msra.mxu1 %v2912_v50  ;;  %v4340_v50 = vld [vmem:[%s4550_s22 + $0x14] ss:$8 sps:$4 sm:$0xff]  }
 0xefd   : > { %4197 = vmatprep.subr.bf16.mxu1 %v4470_v25 }
 0xeff   : > { %4186 = vmatmul.mubr.msk.bf16.vlgmr.msra.gmra.mrb[80].mxu1 %vm2206_vm13, %v2905_v54 }
 0xf00   : > { %4198 = vmatpush3.bf16.msra.mxu1 %v3023_v55  ;;  %4199 = vmatprep.mubr.msk.bf16.mxu1 %vm4473_vm1, %v4470_v25 }
 0xf01   : > { %v4442_v60 = vpop.eup %4441  ;;  %3277 = vmatprep.subr.bf16.mxu1 %v4337_v48  ;;  %v4456_v48 = vld [vmem:[%s4560_s29 + $0x8] sm:$0xff] }
 0xf02   : > { %v3015_v33 = vmul.f32 %v4442_v60, %v5081_v62 }
 0xf04   : > { %v3016_v59 = vpack.c.bf16 %v3015_v33, %v3015_v33 }
 0xf07   : > { %4200 = vmatmul.mubr.msk.bf16.vlgmr.msra.gmra.mrb[84].mxu1 %vm2206_vm13, %v3016_v59 }
 0xf08   : > { %3309 = vmatprep.mubr.bf16.mxu1 %v4469_v6  ;;  %3278 = vmatpush1.bf16.msra.mxu1 %v4335_v47 }
 0xf09   : > { %3279 = vmatprep.subr.bf16.mxu1 %v4340_v50 }
 0xf0c   : > { %3280 = vmatpush1.bf16.msra.mxu1 %v4338_v49 }
 0xf7e   : > { %v2356_v2 = vpop.f32.mrb[60].mxu1 }
 0xf7f   : > { %2363 = vrot.lane.b32.xlu1 %v2356_v2, %s4474_s18  ;;  %v4117_v3 = vpop.f32.mrb[61].mxu1 }
 0xf80   : > { %v2359_v5 = vpop.f32.mrb[62].mxu1  ;;  %v4343_v3 = vld [vmem:[%s4550_s22 + $0x24] ss:$8 sps:$4 sm:$0xff]  }
 0xf81   : > { %v4118_v8 = vpop.f32.mrb[63].mxu1  ;;  %v4341_v5 = vld [vmem:[%s4550_s22 + $0x20] ss:$8 sps:$4 sm:$0xff]   ;;  %3281 = vmatprep.subr.bf16.mxu1 %v4343_v3 }
 0xf82   : > { %3282 = vmatpush1.bf16.msra.mxu1 %v4341_v5  ;;  %v4346_v8 = vld [vmem:[%s4550_s22 + $0x34] ss:$8 sps:$4 sm:$0xff]  }
 0xf83   : > { %3283 = vmatprep.subr.bf16.mxu1 %v4346_v8 }
 0xf99   : > { %v2467_v52 = vpop.f32.mrb[64].mxu1 }
 0xf9a   : > { %2474 = vrot.lane.b32.xlu1 %v2467_v52, %s4472_s13  ;;  %v4131_v45 = vpop.f32.mrb[65].mxu1  ;;  %v4344_v52 = vld [vmem:[%s4550_s22 + $0x30] ss:$8 sps:$4 sm:$0xff]  }
 0xf9b   : > { %v2470_v7 = vpop.f32.mrb[66].mxu1  ;;  %3284 = vmatpush1.bf16.msra.mxu1 %v4344_v52  ;;  %v4349_v45 = vld [vmem:[%s4550_s22 + $0x44] ss:$8 sps:$4 sm:$0xff]  }
 0xf9c   : > { %v4132_v25 = vpop.f32.mrb[67].mxu1  ;;  %v4347_v7 = vld [vmem:[%s4550_s22 + $0x40] ss:$8 sps:$4 sm:$0xff]   ;;  %3285 = vmatprep.subr.bf16.mxu1 %v4349_v45  ;;  %v3328_v45 = vsub.s32 5, %v4597_v30 }
 0xf9d   : > { %v4352_v25 = vld [vmem:[%s4550_s22 + $0x54] ss:$8 sps:$4 sm:$0xff]  }
 0xf9f   : > { %3286 = vmatpush1.bf16.msra.mxu1 %v4347_v7 }
 0xfa0   : > { %3287 = vmatprep.subr.bf16.mxu1 %v4352_v25 }
 0xfa1   : > { %v2578_v10 = vpop.f32.mrb[68].mxu1 }
 0xfa2   : > { %v4145_v38 = vpop.f32.mrb[69].mxu1 }
 0xfa3   : > { %v2581_v11 = vpop.f32.mrb[70].mxu1  ;;  %v4355_v38 = vld [vmem:[%s4550_s22 + $0x64] ss:$8 sps:$4 sm:$0xff]  }
 0xfa4   : > { %v4146_v12 = vpop.f32.mrb[71].mxu1  ;;  %v4353_v11 = vld [vmem:[%s4550_s22 + $0x60] ss:$8 sps:$4 sm:$0xff]  }
 0xfa5   : > { %v4358_v12 = vld [vmem:[%s4550_s22 + $0x74] ss:$8 sps:$4 sm:$0xff]  }
 0xfa9   : > { %v2729_v4 = vpop.f32.mrb[72].mxu1 }
 0xfaa   : > { %2735 = vst.msk [vmem:[#allocation3 + $0x6] sm:$0x3f] %vm915_vm7, %v2729_v4  ;;  %v4159_v6 = vpop.f32.mrb[73].mxu1  ;;  %v4356_v4 = vld [vmem:[%s4550_s22 + $0x70] ss:$8 sps:$4 sm:$0xff]  }
 0xfab   : > { %v2732_v62 = vpop.f32.mrb[74].mxu1  ;;  %v4359_v6 = vld [vmem:[%s4555_s25 + $0x40] sm:$0xff]  }
 0xfac   : > { %v4160_v9 = vpop.f32.mrb[75].mxu1  ;;  %v4360_v62 = vld [vmem:[%s4555_s25] sm:$0xff]   ;;  %3897 = vmatprep.subr.bf16.mxu0 %v4359_v6 }
 0xfad   : > { %v4361_v9 = vld [vmem:[%s4555_s25 + $0x48] sm:$0xff]  }
 0xfb1   : > { %v2837_v16 = vpop.f32.mrb[76].mxu1 }
 0xfb2   : > { %2844 = vrot.lane.b32.xlu1 %v2837_v16, %s4474_s18  ;;  %v4173_v13 = vpop.f32.mrb[77].mxu1  ;;  %v4362_v16 = vld [vmem:[%s4555_s25 + $0x8] sm:$0xff]  }
 0xfb3   : > { %v2840_v24 = vpop.f32.mrb[78].mxu1  ;;  %v4363_v13 = vld [vmem:[%s4555_s25 + $0x50] sm:$0xff]  }
 0xfb4   : > { %v4174_v40 = vpop.f32.mrb[79].mxu1  ;;  %v4364_v24 = vld [vmem:[%s4555_s25 + $0x10] sm:$0xff]  }
 0xfb5   : > { %v4365_v40 = vld [vmem:[%s4555_s25 + $0x58] sm:$0xff]  }
 0xfb6   : > { %2585 = vrot.lane.b32.xlu1 %v2578_v10, %s4471_s11  ;;  %v4350_v10 = vld [vmem:[%s4550_s22 + $0x50] ss:$8 sps:$4 sm:$0xff]  }
 0xfb7   : > { %3288 = vmatpush1.bf16.msra.mxu1 %v4350_v10 }
 0xfb8   : > { %3289 = vmatprep.subr.bf16.mxu1 %v4355_v38 }
 0xfbb   : > { %3290 = vmatpush1.bf16.msra.mxu1 %v4353_v11 }
 0xfbc   : > { %3291 = vmatprep.subr.bf16.mxu1 %v4358_v12 }
 0xfbf   : > { %3292 = vmatpush1.bf16.msra.mxu1 %v4356_v4 }
 0xfd2   : > { %v2948_v63 = vpop.f32.mrb[80].mxu1 }
 0xfd3   : > { %2955 = vrot.lane.b32.xlu0 %v2948_v63, %s4472_s13  ;;  %v4187_v56 = vpop.f32.mrb[81].mxu1  ;;  %v4366_v63 = vld [vmem:[%s4555_s25 + $0x18] sm:$0xff]  }
 0xfd4   : > { %v2951_v0 = vpop.f32.mrb[82].mxu1  ;;  %v4367_v56 = vld [vmem:[%s4555_s25 + $0x60] sm:$0xff]  }
 0xfd5   : > { %v4188_v1 = vpop.f32.mrb[83].mxu1  ;;  %v4368_v0 = vld [vmem:[%s4555_s25 + $0x20] sm:$0xff]  }
 0xfd6   : > { %v4369_v1 = vld [vmem:[%s4555_s25 + $0x68] sm:$0xff]  }
 0xfda   : > { %v3059_v14 = vpop.f32.mrb[84].mxu1 }
 0xfdb   : > { %3066 = vrot.lane.b32.xlu0 %v3059_v14, %s4471_s11  ;;  %v4201_v15 = vpop.f32.mrb[85].mxu1 }
 0xfdc   : > { %v3062_v53 = vpop.f32.mrb[86].mxu1 }
 0xfdd   : > { %v4202_v35 = vpop.f32.mrb[87].mxu1 }
 0xff1   : > { %v2364_v37 = vpop.permute.xlu1 %2363 }
 0xff2   : > { %2366 = vst.msk [vmem:[#allocation3] sm:$0x3f] %vm1030_vm8, %v2364_v37 }
0x100c   : > { %v2475_v21 = vpop.permute.xlu1 %2474 }
0x100d   : > { %2477 = vst.msk [vmem:[#allocation3] sm:$0x3f] %vm1143_vm9, %v2475_v21 }
0x1024   : > { %v2845_v26 = vpop.permute.xlu1 %2844 }
0x1025   : > { %2847 = vst.msk [vmem:[#allocation3 + $0x6] sm:$0x3f] %vm1030_vm8, %v2845_v26  ;;  %v5182_v26 = vld [vmem:[%s4560_s29 + $0x18] sm:$0xf] }
0x1028   : > { %v2586_v28 = vpop.permute.xlu1 %2585 }
0x1029   : > { %2588 = vst.msk [vmem:[#allocation3] sm:$0x3f] %vm1256_vm10, %v2586_v28 }
0x1045   : > { %v2956_v19 = vpop.permute.xlu0 %2955 }
0x1046   : > { %2958 = vst.msk [vmem:[#allocation3 + $0x6] sm:$0x3f] %vm1143_vm9, %v2956_v19 }
0x104d   : > { %v3067_v20 = vpop.permute.xlu0 %3066 }
0x104e   : > { %3069 = vst.msk [vmem:[#allocation3 + $0x6] sm:$0x3f] %vm1256_vm10, %v3067_v20  ;;  %v3179_v20 = vrot.slane %v5182_v26, %v4601_v32  ;;  %v4372_v32 = vld [vmem:[%s4555_s25 + $0x30] sm:$0xff]  }
0x1055   : > { %v3070_v22 = vld [vmem:[#allocation3] sm:$0xff]  ;;  %v3071_v23 = vld [vmem:[#allocation3 + $0x8] sm:$0xf] }
0x1056   : > { %v3072_v27 = vpack.c.bf16 %v3071_v23, %v3070_v22 }
0x1058   : > { %4220 = vmatmul.mubr.bf16.vlgmr.msra.gmra.mrb[60].mxu0 %v3072_v27 }
0x1059   : > { %3898 = vmatpush3.bf16.msra.mxu0 %v4360_v62 }
0x105a   : > { %3899 = vmatprep.subr.bf16.mxu0 %v4361_v9 }
0x105d   : > { %3900 = vmatpush3.bf16.msra.mxu0 %v4362_v16 }
0x105e   : > { %3901 = vmatprep.subr.bf16.mxu0 %v4363_v13 }
0x1061   : > { %3902 = vmatpush3.bf16.msra.mxu0 %v4364_v24 }
0x1062   : > { %3903 = vmatprep.subr.bf16.mxu0 %v4365_v40 }
0x1065   : > { %3904 = vmatpush3.bf16.msra.mxu0 %v4366_v63 }
0x1066   : > { %3905 = vmatprep.subr.bf16.mxu0 %v4367_v56 }
0x1069   : > { %3906 = vmatpush3.bf16.msra.mxu0 %v4368_v0 }
0x106a   : > { %3907 = vmatprep.subr.bf16.mxu0 %v4369_v1 }
0x112b   : > { %v3143_v39 = vpop.f32.mrb[60].mxu0 }
0x112c   : > { %v3144_v41 = vadd.f32 %v3143_v39, %v3076_v34  ;;  %v4221_v29 = vpop.f32.mrb[61].mxu0 }
0x112d   : > { %v3146_v42 = vpop.f32.mrb[62].mxu0 }
0x112e   : > { %v3150_v36 = vadd.f32 %v3144_v41, %v4929_v57  ;;  %v3147_v43 = vadd.f32 %v3146_v42, %v3076_v34  ;;  %v4222_v44 = vpop.f32.mrb[63].mxu0  ;;  %v3185_v34 = vrot.slane %v5182_v26, %v4767_v61  ;;  %v4455_v61 = vld [vmem:[%s4560_s29] sm:$0xff] }
0x112f   : > { %v4373_v44 = vld [vmem:[%s4555_s25 + $0x78] sm:$0xff]   ;;  %v3329_v25 = vrot.slane %v4455_v61, %v3328_v45 }
0x1130   : > { %v3151_v46 = vadd.f32 %v3147_v43, %v4931_v58  ;;  %3152 = vadd.xlane.f32.xlu0 %v3150_v36  ;;  %v4371_v43 = vld [vmem:[%s4555_s25 + $0x70] sm:$0xff]  }
0x1132   : > { %v3154_v18 = vsel %vm1840_vm11, %v3151_v46, 0.0 }
0x1133   : > { %3155 = vadd.xlane.f32.xlu1 %v3154_v18  ;;  %v3191_v18 = vsub.s32 4, %v4597_v30 }
0x1135   : > { %v3192_v47 = vrot.slane %v4455_v61, %v3191_v18  ;;  %v3196_v50 = vrot.slane %v4456_v48, %v3191_v18 }
0x11bd   : > { %v3153_v57 = vpop.xlane.xlu0 %3152 }
0x11be   : > { %v3157_v51 = vmul.f32 0.0078125, %v3153_v57 }
0x11c0   : > { %v5149_v54 = vsub.f32 %v3150_v36, %v3157_v51  ;;  %v3156_v58 = vpop.xlane.xlu1 %3155  ;;  %v4370_v36 = vld [vmem:[%s4555_s25 + $0x28] sm:$0xff]  }
0x11c1   : > { %v3158_v55 = vmul.f32 0.0078125, %v3156_v58  ;;  %3908 = vmatpush3.bf16.msra.mxu0 %v4370_v36 }
0x11c2   : > { %v3161_v60 = vmul.f32 %v5149_v54, %v5149_v54  ;;  %3909 = vmatprep.subr.bf16.mxu0 %v4371_v43 }
0x11c3   : > { %v5153_v33 = vsub.f32 %v3151_v46, %v3158_v55  ;;  %v4374_v46 = vld [vmem:[%s4555_s25 + $0x38] sm:$0xff]  }
0x11c4   : > { %3163 = vadd.xlane.f32.xlu0 %v3161_v60 }
0x11c5   : > { %v3162_v59 = vmul.f32 %v5153_v33, %v5153_v33  ;;  %3910 = vmatpush3.bf16.msra.mxu0 %v4372_v32 }
0x11c6   : > { %3911 = vmatprep.subr.bf16.mxu0 %v4373_v44 }
0x11c7   : > { %v3165_v2 = vsel %vm1840_vm11, %v3162_v59, 0.0 }
0x11c8   : > { %3166 = vadd.xlane.f32.xlu1 %v3165_v2 }
0x11c9   : > { %3912 = vmatpush3.bf16.msra.mxu0 %v4374_v46 }
0x1251   : > { %v3164_v14 = vpop.xlane.xlu0 %3163 }
0x1252   : > { %v3168_v15 = vmul.f32 0.0078125, %v3164_v14 }
0x1254   : > { %v3170_v53 = vadd.f32 1e-05, %v3168_v15 }
0x1255   : > { %v3167_v35 = vpop.xlane.xlu1 %3166 }
0x1256   : > { %4443 = vrsqrt.f32 %v3170_v53  ;;  %v3169_v37 = vmul.f32 0.0078125, %v3167_v35 }
0x1258   : > { %v3171_v21 = vadd.f32 1e-05, %v3169_v37 }
0x125a   : > { %4445 = vrsqrt.f32 %v3171_v21 }
0x1260   : > { %v4444_v28 = vpop.eup %4443 }
0x1261   : > { %v3174_v19 = vmul.f32 %v4444_v28, %v5149_v54 }
0x1263   : > { %v3180_v27 = vmul.f32 %v3179_v20, %v3174_v19 }
0x1264   : > { %v4446_v22 = vpop.eup %4445 }
0x1265   : > { %v3175_v23 = vmul.f32 %v4446_v22, %v5153_v33  ;;  %v3186_v41 = vadd.f32 %v3185_v34, %v3180_v27  ;;  %v3496_v22 = vrot.slane %v5182_v26, %v4912_v17  ;;  %v3502_v27 = vrot.slane %v5182_v26, %v3075_v31 }
0x1267   : > { %v3181_v39 = vmul.f32 %v3179_v20, %v3175_v23 }
0x1269   : > { %v3187_v29 = vadd.f32 %v3185_v34, %v3181_v39 }
0x126b   : > { %v3188_v42 = vpack.c.bf16 %v3187_v29, %v3186_v41 }
0x126d   : > { %3310 = vmatmul.mubr.bf16.vlgmr.msra.gmra.mrb[88].mxu1 %v3188_v42 }
0x1340   : > { %v3311_v49 = vpop.f32.mrb[88].mxu1 }
0x1341   : > { %v3312_v57 = vadd.f32 %v3311_v49, %v3192_v47  ;;  %v3313_v51 = vpop.f32.mrb[89].mxu1 }
0x1342   : > { %v3314_v54 = vadd.f32 %v3313_v51, %v3196_v50  ;;  %v3315_v58 = vpop.f32.mrb[90].mxu1 }
0x1343   : > { %v3316_v55 = vadd.f32 %v3315_v58, %v3192_v47  ;;  %v3317_v60 = vpop.f32.mrb[91].mxu1  ;;  %v3320_v59 = vmax.f32 %v3312_v57, 0.0 }
0x1344   : > { %v3318_v33 = vadd.f32 %v3317_v60, %v3196_v50  ;;  %v3321_v3 = vmax.f32 %v3314_v54, 0.0 }
0x1345   : > { %v3322_v2 = vmax.f32 %v3316_v55, 0.0 }
0x1346   : > { %v3323_v5 = vmax.f32 %v3318_v33, 0.0  ;;  %v3773_v33 = vld [vmem:[%s5232_s8] ss:$0 sm:$0xff] (!%p3772_p5) }
0x1347   : > { %v3324_v8 = vpack.c.bf16 %v3322_v2, %v3320_v59  ;;  %v3774_v2 = vld [vmem:[%s5232_s8 + $0x1] ss:$0 sm:$0xff] (!%p3772_p5) }
0x1348   : > { %v3325_v52 = vpack.c.bf16 %v3323_v5, %v3321_v3 }
0x134a   : > { %3458 = vmatprep.mubr.bf16.mxu0 %v3325_v52 }
0x134b   : > { %3459 = vmatmul.mubr.bf16.vlgmr.msra.gmra.mrb[64].mxu0 %v3324_v8 }
0x141e   : > { %v3913_v7 = vpop.f32.mrb[64].mxu0 }
0x141f   : > { %v3914_v10 = vpop.f32.mrb[65].mxu0 }
0x1420   : > { %v3915_v38 = vadd.f32 %v3914_v10, %v3913_v7  ;;  %v3916_v11 = vpop.f32.mrb[66].mxu0 }
0x1421   : > { %v3917_v12 = vpop.f32.mrb[67].mxu0 }
0x1422   : > { %v3461_v4 = vadd.f32 %v3915_v38, %v3329_v25  ;;  %v3918_v6 = vadd.f32 %v3917_v12, %v3916_v11 }
0x1424   : > { %v3464_v62 = vadd.f32 %v3918_v6, %v3329_v25  ;;  %v3467_v9 = vadd.f32 %v3461_v4, %v3186_v41 }
0x1426   : > { %3469 = vadd.xlane.f32.xlu1 %v3467_v9  ;;  %v3468_v16 = vadd.f32 %v3464_v62, %v3187_v29 }
0x1428   : > { %v3471_v13 = vsel %vm1840_vm11, %v3468_v16, 0.0 }
0x1429   : > { %3472 = vadd.xlane.f32.xlu0 %v3471_v13 }
0x14b3   : > { %v3470_v24 = vpop.xlane.xlu1 %3469 }
0x14b4   : > { %v3474_v40 = vmul.f32 0.0078125, %v3470_v24 }
0x14b6   : > { %v3476_v63 = vsub.f32 %v3467_v9, %v3474_v40  ;;  %v3473_v56 = vpop.xlane.xlu0 %3472 }
0x14b7   : > { %v3475_v0 = vmul.f32 0.0078125, %v3473_v56 }
0x14b8   : > { %v3478_v1 = vmul.f32 %v3476_v63, %v3476_v63 }
0x14b9   : > { %v3477_v14 = vsub.f32 %v3468_v16, %v3475_v0 }
0x14ba   : > { %3480 = vadd.xlane.f32.xlu0 %v3478_v1 }
0x14bb   : > { %v3479_v15 = vmul.f32 %v3477_v14, %v3477_v14 }
0x14bd   : > { %v3482_v53 = vsel %vm1840_vm11, %v3479_v15, 0.0 }
0x14be   : > { %3483 = vadd.xlane.f32.xlu1 %v3482_v53 }
0x1547   : > { %v3481_v35 = vpop.xlane.xlu0 %3480 }
0x1548   : > { %v3485_v37 = vmul.f32 0.0078125, %v3481_v35 }
0x154a   : > { %v3487_v21 = vadd.f32 1e-05, %v3485_v37 }
0x154b   : > { %v3484_v28 = vpop.xlane.xlu1 %3483 }
0x154c   : > { %4447 = vrsqrt.f32 %v3487_v21  ;;  %v3486_v19 = vmul.f32 0.0078125, %v3484_v28 }
0x154e   : > { %v3488_v20 = vadd.f32 1e-05, %v3486_v19 }
0x1550   : > { %4449 = vrsqrt.f32 %v3488_v20 }
0x1556   : > { %v4448_v23 = vpop.eup %4447 }
0x1557   : > { %v3491_v34 = vmul.f32 %v4448_v23, %v3476_v63 }
0x1559   : > { %v3497_v39 = vmul.f32 %v3496_v22, %v3491_v34 }
0x155a   : > { %v4450_v41 = vpop.eup %4449 }
0x155b   : > { %v3503_v29 = vadd.f32 %v3502_v27, %v3497_v39  ;;  %v3492_v42 = vmul.f32 %v4450_v41, %v3477_v14  ;;  %3510 = sbr.rel (%p3772_p5) target bundleno = 5802 (0x16aa), region = 64 }
0x155d   : > { %3505 = vst [vmem:[#allocation2] sm:$0xff] %v3503_v29  ;;  %v3498_v36 = vmul.f32 %v3496_v22, %v3492_v42 }
0x155f   : > { %v3504_v43 = vadd.f32 %v3502_v27, %v3498_v36 }
0x1561   : > { %3506 = vst [vmem:[#allocation2 + $0x8] sm:$0xf] %v3504_v43 }
0x1564   : > { %v3511_v44 = vld [vmem:[#allocation2] sm:$0xff] }
0x1568   : > { %v3512_v32 = vld [vmem:[#allocation2 + $0x8] sm:$0xf] }
0x1569   : > { %v3517_v17 = vsel %vm1840_vm11, %v3512_v32, 0.0 }
0x156a   : > { %3518 = vadd.xlane.f32.xlu0 %v3517_v17 }
0x156e   : > { %3515 = vadd.xlane.f32.xlu0 %v3511_v44 }
0x15f7   : > { %v3519_v30 = vpop.xlane.xlu0 %3518 }
0x15f8   : > { %v3521_v31 = vmul.f32 0.0078125, %v3519_v30 }
0x15fa   : > { %v3523_v18 = vsub.f32 %v3512_v32, %v3521_v31 }
0x15fb   : > { %v3516_v26 = vpop.xlane.xlu0 %3515 }
0x15fc   : > { %v3520_v46 = vmul.f32 0.0078125, %v3516_v26  ;;  %v3525_v48 = vmul.f32 %v3523_v18, %v3523_v18 }
0x15fe   : > { %v3522_v61 = vsub.f32 %v3511_v44, %v3520_v46  ;;  %v3528_v50 = vsel %vm1840_vm11, %v3525_v48, 0.0 }
0x1600   : > { %v3524_v47 = vmul.f32 %v3522_v61, %v3522_v61 }
0x1602   : > { %3526 = vadd.xlane.f32.xlu1 %v3524_v47 }
0x1606   : > { %3529 = vadd.xlane.f32.xlu1 %v3528_v50 }
0x168f   : > { %v3527_v49 = vpop.xlane.xlu1 %3526 }
0x1690   : > { %v3531_v57 = vmul.f32 0.0078125, %v3527_v49 }
0x1692   : > { %v3533_v51 = vadd.f32 1e-05, %v3531_v57 }
0x1693   : > { %v3530_v54 = vpop.xlane.xlu1 %3529 }
0x1694   : > { %4457 = vrsqrt.f32 %v3533_v51  ;;  %v3532_v58 = vmul.f32 0.0078125, %v3530_v54 }
0x1696   : > { %v3534_v55 = vadd.f32 1e-05, %v3532_v58 }
0x1698   : > { %4459 = vrsqrt.f32 %v3534_v55 }
0x169e   : > { %v4458_v60 = vpop.eup %4457 }
0x169f   : > { %v3537_v59 = vmul.f32 %v4458_v60, %v3522_v61 }
0x16a1   : > { %v3543_v3 = vmul.f32 %v3773_v33, %v3537_v59 }
0x16a2   : > { %v4460_v5 = vpop.eup %4459 }
0x16a3   : > { %v3549_v8 = vadd.f32 %v3774_v2, %v3543_v3  ;;  %v3538_v52 = vmul.f32 %v4460_v5, %v3523_v18 }
0x16a5   : > { %3551 = vst [vmem:[%s5233_s9] sm:$0xff] %v3549_v8  ;;  %v3544_v45 = vmul.f32 %v3773_v33, %v3538_v52 }
0x16a7   : > { %v3550_v7 = vadd.f32 %v3774_v2, %v3544_v45 }
0x16a9   : > { %3552 = vst [vmem:[%s5233_s9 + $0x8] sm:$0xf] %v3550_v7 }
0x16aa PF: > { %s19_s30 = sadd.s32 1, %s4467_s30  }
0x16ab   : > { %p16_p6 = scmp.ge.s32.totalorder %s19_s30, 4  }
0x16ad   :  { %18 = sbr.rel (!%p16_p6) target bundleno = 1 (0x1), region = 102 }

</bundles_post_ra>
